<compile_context>
chip_gen: v6e
topology: v6e:2x2x1
jax: 0.10.0
libtpu: 0.0.40
codegen_flags: <defaults>
</compile_context>

<pallas_src>
import functools
import numpy as np
import jax
import jax.numpy as jnp
from jax import lax
from jax.experimental import pallas as pl
from jax.experimental.pallas import tpu as pltpu


def _round_up(x, m):
    return ((x + m - 1) // m) * m


# ----------------------------------------------------------------------------
# Pallas kernel 1: tiled matmul + bias  (bf16 x bf16 -> f32 accumulate)
# ----------------------------------------------------------------------------

def _matmul_bias_kernel(a_ref, b_ref, bias_ref, o_ref, acc_ref):
    k = pl.program_id(2)

    @pl.when(k == 0)
    def _init():
        # Bias folded into accumulator init: added exactly once per output tile.
        acc_ref[...] = jnp.broadcast_to(bias_ref[...], acc_ref.shape)

    acc_ref[...] += jnp.dot(a_ref[...], b_ref[...],
                            preferred_element_type=jnp.float32)

    @pl.when(k == pl.num_programs(2) - 1)
    def _store():
        o_ref[...] = acc_ref[...]


def pallas_matmul_bias(a, b, bias, *, tm_max=256, tn_max=256, tk_max=512):
    """out[m, n] = sum_k a[m, k] * b[k, n] + bias[n].

    a, b: bf16 (or f32); bias: f32; output: f32.  M/N/K are padded up to tile
    multiples so every block is (8,128)-aligned and stores are lane-dense.
    """
    M, K = a.shape
    K2, N = b.shape
    assert K == K2 and bias.shape == (N,)

    tm = min(tm_max, _round_up(M, 8))
    tn = min(tn_max, _round_up(N, 128))
    tk = min(tk_max, _round_up(K, 128))
    Mp, Np, Kp = _round_up(M, tm), _round_up(N, tn), _round_up(K, tk)

    if (Mp, Kp) != (M, K):
        a = jnp.pad(a, ((0, Mp - M), (0, Kp - K)))
    if (Kp, Np) != (K, N):
        b = jnp.pad(b, ((0, Kp - K), (0, Np - N)))
    bias_p = bias if Np == N else jnp.pad(bias, (0, Np - N))
    bias_p = bias_p.reshape(1, Np).astype(jnp.float32)

    grid = (Mp // tm, Np // tn, Kp // tk)
    out = pl.pallas_call(
        _matmul_bias_kernel,
        out_shape=jax.ShapeDtypeStruct((Mp, Np), jnp.float32),
        grid_spec=pltpu.PrefetchScalarGridSpec(
            num_scalar_prefetch=0,
            grid=grid,
            in_specs=[
                pl.BlockSpec((tm, tk), lambda i, j, k: (i, k)),
                pl.BlockSpec((tk, tn), lambda i, j, k: (k, j)),
                pl.BlockSpec((1, tn), lambda i, j, k: (0, j)),
            ],
            out_specs=pl.BlockSpec((tm, tn), lambda i, j, k: (i, j)),
            scratch_shapes=[pltpu.VMEM((tm, tn), jnp.float32)],
        ),
        compiler_params=pltpu.CompilerParams(
            dimension_semantics=("parallel", "parallel", "arbitrary"),
            # Tiles above are ~1-2 MiB; this just leaves double-buffering
            # headroom while staying safely under v7x's 64 MiB physical VMEM.
            vmem_limit_bytes=48 * 1024 * 1024,
        ),
    )(a, b, bias_p)
    if (Mp, Np) != (M, N):
        out = out[:M, :N]
    return out


# ----------------------------------------------------------------------------
# Pallas kernel 2: GroupNorm + ReLU (lane-dense channel folding)
# ----------------------------------------------------------------------------

def _gn_relu_kernel(x_ref, gmat_ref, gamma_ref, beta_ref, o_ref, *, eps):
    xv = x_ref[0]                                   # (S/f, f*C) float32
    s1 = jnp.sum(xv, axis=0, keepdims=True)         # folded per-channel sum
    s2 = jnp.sum(xv * xv, axis=0, keepdims=True)    # folded per-channel sumsq
    # Fold-aware group-averaging matrix -> per-(folded)channel mean / E[x^2].
    mean = jnp.dot(s1, gmat_ref[...], preferred_element_type=jnp.float32)
    ex2 = jnp.dot(s2, gmat_ref[...], preferred_element_type=jnp.float32)
    var = jnp.maximum(ex2 - mean * mean, 0.0)       # guard f32 cancellation
    scale = lax.rsqrt(var + eps) * gamma_ref[...]   # (1, f*C)
    shift = beta_ref[...] - mean * scale            # (1, f*C)
    o_ref[0] = jnp.maximum(xv * scale + shift, 0.0)  # fused ReLU


def pallas_groupnorm_relu(x, gamma, beta, num_groups, eps=1e-5):
    """x: (N, S, C) channels-last, S = D*H*W. Returns relu(groupnorm(x))."""
    N, S, C = x.shape
    gc = C // num_groups
    # Fold spatial rows into lanes so the last dim fills all 128 lanes even
    # for C < 128 layers (lane-dense vregs + unmasked stores).
    f = max(1, 128 // C)
    if S % f != 0:
        f = 1
    Sf, fC = S // f, f * C
    xf = x.reshape(N, Sf, fC)

    gid = jnp.tile(jnp.arange(C, dtype=jnp.int32) // gc, f)          # (fC,)
    gmat = (gid[:, None] == gid[None, :]).astype(jnp.float32) / float(gc * S)
    gamma_f = jnp.tile(gamma.astype(jnp.float32), f).reshape(1, fC)
    beta_f = jnp.tile(beta.astype(jnp.float32), f).reshape(1, fC)

    kernel = functools.partial(_gn_relu_kernel, eps=eps)
    y = pl.pallas_call(
        kernel,
        out_shape=jax.ShapeDtypeStruct((N, Sf, fC), jnp.float32),
        grid=(N,),
        in_specs=[
            pl.BlockSpec((1, Sf, fC), lambda n: (n, 0, 0)),
            pl.BlockSpec((fC, fC), lambda n: (0, 0)),
            pl.BlockSpec((1, fC), lambda n: (0, 0)),
            pl.BlockSpec((1, fC), lambda n: (0, 0)),
        ],
        out_specs=pl.BlockSpec((1, Sf, fC), lambda n: (n, 0, 0)),
        compiler_params=pltpu.CompilerParams(
            dimension_semantics=("parallel",)),
    )(xf, gmat, gamma_f, beta_f)
    return y.reshape(N, S, C)


# ----------------------------------------------------------------------------
# Glue: im2col (pure slicing, bf16) + conv wrapper around the Pallas matmul
# ----------------------------------------------------------------------------

def im2col3d(x, ksize, stride, pad):
    """x: (N, D, H, W, C) -> patches (N*Do*Ho*Wo, ksize^3 * C), out dims."""
    N, D, H, W, C = x.shape
    xp = jnp.pad(x, ((0, 0), (pad, pad), (pad, pad), (pad, pad), (0, 0)))
    Do = (D + 2 * pad - ksize) // stride + 1
    Ho = (H + 2 * pad - ksize) // stride + 1
    Wo = (W + 2 * pad - ksize) // stride + 1
    pats = []
    for kd in range(ksize):
        for kh in range(ksize):
            for kw in range(ksize):
                pats.append(xp[:, kd:kd + stride * Do:stride,
                                  kh:kh + stride * Ho:stride,
                                  kw:kw + stride * Wo:stride, :])
    p = jnp.stack(pats, axis=-2)                    # (N,Do,Ho,Wo,k^3,C)
    return p.reshape(N * Do * Ho * Wo, ksize ** 3 * C), (N, Do, Ho, Wo)


def conv3d(x, w, b, stride, pad):
    """x: (N, D, H, W, C_in); w: (C_out, C_in, k, k, k) (PyTorch layout)."""
    # TODO(synk): replace the materialized im2col with a tap-decomposed /
    # fused-gather DMA conv so the ~8x-duplicated patch matrix never round
    # trips HBM (the remaining memory-bound part of this pipeline).
    cout, cin, ks, _, _ = w.shape
    a, (N, Do, Ho, Wo) = im2col3d(x.astype(jnp.bfloat16), ks, stride, pad)
    w2 = jnp.transpose(w, (2, 3, 4, 1, 0)).reshape(ks ** 3 * cin, cout)
    y = pallas_matmul_bias(a, w2.astype(jnp.bfloat16), b.astype(jnp.float32))
    return y.reshape(N, Do, Ho, Wo, cout)


# ----------------------------------------------------------------------------
# Sub_Encoder: params + forward
# ----------------------------------------------------------------------------

def init_sub_encoder_params(key, channel, latent_dim):
    c4, c2 = channel // 4, channel // 2
    ks = jax.random.split(key, 16)

    def conv_w(k, cout, cin, ksize):
        fan = cin * ksize ** 3
        return (jax.random.normal(k, (cout, cin, ksize, ksize, ksize),
                                  jnp.float32) / np.sqrt(fan))

    return {
        "conv2_w": conv_w(ks[0], c4, c4, 4),
        "conv2_b": 0.01 * jax.random.normal(ks[1], (c4,), jnp.float32),
        "bn2_g": 1.0 + 0.1 * jax.random.normal(ks[2], (c4,), jnp.float32),
        "bn2_b": 0.1 * jax.random.normal(ks[3], (c4,), jnp.float32),
        "conv3_w": conv_w(ks[4], c2, c4, 4),
        "conv3_b": 0.01 * jax.random.normal(ks[5], (c2,), jnp.float32),
        "bn3_g": 1.0 + 0.1 * jax.random.normal(ks[6], (c2,), jnp.float32),
        "bn3_b": 0.1 * jax.random.normal(ks[7], (c2,), jnp.float32),
        "conv4_w": conv_w(ks[8], channel, c2, 4),
        "conv4_b": 0.01 * jax.random.normal(ks[9], (channel,), jnp.float32),
        "bn4_g": 1.0 + 0.1 * jax.random.normal(ks[10], (channel,), jnp.float32),
        "bn4_b": 0.1 * jax.random.normal(ks[11], (channel,), jnp.float32),
        "conv5_w": conv_w(ks[12], latent_dim, channel, 4),
        "conv5_b": 0.01 * jax.random.normal(ks[13], (latent_dim,), jnp.float32),
    }


def sub_encoder_forward(params, h, latent_dim):
    """h: (N, C_in, D, H, W) exactly like the PyTorch module's input."""
    x = jnp.transpose(h, (0, 2, 3, 4, 1))           # NCDHW -> NDHWC

    def gn_relu(x, g, b):
        N, D, H, W, C = x.shape
        y = pallas_groupnorm_relu(x.reshape(N, D * H * W, C), g, b, 8)
        return y.reshape(N, D, H, W, C)

    x = conv3d(x, params["conv2_w"], params["conv2_b"], stride=2, pad=1)
    x = gn_relu(x, params["bn2_g"], params["bn2_b"])
    x = conv3d(x, params["conv3_w"], params["conv3_b"], stride=2, pad=1)
    x = gn_relu(x, params["bn3_g"], params["bn3_b"])
    x = conv3d(x, params["conv4_w"], params["conv4_b"], stride=2, pad=1)
    x = gn_relu(x, params["bn4_g"], params["bn4_b"])
    x = conv3d(x, params["conv5_w"], params["conv5_b"], stride=1, pad=0)
    # AdaptiveAvgPool3d((1,1,1)) + squeeze: mean over (tiny) spatial dims (glue)
    out = x.mean(axis=(1, 2, 3))
    assert out.shape[1:] == (latent_dim,)
    return out


# ----------------------------------------------------------------------------
# Pure-JAX reference (for correctness sanity checks)
# ----------------------------------------------------------------------------

def _conv_ref(x, w, b, stride, pad, conv_dtype):
    w_dhwio = jnp.transpose(w, (2, 3, 4, 1, 0)).astype(conv_dtype)
    y = lax.conv_general_dilated(
        x.astype(conv_dtype), w_dhwio, window_strides=(stride,) * 3,
        padding=[(pad, pad)] * 3,
        dimension_numbers=("NDHWC", "DHWIO", "NDHWC"),
        preferred_element_type=jnp.float32)
    return y + b


def _gn_relu_ref(x, g, b, G, eps=1e-5):
    N, D, H, W, C = x.shape
    xg = x.reshape(N, D * H * W, G, C // G)
    mean = xg.mean(axis=(1, 3), keepdims=True)
    var = xg.var(axis=(1, 3), keepdims=True)
    xn = ((xg - mean) / jnp.sqrt(var + eps)).reshape(N, D, H, W, C)
    return jnp.maximum(xn * g + b, 0.0)


def sub_encoder_ref(params, h, latent_dim, conv_dtype=jnp.float32):
    x = jnp.transpose(h, (0, 2, 3, 4, 1))
    x = _gn_relu_ref(_conv_ref(x, params["conv2_w"], params["conv2_b"], 2, 1,
                               conv_dtype),
                     params["bn2_g"], params["bn2_b"], 8)
    x = _gn_relu_ref(_conv_ref(x, params["conv3_w"], params["conv3_b"], 2, 1,
                               conv_dtype),
                     params["bn3_g"], params["bn3_b"], 8)
    x = _gn_relu_ref(_conv_ref(x, params["conv4_w"], params["conv4_b"], 2, 1,
                               conv_dtype),
                     params["bn4_g"], params["bn4_b"], 8)
    x = _conv_ref(x, params["conv5_w"], params["conv5_b"], 1, 0, conv_dtype)
    return x.mean(axis=(1, 2, 3))


# ----------------------------------------------------------------------------

if __name__ == "__main__":
    # Small, self-consistent shapes (PyTorch defaults are channel=256,
    # latent_dim=1024 with larger spatial; scaled down here).
    channel, latent_dim = 32, 64
    N, C_in, S = 2, channel // 4, 32   # 32 -> 16 -> 8 -> 4 -> conv5(k=4) -> 1

    key = jax.random.PRNGKey(0)
    pkey, xkey = jax.random.split(key)
    params = init_sub_encoder_params(pkey, channel, latent_dim)
    h = jax.random.normal(xkey, (N, C_in, S, S, S), jnp.float32)

    fwd = jax.jit(functools.partial(sub_encoder_forward, latent_dim=latent_dim))
    out = jax.block_until_ready(fwd(params, h))
    assert out.shape == (N, latent_dim)

    # Numerics-matched reference (bf16 conv operands, f32 accumulation).
    ref_bf16 = jax.block_until_ready(
        sub_encoder_ref(params, h, latent_dim, conv_dtype=jnp.bfloat16))
    err = float(jnp.max(jnp.abs(out - ref_bf16)))
    assert err < 2e-2, f"mismatch vs bf16-matched reference: {err}"

    # Loose sanity check vs the full-f32 reference (bf16 rounding tolerance).
    ref_f32 = jax.block_until_ready(
        sub_encoder_ref(params, h, latent_dim, conv_dtype=jnp.float32))
    err32 = float(jnp.max(jnp.abs(out - ref_f32)))
    assert err32 < 2e-1, f"mismatch vs f32 reference: {err32}"

    print("KERNEL_OK")
</pallas_src>

<mosaic_0001>
module attributes {stable_mosaic.version = 11 : i64} {
  func.func @_matmul_bias_kernel(%arg0: i32, %arg1: i32, %arg2: i32, %arg3: memref<256x512xbf16, #tpu.memory_space<vmem>>, %arg4: memref<512x128xbf16, #tpu.memory_space<vmem>>, %arg5: memref<1x128xf32, #tpu.memory_space<vmem>>, %arg6: memref<256x128xf32, #tpu.memory_space<vmem>>, %arg7: memref<256x128xf32, #tpu.memory_space<vmem>>) attributes {dimension_semantics = [#tpu.dimension_semantics<parallel>, #tpu.dimension_semantics<parallel>, #tpu.dimension_semantics<arbitrary>], iteration_bounds = array<i64: 32, 1, 1>, scalar_prefetch = 0 : i64, scratch_operands = 1 : i64, tpu.core_type = #tpu.core_type<tc>, window_params = [{transform_indices = @transform_0, window_bounds = array<i64: 256, 512>}, {transform_indices = @transform_1, window_bounds = array<i64: 512, 128>}, {transform_indices = @transform_2, window_bounds = array<i64: 1, 128>}, {transform_indices = @transform_3, window_bounds = array<i64: 256, 128>}]} {
    %c0_i32 = arith.constant 0 : i32
    %0 = arith.cmpi eq, %arg2, %c0_i32 : i32
    %1 = arith.extui %0 : i1 to i32
    %c0_i32_0 = arith.constant 0 : i32
    %2 = arith.cmpi ne, %1, %c0_i32_0 : i32
    scf.if %2 {
      %c0_10 = arith.constant 0 : index
      %c0_11 = arith.constant 0 : index
      %12 = vector.load %arg5[%c0_10, %c0_11] : memref<1x128xf32, #tpu.memory_space<vmem>>, vector<1x128xf32>
      %13 = vector.shape_cast %12 : vector<1x128xf32> to vector<1x128xf32>
      %14 = vector.broadcast %13 : vector<1x128xf32> to vector<256x128xf32>
      %c0_12 = arith.constant 0 : index
      %c0_13 = arith.constant 0 : index
      %15 = vector.load %arg7[%c0_12, %c0_13] : memref<256x128xf32, #tpu.memory_space<vmem>>, vector<256x128xf32>
      tpu.vector_store %arg7[%c0_12, %c0_13], %14 {strides = array<i32>} : memref<256x128xf32, #tpu.memory_space<vmem>>, vector<256x128xf32>,
    } else {
    }
    %c0 = arith.constant 0 : index
    %c0_1 = arith.constant 0 : index
    %3 = vector.load %arg7[%c0, %c0_1] : memref<256x128xf32, #tpu.memory_space<vmem>>, vector<256x128xf32>
    %c0_2 = arith.constant 0 : index
    %c0_3 = arith.constant 0 : index
    %4 = vector.load %arg3[%c0_2, %c0_3] : memref<256x512xbf16, #tpu.memory_space<vmem>>, vector<256x512xbf16>
    %c0_4 = arith.constant 0 : index
    %c0_5 = arith.constant 0 : index
    %5 = vector.load %arg4[%c0_4, %c0_5] : memref<512x128xbf16, #tpu.memory_space<vmem>>, vector<512x128xbf16>
    %cst = arith.constant dense<0.000000e+00> : vector<256x128xf32>
    %6 = tpu.matmul %4, %5, %cst {dimension_numbers = #tpu.dot_dimension_numbers<[1], [0], [0], [1], [0, 0, 1, 1], [], []>} : vector<256x512xbf16>, vector<512x128xbf16>, vector<256x128xf32> -> vector<256x128xf32>
    %7 = arith.addf %3, %6 : vector<256x128xf32>
    %c0_6 = arith.constant 0 : index
    %c0_7 = arith.constant 0 : index
    %8 = vector.load %arg7[%c0_6, %c0_7] : memref<256x128xf32, #tpu.memory_space<vmem>>, vector<256x128xf32>
    tpu.vector_store %arg7[%c0_6, %c0_7], %7 {strides = array<i32>} : memref<256x128xf32, #tpu.memory_space<vmem>>, vector<256x128xf32>,
    %c0_i32_8 = arith.constant 0 : i32
    %9 = arith.cmpi eq, %arg2, %c0_i32_8 : i32
    %10 = arith.extui %9 : i1 to i32
    %c0_i32_9 = arith.constant 0 : i32
    %11 = arith.cmpi ne, %10, %c0_i32_9 : i32
    scf.if %11 {
      %c0_10 = arith.constant 0 : index
      %c0_11 = arith.constant 0 : index
      %12 = vector.load %arg7[%c0_10, %c0_11] : memref<256x128xf32, #tpu.memory_space<vmem>>, vector<256x128xf32>
      %c0_12 = arith.constant 0 : index
      %c0_13 = arith.constant 0 : index
      %13 = vector.load %arg6[%c0_12, %c0_13] : memref<256x128xf32, #tpu.memory_space<vmem>>, vector<256x128xf32>
      tpu.vector_store %arg6[%c0_12, %c0_13], %12 {strides = array<i32>} : memref<256x128xf32, #tpu.memory_space<vmem>>, vector<256x128xf32>,
    } else {
    }
    return
  }
  func.func @transform_0(%arg0: i32, %arg1: i32, %arg2: i32) -> (i32, i32) {
    %c0_i32 = arith.constant 0 : i32
    return %arg0, %arg2 : i32, i32
  }
  func.func @transform_1(%arg0: i32, %arg1: i32, %arg2: i32) -> (i32, i32) {
    %c0_i32 = arith.constant 0 : i32
    return %arg2, %arg1 : i32, i32
  }
  func.func @transform_2(%arg0: i32, %arg1: i32, %arg2: i32) -> (i32, i32) {
    %c0_i32 = arith.constant 0 : i32
    %c0_i32_0 = arith.constant 0 : i32
    return %c0_i32, %arg1 : i32, i32
  }
  func.func @transform_3(%arg0: i32, %arg1: i32, %arg2: i32) -> (i32, i32) {
    %c0_i32 = arith.constant 0 : i32
    return %arg0, %arg1 : i32, i32
  }
}

module attributes {stable_mosaic.version = 11 : i64} {
  func.func @_gn_relu_kernel(%arg0: i32, %arg1: memref<1x256x128xf32, #tpu.memory_space<vmem>>, %arg2: memref<128x128xf32, #tpu.memory_space<vmem>>, %arg3: memref<1x128xf32, #tpu.memory_space<vmem>>, %arg4: memref<1x128xf32, #tpu.memory_space<vmem>>, %arg5: memref<1x256x128xf32, #tpu.memory_space<vmem>>) attributes {dimension_semantics = [#tpu.dimension_semantics<parallel>], iteration_bounds = array<i64: 2>, scalar_prefetch = 0 : i64, scratch_operands = 0 : i64, tpu.core_type = #tpu.core_type<tc>, window_params = [{transform_indices = @transform_0, window_bounds = array<i64: 1, 256, 128>}, {pipeline_mode = #tpu.pipeline_mode<synchronous>, transform_indices = @transform_1, window_bounds = array<i64: 128, 128>}, {pipeline_mode = #tpu.pipeline_mode<synchronous>, transform_indices = @transform_2, window_bounds = array<i64: 1, 128>}, {pipeline_mode = #tpu.pipeline_mode<synchronous>, transform_indices = @transform_3, window_bounds = array<i64: 1, 128>}, {transform_indices = @transform_4, window_bounds = array<i64: 1, 256, 128>}]} {
    %c0 = arith.constant 0 : index
    %c0_0 = arith.constant 0 : index
    %c0_1 = arith.constant 0 : index
    %0 = vector.load %arg1[%c0, %c0_0, %c0_1] : memref<1x256x128xf32, #tpu.memory_space<vmem>>, vector<1x256x128xf32>
    %1 = vector.shape_cast %0 : vector<1x256x128xf32> to vector<256x128xf32>
    %cst = arith.constant dense<0.000000e+00> : vector<128xf32>
    %2 = vector.multi_reduction <add>, %1, %cst [0] : vector<256x128xf32> to vector<128xf32>
    %3 = vector.shape_cast %2 : vector<128xf32> to vector<1x128xf32>
    %4 = arith.mulf %1, %1 : vector<256x128xf32>
    %cst_2 = arith.constant dense<0.000000e+00> : vector<128xf32>
    %5 = vector.multi_reduction <add>, %4, %cst_2 [0] : vector<256x128xf32> to vector<128xf32>
    %6 = vector.shape_cast %5 : vector<128xf32> to vector<1x128xf32>
    %c0_3 = arith.constant 0 : index
    %c0_4 = arith.constant 0 : index
    %7 = vector.load %arg2[%c0_3, %c0_4] : memref<128x128xf32, #tpu.memory_space<vmem>>, vector<128x128xf32>
    %cst_5 = arith.constant dense<0.000000e+00> : vector<1x128xf32>
    %8 = tpu.matmul %3, %7, %cst_5 {dimension_numbers = #tpu.dot_dimension_numbers<[1], [0], [0], [1], [0, 0, 1, 1], [], []>} : vector<1x128xf32>, vector<128x128xf32>, vector<1x128xf32> -> vector<1x128xf32>
    %c0_6 = arith.constant 0 : index
    %c0_7 = arith.constant 0 : index
    %9 = vector.load %arg2[%c0_6, %c0_7] : memref<128x128xf32, #tpu.memory_space<vmem>>, vector<128x128xf32>
    %cst_8 = arith.constant dense<0.000000e+00> : vector<1x128xf32>
    %10 = tpu.matmul %6, %9, %cst_8 {dimension_numbers = #tpu.dot_dimension_numbers<[1], [0], [0], [1], [0, 0, 1, 1], [], []>} : vector<1x128xf32>, vector<128x128xf32>, vector<1x128xf32> -> vector<1x128xf32>
    %11 = arith.mulf %8, %8 : vector<1x128xf32>
    %12 = arith.subf %10, %11 : vector<1x128xf32>
    %cst_9 = arith.constant 0.000000e+00 : f32
    %13 = vector.broadcast %cst_9 : f32 to vector<1x128xf32>
    %14 = arith.maximumf %12, %13 : vector<1x128xf32>
    %cst_10 = arith.constant 9.99999974E-6 : f32
    %15 = vector.broadcast %cst_10 : f32 to vector<1x128xf32>
    %16 = arith.addf %14, %15 : vector<1x128xf32>
    %17 = math.rsqrt %16 : vector<1x128xf32>
    %c0_11 = arith.constant 0 : index
    %c0_12 = arith.constant 0 : index
    %18 = vector.load %arg3[%c0_11, %c0_12] : memref<1x128xf32, #tpu.memory_space<vmem>>, vector<1x128xf32>
    %19 = arith.mulf %17, %18 : vector<1x128xf32>
    %c0_13 = arith.constant 0 : index
    %c0_14 = arith.constant 0 : index
    %20 = vector.load %arg4[%c0_13, %c0_14] : memref<1x128xf32, #tpu.memory_space<vmem>>, vector<1x128xf32>
    %21 = arith.mulf %8, %19 : vector<1x128xf32>
    %22 = arith.subf %20, %21 : vector<1x128xf32>
    %23 = vector.broadcast %19 : vector<1x128xf32> to vector<256x128xf32>
    %24 = arith.mulf %1, %23 : vector<256x128xf32>
    %25 = vector.broadcast %22 : vector<1x128xf32> to vector<256x128xf32>
    %26 = arith.addf %24, %25 : vector<256x128xf32>
    %cst_15 = arith.constant 0.000000e+00 : f32
    %27 = vector.broadcast %cst_15 : f32 to vector<256x128xf32>
    %28 = arith.maximumf %26, %27 : vector<256x128xf32>
    %c0_16 = arith.constant 0 : index
    %c0_17 = arith.constant 0 : index
    %c0_18 = arith.constant 0 : index
    %29 = vector.load %arg5[%c0_16, %c0_17, %c0_18] : memref<1x256x128xf32, #tpu.memory_space<vmem>>, vector<1x256x128xf32>
    %30 = vector.shape_cast %29 : vector<1x256x128xf32> to vector<256x128xf32>
    %31 = vector.shape_cast %28 : vector<256x128xf32> to vector<1x256x128xf32>
    tpu.vector_store %arg5[%c0_16, %c0_17, %c0_18], %31 {strides = array<i32>} : memref<1x256x128xf32, #tpu.memory_space<vmem>>, vector<1x256x128xf32>,
    return
  }
  func.func @transform_0(%arg0: i32) -> (i32, i32, i32) {
    %c0_i32 = arith.constant 0 : i32
    %c0_i32_0 = arith.constant 0 : i32
    %c0_i32_1 = arith.constant 0 : i32
    return %arg0, %c0_i32, %c0_i32_0 : i32, i32, i32
  }
  func.func @transform_1(%arg0: i32) -> (i32, i32) {
    %c0_i32 = arith.constant 0 : i32
    %c0_i32_0 = arith.constant 0 : i32
    %c0_i32_1 = arith.constant 0 : i32
    return %c0_i32, %c0_i32_0 : i32, i32
  }
  func.func @transform_2(%arg0: i32) -> (i32, i32) {
    %c0_i32 = arith.constant 0 : i32
    %c0_i32_0 = arith.constant 0 : i32
    %c0_i32_1 = arith.constant 0 : i32
    return %c0_i32, %c0_i32_0 : i32, i32
  }
  func.func @transform_3(%arg0: i32) -> (i32, i32) {
    %c0_i32 = arith.constant 0 : i32
    %c0_i32_0 = arith.constant 0 : i32
    %c0_i32_1 = arith.constant 0 : i32
    return %c0_i32, %c0_i32_0 : i32, i32
  }
  func.func @transform_4(%arg0: i32) -> (i32, i32, i32) {
    %c0_i32 = arith.constant 0 : i32
    %c0_i32_0 = arith.constant 0 : i32
    %c0_i32_1 = arith.constant 0 : i32
    return %arg0, %c0_i32, %c0_i32_0 : i32, i32, i32
  }
}

module attributes {stable_mosaic.version = 11 : i64} {
  func.func @_matmul_bias_kernel(%arg0: i32, %arg1: i32, %arg2: i32, %arg3: memref<256x512xbf16, #tpu.memory_space<vmem>>, %arg4: memref<512x128xbf16, #tpu.memory_space<vmem>>, %arg5: memref<1x128xf32, #tpu.memory_space<vmem>>, %arg6: memref<256x128xf32, #tpu.memory_space<vmem>>, %arg7: memref<256x128xf32, #tpu.memory_space<vmem>>) attributes {dimension_semantics = [#tpu.dimension_semantics<parallel>, #tpu.dimension_semantics<parallel>, #tpu.dimension_semantics<arbitrary>], iteration_bounds = array<i64: 4, 1, 1>, scalar_prefetch = 0 : i64, scratch_operands = 1 : i64, tpu.core_type = #tpu.core_type<tc>, window_params = [{transform_indices = @transform_0, window_bounds = array<i64: 256, 512>}, {transform_indices = @transform_1, window_bounds = array<i64: 512, 128>}, {transform_indices = @transform_2, window_bounds = array<i64: 1, 128>}, {transform_indices = @transform_3, window_bounds = array<i64: 256, 128>}]} {
    %c0_i32 = arith.constant 0 : i32
    %0 = arith.cmpi eq, %arg2, %c0_i32 : i32
    %1 = arith.extui %0 : i1 to i32
    %c0_i32_0 = arith.constant 0 : i32
    %2 = arith.cmpi ne, %1, %c0_i32_0 : i32
    scf.if %2 {
      %c0_10 = arith.constant 0 : index
      %c0_11 = arith.constant 0 : index
      %12 = vector.load %arg5[%c0_10, %c0_11] : memref<1x128xf32, #tpu.memory_space<vmem>>, vector<1x128xf32>
      %13 = vector.shape_cast %12 : vector<1x128xf32> to vector<1x128xf32>
      %14 = vector.broadcast %13 : vector<1x128xf32> to vector<256x128xf32>
      %c0_12 = arith.constant 0 : index
      %c0_13 = arith.constant 0 : index
      %15 = vector.load %arg7[%c0_12, %c0_13] : memref<256x128xf32, #tpu.memory_space<vmem>>, vector<256x128xf32>
      tpu.vector_store %arg7[%c0_12, %c0_13], %14 {strides = array<i32>} : memref<256x128xf32, #tpu.memory_space<vmem>>, vector<256x128xf32>,
    } else {
    }
    %c0 = arith.constant 0 : index
    %c0_1 = arith.constant 0 : index
    %3 = vector.load %arg7[%c0, %c0_1] : memref<256x128xf32, #tpu.memory_space<vmem>>, vector<256x128xf32>
    %c0_2 = arith.constant 0 : index
    %c0_3 = arith.constant 0 : index
    %4 = vector.load %arg3[%c0_2, %c0_3] : memref<256x512xbf16, #tpu.memory_space<vmem>>, vector<256x512xbf16>
    %c0_4 = arith.constant 0 : index
    %c0_5 = arith.constant 0 : index
    %5 = vector.load %arg4[%c0_4, %c0_5] : memref<512x128xbf16, #tpu.memory_space<vmem>>, vector<512x128xbf16>
    %cst = arith.constant dense<0.000000e+00> : vector<256x128xf32>
    %6 = tpu.matmul %4, %5, %cst {dimension_numbers = #tpu.dot_dimension_numbers<[1], [0], [0], [1], [0, 0, 1, 1], [], []>} : vector<256x512xbf16>, vector<512x128xbf16>, vector<256x128xf32> -> vector<256x128xf32>
    %7 = arith.addf %3, %6 : vector<256x128xf32>
    %c0_6 = arith.constant 0 : index
    %c0_7 = arith.constant 0 : index
    %8 = vector.load %arg7[%c0_6, %c0_7] : memref<256x128xf32, #tpu.memory_space<vmem>>, vector<256x128xf32>
    tpu.vector_store %arg7[%c0_6, %c0_7], %7 {strides = array<i32>} : memref<256x128xf32, #tpu.memory_space<vmem>>, vector<256x128xf32>,
    %c0_i32_8 = arith.constant 0 : i32
    %9 = arith.cmpi eq, %arg2, %c0_i32_8 : i32
    %10 = arith.extui %9 : i1 to i32
    %c0_i32_9 = arith.constant 0 : i32
    %11 = arith.cmpi ne, %10, %c0_i32_9 : i32
    scf.if %11 {
      %c0_10 = arith.constant 0 : index
      %c0_11 = arith.constant 0 : index
      %12 = vector.load %arg7[%c0_10, %c0_11] : memref<256x128xf32, #tpu.memory_space<vmem>>, vector<256x128xf32>
      %c0_12 = arith.constant 0 : index
      %c0_13 = arith.constant 0 : index
      %13 = vector.load %arg6[%c0_12, %c0_13] : memref<256x128xf32, #tpu.memory_space<vmem>>, vector<256x128xf32>
      tpu.vector_store %arg6[%c0_12, %c0_13], %12 {strides = array<i32>} : memref<256x128xf32, #tpu.memory_space<vmem>>, vector<256x128xf32>,
    } else {
    }
    return
  }
  func.func @transform_0(%arg0: i32, %arg1: i32, %arg2: i32) -> (i32, i32) {
    %c0_i32 = arith.constant 0 : i32
    return %arg0, %arg2 : i32, i32
  }
  func.func @transform_1(%arg0: i32, %arg1: i32, %arg2: i32) -> (i32, i32) {
    %c0_i32 = arith.constant 0 : i32
    return %arg2, %arg1 : i32, i32
  }
  func.func @transform_2(%arg0: i32, %arg1: i32, %arg2: i32) -> (i32, i32) {
    %c0_i32 = arith.constant 0 : i32
    %c0_i32_0 = arith.constant 0 : i32
    return %c0_i32, %arg1 : i32, i32
  }
  func.func @transform_3(%arg0: i32, %arg1: i32, %arg2: i32) -> (i32, i32) {
    %c0_i32 = arith.constant 0 : i32
    return %arg0, %arg1 : i32, i32
  }
}

module attributes {stable_mosaic.version = 11 : i64} {
  func.func @_gn_relu_kernel(%arg0: i32, %arg1: memref<1x64x128xf32, #tpu.memory_space<vmem>>, %arg2: memref<128x128xf32, #tpu.memory_space<vmem>>, %arg3: memref<1x128xf32, #tpu.memory_space<vmem>>, %arg4: memref<1x128xf32, #tpu.memory_space<vmem>>, %arg5: memref<1x64x128xf32, #tpu.memory_space<vmem>>) attributes {dimension_semantics = [#tpu.dimension_semantics<parallel>], iteration_bounds = array<i64: 2>, scalar_prefetch = 0 : i64, scratch_operands = 0 : i64, tpu.core_type = #tpu.core_type<tc>, window_params = [{transform_indices = @transform_0, window_bounds = array<i64: 1, 64, 128>}, {pipeline_mode = #tpu.pipeline_mode<synchronous>, transform_indices = @transform_1, window_bounds = array<i64: 128, 128>}, {pipeline_mode = #tpu.pipeline_mode<synchronous>, transform_indices = @transform_2, window_bounds = array<i64: 1, 128>}, {pipeline_mode = #tpu.pipeline_mode<synchronous>, transform_indices = @transform_3, window_bounds = array<i64: 1, 128>}, {transform_indices = @transform_4, window_bounds = array<i64: 1, 64, 128>}]} {
    %c0 = arith.constant 0 : index
    %c0_0 = arith.constant 0 : index
    %c0_1 = arith.constant 0 : index
    %0 = vector.load %arg1[%c0, %c0_0, %c0_1] : memref<1x64x128xf32, #tpu.memory_space<vmem>>, vector<1x64x128xf32>
    %1 = vector.shape_cast %0 : vector<1x64x128xf32> to vector<64x128xf32>
    %cst = arith.constant dense<0.000000e+00> : vector<128xf32>
    %2 = vector.multi_reduction <add>, %1, %cst [0] : vector<64x128xf32> to vector<128xf32>
    %3 = vector.shape_cast %2 : vector<128xf32> to vector<1x128xf32>
    %4 = arith.mulf %1, %1 : vector<64x128xf32>
    %cst_2 = arith.constant dense<0.000000e+00> : vector<128xf32>
    %5 = vector.multi_reduction <add>, %4, %cst_2 [0] : vector<64x128xf32> to vector<128xf32>
    %6 = vector.shape_cast %5 : vector<128xf32> to vector<1x128xf32>
    %c0_3 = arith.constant 0 : index
    %c0_4 = arith.constant 0 : index
    %7 = vector.load %arg2[%c0_3, %c0_4] : memref<128x128xf32, #tpu.memory_space<vmem>>, vector<128x128xf32>
    %cst_5 = arith.constant dense<0.000000e+00> : vector<1x128xf32>
    %8 = tpu.matmul %3, %7, %cst_5 {dimension_numbers = #tpu.dot_dimension_numbers<[1], [0], [0], [1], [0, 0, 1, 1], [], []>} : vector<1x128xf32>, vector<128x128xf32>, vector<1x128xf32> -> vector<1x128xf32>
    %c0_6 = arith.constant 0 : index
    %c0_7 = arith.constant 0 : index
    %9 = vector.load %arg2[%c0_6, %c0_7] : memref<128x128xf32, #tpu.memory_space<vmem>>, vector<128x128xf32>
    %cst_8 = arith.constant dense<0.000000e+00> : vector<1x128xf32>
    %10 = tpu.matmul %6, %9, %cst_8 {dimension_numbers = #tpu.dot_dimension_numbers<[1], [0], [0], [1], [0, 0, 1, 1], [], []>} : vector<1x128xf32>, vector<128x128xf32>, vector<1x128xf32> -> vector<1x128xf32>
    %11 = arith.mulf %8, %8 : vector<1x128xf32>
    %12 = arith.subf %10, %11 : vector<1x128xf32>
    %cst_9 = arith.constant 0.000000e+00 : f32
    %13 = vector.broadcast %cst_9 : f32 to vector<1x128xf32>
    %14 = arith.maximumf %12, %13 : vector<1x128xf32>
    %cst_10 = arith.constant 9.99999974E-6 : f32
    %15 = vector.broadcast %cst_10 : f32 to vector<1x128xf32>
    %16 = arith.addf %14, %15 : vector<1x128xf32>
    %17 = math.rsqrt %16 : vector<1x128xf32>
    %c0_11 = arith.constant 0 : index
    %c0_12 = arith.constant 0 : index
    %18 = vector.load %arg3[%c0_11, %c0_12] : memref<1x128xf32, #tpu.memory_space<vmem>>, vector<1x128xf32>
    %19 = arith.mulf %17, %18 : vector<1x128xf32>
    %c0_13 = arith.constant 0 : index
    %c0_14 = arith.constant 0 : index
    %20 = vector.load %arg4[%c0_13, %c0_14] : memref<1x128xf32, #tpu.memory_space<vmem>>, vector<1x128xf32>
    %21 = arith.mulf %8, %19 : vector<1x128xf32>
    %22 = arith.subf %20, %21 : vector<1x128xf32>
    %23 = vector.broadcast %19 : vector<1x128xf32> to vector<64x128xf32>
    %24 = arith.mulf %1, %23 : vector<64x128xf32>
    %25 = vector.broadcast %22 : vector<1x128xf32> to vector<64x128xf32>
    %26 = arith.addf %24, %25 : vector<64x128xf32>
    %cst_15 = arith.constant 0.000000e+00 : f32
    %27 = vector.broadcast %cst_15 : f32 to vector<64x128xf32>
    %28 = arith.maximumf %26, %27 : vector<64x128xf32>
    %c0_16 = arith.constant 0 : index
    %c0_17 = arith.constant 0 : index
    %c0_18 = arith.constant 0 : index
    %29 = vector.load %arg5[%c0_16, %c0_17, %c0_18] : memref<1x64x128xf32, #tpu.memory_space<vmem>>, vector<1x64x128xf32>
    %30 = vector.shape_cast %29 : vector<1x64x128xf32> to vector<64x128xf32>
    %31 = vector.shape_cast %28 : vector<64x128xf32> to vector<1x64x128xf32>
    tpu.vector_store %arg5[%c0_16, %c0_17, %c0_18], %31 {strides = array<i32>} : memref<1x64x128xf32, #tpu.memory_space<vmem>>, vector<1x64x128xf32>,
    return
  }
  func.func @transform_0(%arg0: i32) -> (i32, i32, i32) {
    %c0_i32 = arith.constant 0 : i32
    %c0_i32_0 = arith.constant 0 : i32
    %c0_i32_1 = arith.constant 0 : i32
    return %arg0, %c0_i32, %c0_i32_0 : i32, i32, i32
  }
  func.func @transform_1(%arg0: i32) -> (i32, i32) {
    %c0_i32 = arith.constant 0 : i32
    %c0_i32_0 = arith.constant 0 : i32
    %c0_i32_1 = arith.constant 0 : i32
    return %c0_i32, %c0_i32_0 : i32, i32
  }
  func.func @transform_2(%arg0: i32) -> (i32, i32) {
    %c0_i32 = arith.constant 0 : i32
    %c0_i32_0 = arith.constant 0 : i32
    %c0_i32_1 = arith.constant 0 : i32
    return %c0_i32, %c0_i32_0 : i32, i32
  }
  func.func @transform_3(%arg0: i32) -> (i32, i32) {
    %c0_i32 = arith.constant 0 : i32
    %c0_i32_0 = arith.constant 0 : i32
    %c0_i32_1 = arith.constant 0 : i32
    return %c0_i32, %c0_i32_0 : i32, i32
  }
  func.func @transform_4(%arg0: i32) -> (i32, i32, i32) {
    %c0_i32 = arith.constant 0 : i32
    %c0_i32_0 = arith.constant 0 : i32
    %c0_i32_1 = arith.constant 0 : i32
    return %arg0, %c0_i32, %c0_i32_0 : i32, i32, i32
  }
}

module attributes {stable_mosaic.version = 11 : i64} {
  func.func @_matmul_bias_kernel(%arg0: i32, %arg1: i32, %arg2: i32, %arg3: memref<128x512xbf16, #tpu.memory_space<vmem>>, %arg4: memref<512x128xbf16, #tpu.memory_space<vmem>>, %arg5: memref<1x128xf32, #tpu.memory_space<vmem>>, %arg6: memref<128x128xf32, #tpu.memory_space<vmem>>, %arg7: memref<128x128xf32, #tpu.memory_space<vmem>>) attributes {dimension_semantics = [#tpu.dimension_semantics<parallel>, #tpu.dimension_semantics<parallel>, #tpu.dimension_semantics<arbitrary>], iteration_bounds = array<i64: 1, 1, 2>, scalar_prefetch = 0 : i64, scratch_operands = 1 : i64, tpu.core_type = #tpu.core_type<tc>, window_params = [{transform_indices = @transform_0, window_bounds = array<i64: 128, 512>}, {transform_indices = @transform_1, window_bounds = array<i64: 512, 128>}, {transform_indices = @transform_2, window_bounds = array<i64: 1, 128>}, {transform_indices = @transform_3, window_bounds = array<i64: 128, 128>}]} {
    %c0_i32 = arith.constant 0 : i32
    %0 = arith.cmpi eq, %arg2, %c0_i32 : i32
    %1 = arith.extui %0 : i1 to i32
    %c0_i32_0 = arith.constant 0 : i32
    %2 = arith.cmpi ne, %1, %c0_i32_0 : i32
    scf.if %2 {
      %c0_9 = arith.constant 0 : index
      %c0_10 = arith.constant 0 : index
      %12 = vector.load %arg5[%c0_9, %c0_10] : memref<1x128xf32, #tpu.memory_space<vmem>>, vector<1x128xf32>
      %13 = vector.shape_cast %12 : vector<1x128xf32> to vector<1x128xf32>
      %14 = vector.broadcast %13 : vector<1x128xf32> to vector<128x128xf32>
      %c0_11 = arith.constant 0 : index
      %c0_12 = arith.constant 0 : index
      %15 = vector.load %arg7[%c0_11, %c0_12] : memref<128x128xf32, #tpu.memory_space<vmem>>, vector<128x128xf32>
      tpu.vector_store %arg7[%c0_11, %c0_12], %14 {strides = array<i32>} : memref<128x128xf32, #tpu.memory_space<vmem>>, vector<128x128xf32>,
    } else {
    }
    %c0 = arith.constant 0 : index
    %c0_1 = arith.constant 0 : index
    %3 = vector.load %arg7[%c0, %c0_1] : memref<128x128xf32, #tpu.memory_space<vmem>>, vector<128x128xf32>
    %c0_2 = arith.constant 0 : index
    %c0_3 = arith.constant 0 : index
    %4 = vector.load %arg3[%c0_2, %c0_3] : memref<128x512xbf16, #tpu.memory_space<vmem>>, vector<128x512xbf16>
    %c0_4 = arith.constant 0 : index
    %c0_5 = arith.constant 0 : index
    %5 = vector.load %arg4[%c0_4, %c0_5] : memref<512x128xbf16, #tpu.memory_space<vmem>>, vector<512x128xbf16>
    %cst = arith.constant dense<0.000000e+00> : vector<128x128xf32>
    %6 = tpu.matmul %4, %5, %cst {dimension_numbers = #tpu.dot_dimension_numbers<[1], [0], [0], [1], [0, 0, 1, 1], [], []>} : vector<128x512xbf16>, vector<512x128xbf16>, vector<128x128xf32> -> vector<128x128xf32>
    %7 = arith.addf %3, %6 : vector<128x128xf32>
    %c0_6 = arith.constant 0 : index
    %c0_7 = arith.constant 0 : index
    %8 = vector.load %arg7[%c0_6, %c0_7] : memref<128x128xf32, #tpu.memory_space<vmem>>, vector<128x128xf32>
    tpu.vector_store %arg7[%c0_6, %c0_7], %7 {strides = array<i32>} : memref<128x128xf32, #tpu.memory_space<vmem>>, vector<128x128xf32>,
    %c1_i32 = arith.constant 1 : i32
    %9 = arith.cmpi eq, %arg2, %c1_i32 : i32
    %10 = arith.extui %9 : i1 to i32
    %c0_i32_8 = arith.constant 0 : i32
    %11 = arith.cmpi ne, %10, %c0_i32_8 : i32
    scf.if %11 {
      %c0_9 = arith.constant 0 : index
      %c0_10 = arith.constant 0 : index
      %12 = vector.load %arg7[%c0_9, %c0_10] : memref<128x128xf32, #tpu.memory_space<vmem>>, vector<128x128xf32>
      %c0_11 = arith.constant 0 : index
      %c0_12 = arith.constant 0 : index
      %13 = vector.load %arg6[%c0_11, %c0_12] : memref<128x128xf32, #tpu.memory_space<vmem>>, vector<128x128xf32>
      tpu.vector_store %arg6[%c0_11, %c0_12], %12 {strides = array<i32>} : memref<128x128xf32, #tpu.memory_space<vmem>>, vector<128x128xf32>,
    } else {
    }
    return
  }
  func.func @transform_0(%arg0: i32, %arg1: i32, %arg2: i32) -> (i32, i32) {
    %c0_i32 = arith.constant 0 : i32
    return %arg0, %arg2 : i32, i32
  }
  func.func @transform_1(%arg0: i32, %arg1: i32, %arg2: i32) -> (i32, i32) {
    %c0_i32 = arith.constant 0 : i32
    return %arg2, %arg1 : i32, i32
  }
  func.func @transform_2(%arg0: i32, %arg1: i32, %arg2: i32) -> (i32, i32) {
    %c0_i32 = arith.constant 0 : i32
    %c0_i32_0 = arith.constant 0 : i32
    return %c0_i32, %arg1 : i32, i32
  }
  func.func @transform_3(%arg0: i32, %arg1: i32, %arg2: i32) -> (i32, i32) {
    %c0_i32 = arith.constant 0 : i32
    return %arg0, %arg1 : i32, i32
  }
}

module attributes {stable_mosaic.version = 11 : i64} {
  func.func @_gn_relu_kernel(%arg0: i32, %arg1: memref<1x16x128xf32, #tpu.memory_space<vmem>>, %arg2: memref<128x128xf32, #tpu.memory_space<vmem>>, %arg3: memref<1x128xf32, #tpu.memory_space<vmem>>, %arg4: memref<1x128xf32, #tpu.memory_space<vmem>>, %arg5: memref<1x16x128xf32, #tpu.memory_space<vmem>>) attributes {dimension_semantics = [#tpu.dimension_semantics<parallel>], iteration_bounds = array<i64: 2>, scalar_prefetch = 0 : i64, scratch_operands = 0 : i64, tpu.core_type = #tpu.core_type<tc>, window_params = [{transform_indices = @transform_0, window_bounds = array<i64: 1, 16, 128>}, {pipeline_mode = #tpu.pipeline_mode<synchronous>, transform_indices = @transform_1, window_bounds = array<i64: 128, 128>}, {pipeline_mode = #tpu.pipeline_mode<synchronous>, transform_indices = @transform_2, window_bounds = array<i64: 1, 128>}, {pipeline_mode = #tpu.pipeline_mode<synchronous>, transform_indices = @transform_3, window_bounds = array<i64: 1, 128>}, {transform_indices = @transform_4, window_bounds = array<i64: 1, 16, 128>}]} {
    %c0 = arith.constant 0 : index
    %c0_0 = arith.constant 0 : index
    %c0_1 = arith.constant 0 : index
    %0 = vector.load %arg1[%c0, %c0_0, %c0_1] : memref<1x16x128xf32, #tpu.memory_space<vmem>>, vector<1x16x128xf32>
    %1 = vector.shape_cast %0 : vector<1x16x128xf32> to vector<16x128xf32>
    %cst = arith.constant dense<0.000000e+00> : vector<128xf32>
    %2 = vector.multi_reduction <add>, %1, %cst [0] : vector<16x128xf32> to vector<128xf32>
    %3 = vector.shape_cast %2 : vector<128xf32> to vector<1x128xf32>
    %4 = arith.mulf %1, %1 : vector<16x128xf32>
    %cst_2 = arith.constant dense<0.000000e+00> : vector<128xf32>
    %5 = vector.multi_reduction <add>, %4, %cst_2 [0] : vector<16x128xf32> to vector<128xf32>
    %6 = vector.shape_cast %5 : vector<128xf32> to vector<1x128xf32>
    %c0_3 = arith.constant 0 : index
    %c0_4 = arith.constant 0 : index
    %7 = vector.load %arg2[%c0_3, %c0_4] : memref<128x128xf32, #tpu.memory_space<vmem>>, vector<128x128xf32>
    %cst_5 = arith.constant dense<0.000000e+00> : vector<1x128xf32>
    %8 = tpu.matmul %3, %7, %cst_5 {dimension_numbers = #tpu.dot_dimension_numbers<[1], [0], [0], [1], [0, 0, 1, 1], [], []>} : vector<1x128xf32>, vector<128x128xf32>, vector<1x128xf32> -> vector<1x128xf32>
    %c0_6 = arith.constant 0 : index
    %c0_7 = arith.constant 0 : index
    %9 = vector.load %arg2[%c0_6, %c0_7] : memref<128x128xf32, #tpu.memory_space<vmem>>, vector<128x128xf32>
    %cst_8 = arith.constant dense<0.000000e+00> : vector<1x128xf32>
    %10 = tpu.matmul %6, %9, %cst_8 {dimension_numbers = #tpu.dot_dimension_numbers<[1], [0], [0], [1], [0, 0, 1, 1], [], []>} : vector<1x128xf32>, vector<128x128xf32>, vector<1x128xf32> -> vector<1x128xf32>
    %11 = arith.mulf %8, %8 : vector<1x128xf32>
    %12 = arith.subf %10, %11 : vector<1x128xf32>
    %cst_9 = arith.constant 0.000000e+00 : f32
    %13 = vector.broadcast %cst_9 : f32 to vector<1x128xf32>
    %14 = arith.maximumf %12, %13 : vector<1x128xf32>
    %cst_10 = arith.constant 9.99999974E-6 : f32
    %15 = vector.broadcast %cst_10 : f32 to vector<1x128xf32>
    %16 = arith.addf %14, %15 : vector<1x128xf32>
    %17 = math.rsqrt %16 : vector<1x128xf32>
    %c0_11 = arith.constant 0 : index
    %c0_12 = arith.constant 0 : index
    %18 = vector.load %arg3[%c0_11, %c0_12] : memref<1x128xf32, #tpu.memory_space<vmem>>, vector<1x128xf32>
    %19 = arith.mulf %17, %18 : vector<1x128xf32>
    %c0_13 = arith.constant 0 : index
    %c0_14 = arith.constant 0 : index
    %20 = vector.load %arg4[%c0_13, %c0_14] : memref<1x128xf32, #tpu.memory_space<vmem>>, vector<1x128xf32>
    %21 = arith.mulf %8, %19 : vector<1x128xf32>
    %22 = arith.subf %20, %21 : vector<1x128xf32>
    %23 = vector.broadcast %19 : vector<1x128xf32> to vector<16x128xf32>
    %24 = arith.mulf %1, %23 : vector<16x128xf32>
    %25 = vector.broadcast %22 : vector<1x128xf32> to vector<16x128xf32>
    %26 = arith.addf %24, %25 : vector<16x128xf32>
    %cst_15 = arith.constant 0.000000e+00 : f32
    %27 = vector.broadcast %cst_15 : f32 to vector<16x128xf32>
    %28 = arith.maximumf %26, %27 : vector<16x128xf32>
    %c0_16 = arith.constant 0 : index
    %c0_17 = arith.constant 0 : index
    %c0_18 = arith.constant 0 : index
    %29 = vector.load %arg5[%c0_16, %c0_17, %c0_18] : memref<1x16x128xf32, #tpu.memory_space<vmem>>, vector<1x16x128xf32>
    %30 = vector.shape_cast %29 : vector<1x16x128xf32> to vector<16x128xf32>
    %31 = vector.shape_cast %28 : vector<16x128xf32> to vector<1x16x128xf32>
    tpu.vector_store %arg5[%c0_16, %c0_17, %c0_18], %31 {strides = array<i32>} : memref<1x16x128xf32, #tpu.memory_space<vmem>>, vector<1x16x128xf32>,
    return
  }
  func.func @transform_0(%arg0: i32) -> (i32, i32, i32) {
    %c0_i32 = arith.constant 0 : i32
    %c0_i32_0 = arith.constant 0 : i32
    %c0_i32_1 = arith.constant 0 : i32
    return %arg0, %c0_i32, %c0_i32_0 : i32, i32, i32
  }
  func.func @transform_1(%arg0: i32) -> (i32, i32) {
    %c0_i32 = arith.constant 0 : i32
    %c0_i32_0 = arith.constant 0 : i32
    %c0_i32_1 = arith.constant 0 : i32
    return %c0_i32, %c0_i32_0 : i32, i32
  }
  func.func @transform_2(%arg0: i32) -> (i32, i32) {
    %c0_i32 = arith.constant 0 : i32
    %c0_i32_0 = arith.constant 0 : i32
    %c0_i32_1 = arith.constant 0 : i32
    return %c0_i32, %c0_i32_0 : i32, i32
  }
  func.func @transform_3(%arg0: i32) -> (i32, i32) {
    %c0_i32 = arith.constant 0 : i32
    %c0_i32_0 = arith.constant 0 : i32
    %c0_i32_1 = arith.constant 0 : i32
    return %c0_i32, %c0_i32_0 : i32, i32
  }
  func.func @transform_4(%arg0: i32) -> (i32, i32, i32) {
    %c0_i32 = arith.constant 0 : i32
    %c0_i32_0 = arith.constant 0 : i32
    %c0_i32_1 = arith.constant 0 : i32
    return %arg0, %c0_i32, %c0_i32_0 : i32, i32, i32
  }
}

module attributes {stable_mosaic.version = 11 : i64} {
  func.func @_matmul_bias_kernel(%arg0: i32, %arg1: i32, %arg2: i32, %arg3: memref<8x512xbf16, #tpu.memory_space<vmem>>, %arg4: memref<512x128xbf16, #tpu.memory_space<vmem>>, %arg5: memref<1x128xf32, #tpu.memory_space<vmem>>, %arg6: memref<8x128xf32, #tpu.memory_space<vmem>>, %arg7: memref<8x128xf32, #tpu.memory_space<vmem>>) attributes {dimension_semantics = [#tpu.dimension_semantics<parallel>, #tpu.dimension_semantics<parallel>, #tpu.dimension_semantics<arbitrary>], iteration_bounds = array<i64: 1, 1, 4>, scalar_prefetch = 0 : i64, scratch_operands = 1 : i64, tpu.core_type = #tpu.core_type<tc>, window_params = [{transform_indices = @transform_0, window_bounds = array<i64: 8, 512>}, {transform_indices = @transform_1, window_bounds = array<i64: 512, 128>}, {transform_indices = @transform_2, window_bounds = array<i64: 1, 128>}, {transform_indices = @transform_3, window_bounds = array<i64: 8, 128>}]} {
    %c0_i32 = arith.constant 0 : i32
    %0 = arith.cmpi eq, %arg2, %c0_i32 : i32
    %1 = arith.extui %0 : i1 to i32
    %c0_i32_0 = arith.constant 0 : i32
    %2 = arith.cmpi ne, %1, %c0_i32_0 : i32
    scf.if %2 {
      %c0_9 = arith.constant 0 : index
      %c0_10 = arith.constant 0 : index
      %12 = vector.load %arg5[%c0_9, %c0_10] : memref<1x128xf32, #tpu.memory_space<vmem>>, vector<1x128xf32>
      %13 = vector.shape_cast %12 : vector<1x128xf32> to vector<1x128xf32>
      %14 = vector.broadcast %13 : vector<1x128xf32> to vector<8x128xf32>
      %c0_11 = arith.constant 0 : index
      %c0_12 = arith.constant 0 : index
      %15 = vector.load %arg7[%c0_11, %c0_12] : memref<8x128xf32, #tpu.memory_space<vmem>>, vector<8x128xf32>
      tpu.vector_store %arg7[%c0_11, %c0_12], %14 {strides = array<i32>} : memref<8x128xf32, #tpu.memory_space<vmem>>, vector<8x128xf32>,
    } else {
    }
    %c0 = arith.constant 0 : index
    %c0_1 = arith.constant 0 : index
    %3 = vector.load %arg7[%c0, %c0_1] : memref<8x128xf32, #tpu.memory_space<vmem>>, vector<8x128xf32>
    %c0_2 = arith.constant 0 : index
    %c0_3 = arith.constant 0 : index
    %4 = vector.load %arg3[%c0_2, %c0_3] : memref<8x512xbf16, #tpu.memory_space<vmem>>, vector<8x512xbf16>
    %c0_4 = arith.constant 0 : index
    %c0_5 = arith.constant 0 : index
    %5 = vector.load %arg4[%c0_4, %c0_5] : memref<512x128xbf16, #tpu.memory_space<vmem>>, vector<512x128xbf16>
    %cst = arith.constant dense<0.000000e+00> : vector<8x128xf32>
    %6 = tpu.matmul %4, %5, %cst {dimension_numbers = #tpu.dot_dimension_numbers<[1], [0], [0], [1], [0, 0, 1, 1], [], []>} : vector<8x512xbf16>, vector<512x128xbf16>, vector<8x128xf32> -> vector<8x128xf32>
    %7 = arith.addf %3, %6 : vector<8x128xf32>
    %c0_6 = arith.constant 0 : index
    %c0_7 = arith.constant 0 : index
    %8 = vector.load %arg7[%c0_6, %c0_7] : memref<8x128xf32, #tpu.memory_space<vmem>>, vector<8x128xf32>
    tpu.vector_store %arg7[%c0_6, %c0_7], %7 {strides = array<i32>} : memref<8x128xf32, #tpu.memory_space<vmem>>, vector<8x128xf32>,
    %c3_i32 = arith.constant 3 : i32
    %9 = arith.cmpi eq, %arg2, %c3_i32 : i32
    %10 = arith.extui %9 : i1 to i32
    %c0_i32_8 = arith.constant 0 : i32
    %11 = arith.cmpi ne, %10, %c0_i32_8 : i32
    scf.if %11 {
      %c0_9 = arith.constant 0 : index
      %c0_10 = arith.constant 0 : index
      %12 = vector.load %arg7[%c0_9, %c0_10] : memref<8x128xf32, #tpu.memory_space<vmem>>, vector<8x128xf32>
      %c0_11 = arith.constant 0 : index
      %c0_12 = arith.constant 0 : index
      %13 = vector.load %arg6[%c0_11, %c0_12] : memref<8x128xf32, #tpu.memory_space<vmem>>, vector<8x128xf32>
      tpu.vector_store %arg6[%c0_11, %c0_12], %12 {strides = array<i32>} : memref<8x128xf32, #tpu.memory_space<vmem>>, vector<8x128xf32>,
    } else {
    }
    return
  }
  func.func @transform_0(%arg0: i32, %arg1: i32, %arg2: i32) -> (i32, i32) {
    %c0_i32 = arith.constant 0 : i32
    return %arg0, %arg2 : i32, i32
  }
  func.func @transform_1(%arg0: i32, %arg1: i32, %arg2: i32) -> (i32, i32) {
    %c0_i32 = arith.constant 0 : i32
    return %arg2, %arg1 : i32, i32
  }
  func.func @transform_2(%arg0: i32, %arg1: i32, %arg2: i32) -> (i32, i32) {
    %c0_i32 = arith.constant 0 : i32
    %c0_i32_0 = arith.constant 0 : i32
    return %c0_i32, %arg1 : i32, i32
  }
  func.func @transform_3(%arg0: i32, %arg1: i32, %arg2: i32) -> (i32, i32) {
    %c0_i32 = arith.constant 0 : i32
    return %arg0, %arg1 : i32, i32
  }
}

</mosaic_0001>

<bundles_post_ra>
// kernel: sub_encoder_forward.7
= control target key start
LH: loop header
LB: loop body
LE: loop exit
PB: predicated region body
PF: predicated region fallthrough
CT: control target
= control target key end

     0   :  { %s2082_s12 = smov 0   ;;  %s2084_s13 = smov 0   ;;  %s2355_s0 = inlined_call_operand.vmem [shape: bf16[8192,512], index: 0, kind: input, shape index: {}]   ;;  %s2356_s1 = inlined_call_operand.vmem [shape: bf16[512,128], index: 1, kind: input, shape index: {}]   ;;  %s2357_s2 = inlined_call_operand.vmem [shape: f32[1,128], index: 2, kind: input, shape index: {}]   ;;  %s2358_s3 = inlined_call_operand.vmem [shape: f32[8192,128], index: 3, kind: output, shape index: {}]  }
   0x1   :  { %s2086_s14 = smov 0  }
   0x2 LB: > { %s32_s15 = sadd.s32 1, %s2056_s13  ;;  %p1556_p0 = scmp.ge.s32.totalorder %s2060_s14, 1  ;;  %s2060_s14 = sphi %s2086_s14, %s13_s14   ;;  %s2056_s13 = sphi %s2084_s13, %s2360_s13   ;;  %s2052_s12 = sphi %s2082_s12, %s2359_s12  }
   0x3   : > { %p34_p1 = scmp.ge.s32.totalorder %s32_s15, 32  ;;  %p191_p2 = scmp.lt.s32.totalorder %s2060_s14, 33 }
   0x5   : > { %s2362_s15 = smov (%p34_p1, %s32_s15), 0  ;;  %p192_p3 = pnand %p1556_p0, %p191_p2 }
   0x6   : > { %s1557_s25 = sshll.u32 (!%p192_p3), %s2052_s12, 5 }
   0x7   : > { %195 = sbr.rel (%p192_p3) target bundleno = 373 (0x175), region = 32  ;;  %p236_p4 = scmp.lt.s32.totalorder (!%p192_p3), %s1557_s25, 1023 }
   0xc   : > { %v1910_v0 = vld [vmem:[%s2356_s1 + $0x78] sm:$0xff]   ;;  %v1914_v4 = vld [vmem:[%s2356_s1 + $0x70] sm:$0xff]   ;;  %v1918_v8 = vld [vmem:[%s2356_s1 + $0x68] sm:$0xff]   ;;  %s2364_s25 = smov (!%p236_p4, %s1557_s25), 1023 }
   0xd   : > { %v1911_v1 = vld [vmem:[%s2356_s1 + $0xf8] sm:$0xff]   ;;  %1662 = vmatprep.subr.bf16.mxu0 %v1910_v0  ;;  %v1915_v5 = vld [vmem:[%s2356_s1 + $0xf0] sm:$0xff]   ;;  %v1919_v9 = vld [vmem:[%s2356_s1 + $0xe8] sm:$0xff]   ;;  %s1661_s24 = sshll.u32 %s2364_s25, 4  ;;  %s1561_s11 = sshll.u32 %s2364_s25, 3 }
   0xe   : > { %v1912_v2 = vld [vmem:[%s2356_s1 + $0x38] sm:$0xff]   ;;  %1774 = vmatprep.subr.bf16.mxu1 %v1911_v1  ;;  %v1916_v6 = vld [vmem:[%s2356_s1 + $0x30] sm:$0xff]   ;;  %v1920_v10 = vld [vmem:[%s2356_s1 + $0x28] sm:$0xff]   ;;  %s2199_s12 = scalar_lea.vmem %s2355_s0, %s1661_s24  ;;  %s2280_s20 = scalar_lea.vmem %s2358_s3, %s1561_s11 }
   0xf   : > { %v1913_v3 = vld [vmem:[%s2356_s1 + $0xb8] sm:$0xff]   ;;  %1663 = vmatpush3.bf16.msra.mxu0 %v1912_v2  ;;  %v1917_v7 = vld [vmem:[%s2356_s1 + $0xb0] sm:$0xff]   ;;  %v1921_v11 = vld [vmem:[%s2356_s1 + $0xa8] sm:$0xff]  }
  0x10   : > { %1775 = vmatpush3.bf16.msra.mxu1 %v1913_v3  ;;  %1664 = vmatprep.subr.bf16.mxu0 %v1914_v4  ;;  %v1922_v12 = vld [vmem:[%s2356_s1 + $0x60] sm:$0xff]   ;;  %v1926_v16 = vld [vmem:[%s2356_s1 + $0x58] sm:$0xff]   ;;  %v1930_v20 = vld [vmem:[%s2356_s1 + $0x50] sm:$0xff]  }
  0x11   : > { %1776 = vmatprep.subr.bf16.mxu1 %v1915_v5  ;;  %v1923_v13 = vld [vmem:[%s2356_s1 + $0xe0] sm:$0xff]   ;;  %v1927_v17 = vld [vmem:[%s2356_s1 + $0xd8] sm:$0xff]   ;;  %v1931_v21 = vld [vmem:[%s2356_s1 + $0xd0] sm:$0xff]  }
  0x12   : > { %v1924_v14 = vld [vmem:[%s2356_s1 + $0x20] sm:$0xff]   ;;  %v1928_v18 = vld [vmem:[%s2356_s1 + $0x18] sm:$0xff]   ;;  %v1932_v22 = vld [vmem:[%s2356_s1 + $0x10] sm:$0xff]  }
  0x13   : > { %1665 = vmatpush3.bf16.msra.mxu0 %v1916_v6  ;;  %v1925_v15 = vld [vmem:[%s2356_s1 + $0xa0] sm:$0xff]   ;;  %v1929_v19 = vld [vmem:[%s2356_s1 + $0x98] sm:$0xff]   ;;  %v1933_v23 = vld [vmem:[%s2356_s1 + $0x90] sm:$0xff]  }
  0x14   : > { %1777 = vmatpush3.bf16.msra.mxu1 %v1917_v7  ;;  %1666 = vmatprep.subr.bf16.mxu0 %v1918_v8  ;;  %v1934_v24 = vld [vmem:[%s2356_s1 + $0x48] sm:$0xff]   ;;  %v1938_v28 = vld [vmem:[%s2356_s1 + $0x40] sm:$0xff]  }
  0x15   : > { %1778 = vmatprep.subr.bf16.mxu1 %v1919_v9  ;;  %v1935_v25 = vld [vmem:[%s2356_s1 + $0xc8] sm:$0xff]   ;;  %v1939_v29 = vld [vmem:[%s2356_s1 + $0xc0] sm:$0xff]  }
  0x16   : > { %v1936_v26 = vld [vmem:[%s2356_s1 + $0x8] sm:$0xff]   ;;  %v1940_v30 = vld [vmem:[%s2356_s1] sm:$0xff]  }
  0x17   : > { %1667 = vmatpush3.bf16.msra.mxu0 %v1920_v10  ;;  %v1937_v27 = vld [vmem:[%s2356_s1 + $0x88] sm:$0xff]   ;;  %v1941_v31 = vld [vmem:[%s2356_s1 + $0x80] sm:$0xff]  }
  0x18   : > { %1779 = vmatpush3.bf16.msra.mxu1 %v1921_v11  ;;  %1668 = vmatprep.subr.bf16.mxu0 %v1922_v12  ;;  %v1942_v32 = vld [vmem:[%s2199_s12] ss:$16 sps:$4 sm:$0xff]   ;;  %v1944_v33 = vld [vmem:[%s2199_s12 + $0x4] ss:$16 sps:$4 sm:$0xff]   ;;  %v1945_v34 = vld [vmem:[%s2199_s12 + $0x8] ss:$16 sps:$4 sm:$0xff]  }
  0x19   : > { %1780 = vmatprep.subr.bf16.mxu1 %v1923_v13  ;;  %v1947_v35 = vld [vmem:[%s2199_s12 + $0xc] ss:$16 sps:$4 sm:$0xff]   ;;  %1015 = vmatprep.mubr.bf16.mxu0 %v1944_v33  ;;  %v1948_v36 = vld [vmem:[%s2199_s12 + $0x24] ss:$16 sps:$4 sm:$0xff]   ;;  %v1952_v38 = vld [vmem:[%s2199_s12 + $0x20] ss:$16 sps:$4 sm:$0xff]  }
  0x1a   : > { %1176 = vmatprep.mubr.bf16.mxu1 %v1947_v35  ;;  %v1950_v37 = vld [vmem:[%s2199_s12 + $0x2c] ss:$16 sps:$4 sm:$0xff]   ;;  %v1953_v39 = vld [vmem:[%s2199_s12 + $0x28] ss:$16 sps:$4 sm:$0xff]   ;;  %v1954_v40 = vld [vmem:[%s2199_s12 + $0x44] ss:$16 sps:$4 sm:$0xff]  }
  0x1b   : > { %1669 = vmatpush3.bf16.msra.mxu0 %v1924_v14  ;;  %v1956_v41 = vld [vmem:[%s2199_s12 + $0x4c] ss:$16 sps:$4 sm:$0xff]   ;;  %v1958_v42 = vld [vmem:[%s2199_s12 + $0x40] ss:$16 sps:$4 sm:$0xff]   ;;  %v1959_v43 = vld [vmem:[%s2199_s12 + $0x48] ss:$16 sps:$4 sm:$0xff]  }
  0x1c   : > { %1781 = vmatpush3.bf16.msra.mxu1 %v1925_v15  ;;  %1670 = vmatprep.subr.bf16.mxu0 %v1926_v16  ;;  %v1960_v44 = vld [vmem:[%s2199_s12 + $0x64] ss:$16 sps:$4 sm:$0xff]   ;;  %v1962_v45 = vld [vmem:[%s2199_s12 + $0x6c] ss:$16 sps:$4 sm:$0xff]   ;;  %v1964_v46 = vld [vmem:[%s2199_s12 + $0x60] ss:$16 sps:$4 sm:$0xff]  }
  0x1d   : > { %1782 = vmatprep.subr.bf16.mxu1 %v1927_v17  ;;  %v1965_v47 = vld [vmem:[%s2199_s12 + $0x68] ss:$16 sps:$4 sm:$0xff]   ;;  %v1966_v48 = vld [vmem:[%s2199_s12 + $0x84] ss:$16 sps:$4 sm:$0xff]   ;;  %v1968_v49 = vld [vmem:[%s2199_s12 + $0x8c] ss:$16 sps:$4 sm:$0xff]  }
  0x1e   : > { %v1970_v50 = vld [vmem:[%s2199_s12 + $0x80] ss:$16 sps:$4 sm:$0xff]   ;;  %v1971_v51 = vld [vmem:[%s2199_s12 + $0x88] ss:$16 sps:$4 sm:$0xff]   ;;  %v1972_v52 = vld [vmem:[%s2199_s12 + $0xa4] ss:$16 sps:$4 sm:$0xff]  }
  0x1f   : > { %1671 = vmatpush3.bf16.msra.mxu0 %v1928_v18  ;;  %v1974_v53 = vld [vmem:[%s2199_s12 + $0xac] ss:$16 sps:$4 sm:$0xff]   ;;  %v1976_v54 = vld [vmem:[%s2199_s12 + $0xa0] ss:$16 sps:$4 sm:$0xff]   ;;  %v1977_v55 = vld [vmem:[%s2199_s12 + $0xa8] ss:$16 sps:$4 sm:$0xff]  }
  0x20   : > { %1783 = vmatpush3.bf16.msra.mxu1 %v1929_v19  ;;  %1672 = vmatprep.subr.bf16.mxu0 %v1930_v20  ;;  %v1978_v56 = vld [vmem:[%s2199_s12 + $0xc4] ss:$16 sps:$4 sm:$0xff]   ;;  %v1980_v57 = vld [vmem:[%s2199_s12 + $0xcc] ss:$16 sps:$4 sm:$0xff]   ;;  %v1982_v58 = vld [vmem:[%s2199_s12 + $0xc0] ss:$16 sps:$4 sm:$0xff]  }
  0x21   : > { %1784 = vmatprep.subr.bf16.mxu1 %v1931_v21  ;;  %v1983_v59 = vld [vmem:[%s2199_s12 + $0xc8] ss:$16 sps:$4 sm:$0xff]   ;;  %v1984_v60 = vld [vmem:[%s2199_s12 + $0xe4] ss:$16 sps:$4 sm:$0xff]   ;;  %v1986_v61 = vld [vmem:[%s2199_s12 + $0xec] ss:$16 sps:$4 sm:$0xff]  }
  0x22   : > { %v1988_v62 = vld [vmem:[%s2199_s12 + $0xe0] ss:$16 sps:$4 sm:$0xff]   ;;  %v1989_v63 = vld [vmem:[%s2199_s12 + $0xe8] ss:$16 sps:$4 sm:$0xff]   ;;  %v1990_v0 = vld [vmem:[%s2199_s12 + $0x104] ss:$16 sps:$4 sm:$0xff]  }
  0x23   : > { %1673 = vmatpush3.bf16.msra.mxu0 %v1932_v22  ;;  %v1992_v1 = vld [vmem:[%s2199_s12 + $0x10c] ss:$16 sps:$4 sm:$0xff]   ;;  %v1994_v2 = vld [vmem:[%s2199_s12 + $0x100] ss:$16 sps:$4 sm:$0xff]   ;;  %v1995_v3 = vld [vmem:[%s2199_s12 + $0x108] ss:$16 sps:$4 sm:$0xff]  }
  0x24   : > { %1785 = vmatpush3.bf16.msra.mxu1 %v1933_v23  ;;  %1674 = vmatprep.subr.bf16.mxu0 %v1934_v24  ;;  %v1996_v4 = vld [vmem:[%s2199_s12 + $0x124] ss:$16 sps:$4 sm:$0xff]   ;;  %v1998_v5 = vld [vmem:[%s2199_s12 + $0x12c] ss:$16 sps:$4 sm:$0xff]   ;;  %v2000_v6 = vld [vmem:[%s2199_s12 + $0x120] ss:$16 sps:$4 sm:$0xff]  }
  0x25   : > { %1786 = vmatprep.subr.bf16.mxu1 %v1935_v25  ;;  %v2001_v7 = vld [vmem:[%s2199_s12 + $0x128] ss:$16 sps:$4 sm:$0xff]   ;;  %v2002_v8 = vld [vmem:[%s2199_s12 + $0x144] ss:$16 sps:$4 sm:$0xff]   ;;  %v2004_v9 = vld [vmem:[%s2199_s12 + $0x14c] ss:$16 sps:$4 sm:$0xff]  }
  0x26   : > { %v2006_v10 = vld [vmem:[%s2199_s12 + $0x140] ss:$16 sps:$4 sm:$0xff]   ;;  %v2007_v11 = vld [vmem:[%s2199_s12 + $0x148] ss:$16 sps:$4 sm:$0xff]   ;;  %v2008_v12 = vld [vmem:[%s2199_s12 + $0x164] ss:$16 sps:$4 sm:$0xff]  }
  0x27   : > { %1675 = vmatpush3.bf16.msra.mxu0 %v1936_v26  ;;  %v2010_v13 = vld [vmem:[%s2199_s12 + $0x16c] ss:$16 sps:$4 sm:$0xff]   ;;  %v2012_v14 = vld [vmem:[%s2199_s12 + $0x160] ss:$16 sps:$4 sm:$0xff]   ;;  %v2013_v15 = vld [vmem:[%s2199_s12 + $0x168] ss:$16 sps:$4 sm:$0xff]  }
  0x28   : > { %1787 = vmatpush3.bf16.msra.mxu1 %v1937_v27  ;;  %1676 = vmatprep.subr.bf16.mxu0 %v1938_v28  ;;  %v2014_v16 = vld [vmem:[%s2199_s12 + $0x184] ss:$16 sps:$4 sm:$0xff]   ;;  %v2016_v17 = vld [vmem:[%s2199_s12 + $0x18c] ss:$16 sps:$4 sm:$0xff]   ;;  %v2018_v18 = vld [vmem:[%s2199_s12 + $0x180] ss:$16 sps:$4 sm:$0xff]  }
  0x29   : > { %1788 = vmatprep.subr.bf16.mxu1 %v1939_v29  ;;  %v2019_v19 = vld [vmem:[%s2199_s12 + $0x188] ss:$16 sps:$4 sm:$0xff]   ;;  %v2020_v20 = vld [vmem:[%s2199_s12 + $0x1a4] ss:$16 sps:$4 sm:$0xff]   ;;  %v2022_v21 = vld [vmem:[%s2199_s12 + $0x1ac] ss:$16 sps:$4 sm:$0xff]  }
  0x2a   : > { %v2024_v22 = vld [vmem:[%s2199_s12 + $0x1a0] ss:$16 sps:$4 sm:$0xff]   ;;  %v2025_v23 = vld [vmem:[%s2199_s12 + $0x1a8] ss:$16 sps:$4 sm:$0xff]   ;;  %v2026_v24 = vld [vmem:[%s2199_s12 + $0x1c4] ss:$16 sps:$4 sm:$0xff]  }
  0x2b   : > { %1677 = vmatpush3.bf16.msra.mxu0 %v1940_v30  ;;  %v2028_v25 = vld [vmem:[%s2199_s12 + $0x1cc] ss:$16 sps:$4 sm:$0xff]   ;;  %v2030_v26 = vld [vmem:[%s2199_s12 + $0x1c0] ss:$16 sps:$4 sm:$0xff]   ;;  %v2031_v27 = vld [vmem:[%s2199_s12 + $0x1c8] ss:$16 sps:$4 sm:$0xff]  }
  0x2c   : > { %1789 = vmatpush3.bf16.msra.mxu1 %v1941_v31  ;;  %v2032_v28 = vld [vmem:[%s2199_s12 + $0x1e4] ss:$16 sps:$4 sm:$0xff]   ;;  %v2034_v29 = vld [vmem:[%s2199_s12 + $0x1ec] ss:$16 sps:$4 sm:$0xff]   ;;  %v2036_v30 = vld [vmem:[%s2199_s12 + $0x1e0] ss:$16 sps:$4 sm:$0xff]  }
  0x2d   : > { %v2037_v31 = vld [vmem:[%s2199_s12 + $0x1e8] ss:$16 sps:$4 sm:$0xff]  }
  0x2e   : > { %1016 = vmatmul.mubr.bf16.vlgmr.msra.gmra.mxu0 %v1942_v32 }
  0x2f   : > { %1177 = vmatmul.mubr.bf16.vlgmr.msra.gmra.mxu1 %v1945_v34  ;;  %1023 = vmatprep.mubr.bf16.mxu0 %v1948_v36 }
  0x30   : > { %1184 = vmatprep.mubr.bf16.mxu1 %v1950_v37 }
  0x36   : > { %1024 = vmatmul.mubr.bf16.gmra.mxu0 %v1952_v38 }
  0x37   : > { %1185 = vmatmul.mubr.bf16.gmra.mxu1 %v1953_v39  ;;  %1031 = vmatprep.mubr.bf16.mxu0 %v1954_v40  ;;  %v2275_v39 = vld [vmem:[%s2357_s2] ss:$0 sm:$0xff] }
  0x38   : > { %1192 = vmatprep.mubr.bf16.mxu1 %v1956_v41 }
  0x3e   : > { %1032 = vmatmul.mubr.bf16.gmra.mxu0 %v1958_v42 }
  0x3f   : > { %1193 = vmatmul.mubr.bf16.gmra.mxu1 %v1959_v43  ;;  %1039 = vmatprep.mubr.bf16.mxu0 %v1960_v44 }
  0x40   : > { %1200 = vmatprep.mubr.bf16.mxu1 %v1962_v45 }
  0x46   : > { %1040 = vmatmul.mubr.bf16.gmra.mxu0 %v1964_v46 }
  0x47   : > { %1201 = vmatmul.mubr.bf16.gmra.mxu1 %v1965_v47  ;;  %1047 = vmatprep.mubr.bf16.mxu0 %v1966_v48 }
  0x48   : > { %1208 = vmatprep.mubr.bf16.mxu1 %v1968_v49 }
  0x4e   : > { %1048 = vmatmul.mubr.bf16.gmra.mxu0 %v1970_v50 }
  0x4f   : > { %1209 = vmatmul.mubr.bf16.gmra.mxu1 %v1971_v51  ;;  %1055 = vmatprep.mubr.bf16.mxu0 %v1972_v52 }
  0x50   : > { %1216 = vmatprep.mubr.bf16.mxu1 %v1974_v53 }
  0x56   : > { %1056 = vmatmul.mubr.bf16.gmra.mxu0 %v1976_v54 }
  0x57   : > { %1217 = vmatmul.mubr.bf16.gmra.mxu1 %v1977_v55  ;;  %1063 = vmatprep.mubr.bf16.mxu0 %v1978_v56 }
  0x58   : > { %1224 = vmatprep.mubr.bf16.mxu1 %v1980_v57 }
  0x5e   : > { %1064 = vmatmul.mubr.bf16.gmra.mxu0 %v1982_v58 }
  0x5f   : > { %1225 = vmatmul.mubr.bf16.gmra.mxu1 %v1983_v59  ;;  %1071 = vmatprep.mubr.bf16.mxu0 %v1984_v60 }
  0x60   : > { %1232 = vmatprep.mubr.bf16.mxu1 %v1986_v61 }
  0x66   : > { %1072 = vmatmul.mubr.bf16.gmra.mxu0 %v1988_v62 }
  0x67   : > { %1233 = vmatmul.mubr.bf16.gmra.mxu1 %v1989_v63  ;;  %1079 = vmatprep.mubr.bf16.mxu0 %v1990_v0 }
  0x68   : > { %1240 = vmatprep.mubr.bf16.mxu1 %v1992_v1 }
  0x6e   : > { %1080 = vmatmul.mubr.bf16.gmra.mxu0 %v1994_v2 }
  0x6f   : > { %1241 = vmatmul.mubr.bf16.gmra.mxu1 %v1995_v3  ;;  %1087 = vmatprep.mubr.bf16.mxu0 %v1996_v4 }
  0x70   : > { %1248 = vmatprep.mubr.bf16.mxu1 %v1998_v5 }
  0x76   : > { %1088 = vmatmul.mubr.bf16.gmra.mxu0 %v2000_v6 }
  0x77   : > { %1249 = vmatmul.mubr.bf16.gmra.mxu1 %v2001_v7  ;;  %1095 = vmatprep.mubr.bf16.mxu0 %v2002_v8 }
  0x78   : > { %1256 = vmatprep.mubr.bf16.mxu1 %v2004_v9 }
  0x7e   : > { %1096 = vmatmul.mubr.bf16.gmra.mxu0 %v2006_v10 }
  0x7f   : > { %1257 = vmatmul.mubr.bf16.gmra.mxu1 %v2007_v11  ;;  %1103 = vmatprep.mubr.bf16.mxu0 %v2008_v12 }
  0x80   : > { %1264 = vmatprep.mubr.bf16.mxu1 %v2010_v13 }
  0x86   : > { %1104 = vmatmul.mubr.bf16.gmra.mxu0 %v2012_v14 }
  0x87   : > { %1265 = vmatmul.mubr.bf16.gmra.mxu1 %v2013_v15  ;;  %1111 = vmatprep.mubr.bf16.mxu0 %v2014_v16 }
  0x88   : > { %1272 = vmatprep.mubr.bf16.mxu1 %v2016_v17 }
  0x8e   : > { %1112 = vmatmul.mubr.bf16.gmra.mxu0 %v2018_v18 }
  0x8f   : > { %1273 = vmatmul.mubr.bf16.gmra.mxu1 %v2019_v19  ;;  %1119 = vmatprep.mubr.bf16.mxu0 %v2020_v20 }
  0x90   : > { %1280 = vmatprep.mubr.bf16.mxu1 %v2022_v21 }
  0x96   : > { %1120 = vmatmul.mubr.bf16.gmra.mxu0 %v2024_v22 }
  0x97   : > { %1281 = vmatmul.mubr.bf16.gmra.mxu1 %v2025_v23  ;;  %1127 = vmatprep.mubr.bf16.mxu0 %v2026_v24 }
  0x98   : > { %1288 = vmatprep.mubr.bf16.mxu1 %v2028_v25 }
  0x9e   : > { %1128 = vmatmul.mubr.bf16.gmra.mxu0 %v2030_v26 }
  0x9f   : > { %1289 = vmatmul.mubr.bf16.gmra.mxu1 %v2031_v27  ;;  %1135 = vmatprep.mubr.bf16.mxu0 %v2032_v28 }
  0xa0   : > { %1296 = vmatprep.mubr.bf16.mxu1 %v2034_v29 }
  0xa6   : > { %1136 = vmatmul.mubr.bf16.gmra.mxu0 %v2036_v30 }
  0xa7   : > { %1297 = vmatmul.mubr.bf16.gmra.mxu1 %v2037_v31 }
  0xee   : > { %v1678_v32 = vpop.f32.mrf.mxu0 }
  0xef   : > { %v1790_v33 = vpop.f32.mrf.mxu1 }
  0xf0   : > { %v1679_v34 = vpop.f32.mrf.mxu0 }
  0xf1   : > { %v1680_v35 = vadd.f32 %v1679_v34, %v1678_v32  ;;  %v1791_v36 = vpop.f32.mrf.mxu1 }
  0xf2   : > { %v1792_v37 = vadd.f32 %v1791_v36, %v1790_v33  ;;  %v1681_v38 = vpop.f32.mrf.mxu0 }
  0xf3   : > { %v1793_v40 = vpop.f32.mrf.mxu1 }
  0xf4   : > { %v1179_v41 = vadd.f32 %v1792_v37, %v1680_v35  ;;  %v1682_v42 = vpop.f32.mrf.mxu0 }
  0xf5   : > { %v1683_v43 = vadd.f32 %v1682_v42, %v1681_v38  ;;  %v1794_v44 = vpop.f32.mrf.mxu1 }
  0xf6   : > { %v1305_v45 = vadd.f32 %v2275_v39, %v1179_v41  ;;  %v1795_v46 = vadd.f32 %v1794_v44, %v1793_v40  ;;  %v1684_v47 = vpop.f32.mrf.mxu0 }
  0xf7   : > { %v1796_v48 = vpop.f32.mrf.mxu1 }
  0xf8   : > { %1404 = vst [vmem:[%s2280_s20] sm:$0xff] %v1305_v45  ;;  %v1182_v49 = vadd.f32 %v1795_v46, %v1683_v43  ;;  %v1685_v50 = vpop.f32.mrf.mxu0 }
  0xf9   : > { %v1686_v51 = vadd.f32 %v1685_v50, %v1684_v47  ;;  %v1797_v52 = vpop.f32.mrf.mxu1 }
  0xfa   : > { %v1306_v53 = vadd.f32 %v2275_v39, %v1182_v49  ;;  %v1798_v54 = vadd.f32 %v1797_v52, %v1796_v48  ;;  %v1687_v55 = vpop.f32.mrf.mxu0 }
  0xfb   : > { %v1799_v56 = vpop.f32.mrf.mxu1 }
  0xfc   : > { %1405 = vst [vmem:[%s2280_s20 + $0x8] sm:$0xff] %v1306_v53  ;;  %v1187_v57 = vadd.f32 %v1798_v54, %v1686_v51  ;;  %v1688_v58 = vpop.f32.mrf.mxu0 }
  0xfd   : > { %v1689_v59 = vadd.f32 %v1688_v58, %v1687_v55  ;;  %v1800_v60 = vpop.f32.mrf.mxu1 }
  0xfe   : > { %v1307_v61 = vadd.f32 %v2275_v39, %v1187_v57  ;;  %v1801_v62 = vadd.f32 %v1800_v60, %v1799_v56  ;;  %v1690_v63 = vpop.f32.mrf.mxu0 }
  0xff   : > { %v1802_v0 = vpop.f32.mrf.mxu1 }
 0x100   : > { %1406 = vst [vmem:[%s2280_s20 + $0x10] sm:$0xff] %v1307_v61  ;;  %v1190_v1 = vadd.f32 %v1801_v62, %v1689_v59  ;;  %v1691_v2 = vpop.f32.mrf.mxu0 }
 0x101   : > { %v1692_v3 = vadd.f32 %v1691_v2, %v1690_v63  ;;  %v1803_v4 = vpop.f32.mrf.mxu1 }
 0x102   : > { %v1308_v5 = vadd.f32 %v2275_v39, %v1190_v1  ;;  %v1804_v6 = vadd.f32 %v1803_v4, %v1802_v0  ;;  %v1693_v7 = vpop.f32.mrf.mxu0 }
 0x103   : > { %v1805_v8 = vpop.f32.mrf.mxu1 }
 0x104   : > { %1407 = vst [vmem:[%s2280_s20 + $0x18] sm:$0xff] %v1308_v5  ;;  %v1195_v9 = vadd.f32 %v1804_v6, %v1692_v3  ;;  %v1694_v10 = vpop.f32.mrf.mxu0 }
 0x105   : > { %v1695_v11 = vadd.f32 %v1694_v10, %v1693_v7  ;;  %v1806_v12 = vpop.f32.mrf.mxu1 }
 0x106   : > { %v1309_v13 = vadd.f32 %v2275_v39, %v1195_v9  ;;  %v1807_v14 = vadd.f32 %v1806_v12, %v1805_v8  ;;  %v1696_v15 = vpop.f32.mrf.mxu0 }
 0x107   : > { %v1808_v16 = vpop.f32.mrf.mxu1 }
 0x108   : > { %1408 = vst [vmem:[%s2280_s20 + $0x20] sm:$0xff] %v1309_v13  ;;  %v1198_v17 = vadd.f32 %v1807_v14, %v1695_v11  ;;  %v1697_v18 = vpop.f32.mrf.mxu0 }
 0x109   : > { %v1698_v19 = vadd.f32 %v1697_v18, %v1696_v15  ;;  %v1809_v20 = vpop.f32.mrf.mxu1 }
 0x10a   : > { %v1310_v21 = vadd.f32 %v2275_v39, %v1198_v17  ;;  %v1810_v22 = vadd.f32 %v1809_v20, %v1808_v16  ;;  %v1699_v23 = vpop.f32.mrf.mxu0 }
 0x10b   : > { %v1811_v24 = vpop.f32.mrf.mxu1 }
 0x10c   : > { %1409 = vst [vmem:[%s2280_s20 + $0x28] sm:$0xff] %v1310_v21  ;;  %v1203_v25 = vadd.f32 %v1810_v22, %v1698_v19  ;;  %v1700_v26 = vpop.f32.mrf.mxu0 }
 0x10d   : > { %v1701_v27 = vadd.f32 %v1700_v26, %v1699_v23  ;;  %v1812_v28 = vpop.f32.mrf.mxu1 }
 0x10e   : > { %v1311_v29 = vadd.f32 %v2275_v39, %v1203_v25  ;;  %v1813_v30 = vadd.f32 %v1812_v28, %v1811_v24  ;;  %v1702_v31 = vpop.f32.mrf.mxu0 }
 0x10f   : > { %v1814_v32 = vpop.f32.mrf.mxu1 }
 0x110   : > { %1410 = vst [vmem:[%s2280_s20 + $0x30] sm:$0xff] %v1311_v29  ;;  %v1206_v33 = vadd.f32 %v1813_v30, %v1701_v27  ;;  %v1703_v34 = vpop.f32.mrf.mxu0 }
 0x111   : > { %v1704_v35 = vadd.f32 %v1703_v34, %v1702_v31  ;;  %v1815_v36 = vpop.f32.mrf.mxu1 }
 0x112   : > { %v1312_v37 = vadd.f32 %v2275_v39, %v1206_v33  ;;  %v1816_v38 = vadd.f32 %v1815_v36, %v1814_v32  ;;  %v1705_v40 = vpop.f32.mrf.mxu0 }
 0x113   : > { %v1817_v41 = vpop.f32.mrf.mxu1 }
 0x114   : > { %1411 = vst [vmem:[%s2280_s20 + $0x38] sm:$0xff] %v1312_v37  ;;  %v1211_v42 = vadd.f32 %v1816_v38, %v1704_v35  ;;  %v1706_v43 = vpop.f32.mrf.mxu0 }
 0x115   : > { %v1707_v44 = vadd.f32 %v1706_v43, %v1705_v40  ;;  %v1818_v45 = vpop.f32.mrf.mxu1 }
 0x116   : > { %v1313_v46 = vadd.f32 %v2275_v39, %v1211_v42  ;;  %v1819_v47 = vadd.f32 %v1818_v45, %v1817_v41  ;;  %v1708_v48 = vpop.f32.mrf.mxu0 }
 0x117   : > { %v1820_v49 = vpop.f32.mrf.mxu1 }
 0x118   : > { %1412 = vst [vmem:[%s2280_s20 + $0x40] sm:$0xff] %v1313_v46  ;;  %v1214_v50 = vadd.f32 %v1819_v47, %v1707_v44  ;;  %v1709_v51 = vpop.f32.mrf.mxu0 }
 0x119   : > { %v1710_v52 = vadd.f32 %v1709_v51, %v1708_v48  ;;  %v1821_v53 = vpop.f32.mrf.mxu1 }
 0x11a   : > { %v1314_v54 = vadd.f32 %v2275_v39, %v1214_v50  ;;  %v1822_v55 = vadd.f32 %v1821_v53, %v1820_v49  ;;  %v1711_v56 = vpop.f32.mrf.mxu0 }
 0x11b   : > { %v1823_v57 = vpop.f32.mrf.mxu1 }
 0x11c   : > { %1413 = vst [vmem:[%s2280_s20 + $0x48] sm:$0xff] %v1314_v54  ;;  %v1219_v58 = vadd.f32 %v1822_v55, %v1710_v52  ;;  %v1712_v59 = vpop.f32.mrf.mxu0 }
 0x11d   : > { %v1713_v60 = vadd.f32 %v1712_v59, %v1711_v56  ;;  %v1824_v61 = vpop.f32.mrf.mxu1 }
 0x11e   : > { %v1315_v62 = vadd.f32 %v2275_v39, %v1219_v58  ;;  %v1825_v63 = vadd.f32 %v1824_v61, %v1823_v57  ;;  %v1714_v0 = vpop.f32.mrf.mxu0 }
 0x11f   : > { %v1826_v1 = vpop.f32.mrf.mxu1 }
 0x120   : > { %1414 = vst [vmem:[%s2280_s20 + $0x50] sm:$0xff] %v1315_v62  ;;  %v1222_v2 = vadd.f32 %v1825_v63, %v1713_v60  ;;  %v1715_v3 = vpop.f32.mrf.mxu0 }
 0x121   : > { %v1716_v4 = vadd.f32 %v1715_v3, %v1714_v0  ;;  %v1827_v5 = vpop.f32.mrf.mxu1 }
 0x122   : > { %v1316_v6 = vadd.f32 %v2275_v39, %v1222_v2  ;;  %v1828_v7 = vadd.f32 %v1827_v5, %v1826_v1  ;;  %v1717_v8 = vpop.f32.mrf.mxu0 }
 0x123   : > { %v1829_v9 = vpop.f32.mrf.mxu1 }
 0x124   : > { %1415 = vst [vmem:[%s2280_s20 + $0x58] sm:$0xff] %v1316_v6  ;;  %v1227_v10 = vadd.f32 %v1828_v7, %v1716_v4  ;;  %v1718_v11 = vpop.f32.mrf.mxu0 }
 0x125   : > { %v1719_v12 = vadd.f32 %v1718_v11, %v1717_v8  ;;  %v1830_v13 = vpop.f32.mrf.mxu1 }
 0x126   : > { %v1317_v14 = vadd.f32 %v2275_v39, %v1227_v10  ;;  %v1831_v15 = vadd.f32 %v1830_v13, %v1829_v9  ;;  %v1720_v16 = vpop.f32.mrf.mxu0 }
 0x127   : > { %v1832_v17 = vpop.f32.mrf.mxu1 }
 0x128   : > { %1416 = vst [vmem:[%s2280_s20 + $0x60] sm:$0xff] %v1317_v14  ;;  %v1230_v18 = vadd.f32 %v1831_v15, %v1719_v12  ;;  %v1721_v19 = vpop.f32.mrf.mxu0 }
 0x129   : > { %v1722_v20 = vadd.f32 %v1721_v19, %v1720_v16  ;;  %v1833_v21 = vpop.f32.mrf.mxu1 }
 0x12a   : > { %v1318_v22 = vadd.f32 %v2275_v39, %v1230_v18  ;;  %v1834_v23 = vadd.f32 %v1833_v21, %v1832_v17  ;;  %v1723_v24 = vpop.f32.mrf.mxu0 }
 0x12b   : > { %v1835_v25 = vpop.f32.mrf.mxu1 }
 0x12c   : > { %1417 = vst [vmem:[%s2280_s20 + $0x68] sm:$0xff] %v1318_v22  ;;  %v1235_v26 = vadd.f32 %v1834_v23, %v1722_v20  ;;  %v1724_v27 = vpop.f32.mrf.mxu0 }
 0x12d   : > { %v1725_v28 = vadd.f32 %v1724_v27, %v1723_v24  ;;  %v1836_v29 = vpop.f32.mrf.mxu1 }
 0x12e   : > { %v1319_v30 = vadd.f32 %v2275_v39, %v1235_v26  ;;  %v1837_v31 = vadd.f32 %v1836_v29, %v1835_v25  ;;  %v1726_v32 = vpop.f32.mrf.mxu0 }
 0x12f   : > { %v1838_v33 = vpop.f32.mrf.mxu1 }
 0x130   : > { %1418 = vst [vmem:[%s2280_s20 + $0x70] sm:$0xff] %v1319_v30  ;;  %v1238_v34 = vadd.f32 %v1837_v31, %v1725_v28  ;;  %v1727_v35 = vpop.f32.mrf.mxu0 }
 0x131   : > { %v1728_v36 = vadd.f32 %v1727_v35, %v1726_v32  ;;  %v1839_v37 = vpop.f32.mrf.mxu1 }
 0x132   : > { %v1320_v38 = vadd.f32 %v2275_v39, %v1238_v34  ;;  %v1840_v40 = vadd.f32 %v1839_v37, %v1838_v33  ;;  %v1729_v41 = vpop.f32.mrf.mxu0 }
 0x133   : > { %v1841_v42 = vpop.f32.mrf.mxu1 }
 0x134   : > { %1419 = vst [vmem:[%s2280_s20 + $0x78] sm:$0xff] %v1320_v38  ;;  %v1243_v43 = vadd.f32 %v1840_v40, %v1728_v36  ;;  %v1730_v44 = vpop.f32.mrf.mxu0 }
 0x135   : > { %v1731_v45 = vadd.f32 %v1730_v44, %v1729_v41  ;;  %v1842_v46 = vpop.f32.mrf.mxu1 }
 0x136   : > { %v1321_v47 = vadd.f32 %v2275_v39, %v1243_v43  ;;  %v1843_v48 = vadd.f32 %v1842_v46, %v1841_v42  ;;  %v1732_v49 = vpop.f32.mrf.mxu0 }
 0x137   : > { %v1844_v50 = vpop.f32.mrf.mxu1 }
 0x138   : > { %1420 = vst [vmem:[%s2280_s20 + $0x80] sm:$0xff] %v1321_v47  ;;  %v1246_v51 = vadd.f32 %v1843_v48, %v1731_v45  ;;  %v1733_v52 = vpop.f32.mrf.mxu0 }
 0x139   : > { %v1734_v53 = vadd.f32 %v1733_v52, %v1732_v49  ;;  %v1845_v54 = vpop.f32.mrf.mxu1 }
 0x13a   : > { %v1322_v55 = vadd.f32 %v2275_v39, %v1246_v51  ;;  %v1846_v56 = vadd.f32 %v1845_v54, %v1844_v50  ;;  %v1735_v57 = vpop.f32.mrf.mxu0 }
 0x13b   : > { %v1847_v58 = vpop.f32.mrf.mxu1 }
 0x13c   : > { %1421 = vst [vmem:[%s2280_s20 + $0x88] sm:$0xff] %v1322_v55  ;;  %v1251_v59 = vadd.f32 %v1846_v56, %v1734_v53  ;;  %v1736_v60 = vpop.f32.mrf.mxu0 }
 0x13d   : > { %v1737_v61 = vadd.f32 %v1736_v60, %v1735_v57  ;;  %v1848_v62 = vpop.f32.mrf.mxu1 }
 0x13e   : > { %v1323_v63 = vadd.f32 %v2275_v39, %v1251_v59  ;;  %v1849_v0 = vadd.f32 %v1848_v62, %v1847_v58  ;;  %v1738_v1 = vpop.f32.mrf.mxu0 }
 0x13f   : > { %v1850_v2 = vpop.f32.mrf.mxu1 }
 0x140   : > { %1422 = vst [vmem:[%s2280_s20 + $0x90] sm:$0xff] %v1323_v63  ;;  %v1254_v3 = vadd.f32 %v1849_v0, %v1737_v61  ;;  %v1739_v4 = vpop.f32.mrf.mxu0 }
 0x141   : > { %v1740_v5 = vadd.f32 %v1739_v4, %v1738_v1  ;;  %v1851_v6 = vpop.f32.mrf.mxu1 }
 0x142   : > { %v1324_v7 = vadd.f32 %v2275_v39, %v1254_v3  ;;  %v1852_v8 = vadd.f32 %v1851_v6, %v1850_v2  ;;  %v1741_v9 = vpop.f32.mrf.mxu0 }
 0x143   : > { %v1853_v10 = vpop.f32.mrf.mxu1 }
 0x144   : > { %1423 = vst [vmem:[%s2280_s20 + $0x98] sm:$0xff] %v1324_v7  ;;  %v1259_v11 = vadd.f32 %v1852_v8, %v1740_v5  ;;  %v1742_v12 = vpop.f32.mrf.mxu0 }
 0x145   : > { %v1743_v13 = vadd.f32 %v1742_v12, %v1741_v9  ;;  %v1854_v14 = vpop.f32.mrf.mxu1 }
 0x146   : > { %v1325_v15 = vadd.f32 %v2275_v39, %v1259_v11  ;;  %v1855_v16 = vadd.f32 %v1854_v14, %v1853_v10  ;;  %v1744_v17 = vpop.f32.mrf.mxu0 }
 0x147   : > { %v1856_v18 = vpop.f32.mrf.mxu1 }
 0x148   : > { %1424 = vst [vmem:[%s2280_s20 + $0xa0] sm:$0xff] %v1325_v15  ;;  %v1262_v19 = vadd.f32 %v1855_v16, %v1743_v13  ;;  %v1745_v20 = vpop.f32.mrf.mxu0 }
 0x149   : > { %v1746_v21 = vadd.f32 %v1745_v20, %v1744_v17  ;;  %v1857_v22 = vpop.f32.mrf.mxu1 }
 0x14a   : > { %v1326_v23 = vadd.f32 %v2275_v39, %v1262_v19  ;;  %v1858_v24 = vadd.f32 %v1857_v22, %v1856_v18  ;;  %v1747_v25 = vpop.f32.mrf.mxu0 }
 0x14b   : > { %v1859_v26 = vpop.f32.mrf.mxu1 }
 0x14c   : > { %1425 = vst [vmem:[%s2280_s20 + $0xa8] sm:$0xff] %v1326_v23  ;;  %v1267_v27 = vadd.f32 %v1858_v24, %v1746_v21  ;;  %v1748_v28 = vpop.f32.mrf.mxu0 }
 0x14d   : > { %v1749_v29 = vadd.f32 %v1748_v28, %v1747_v25  ;;  %v1860_v30 = vpop.f32.mrf.mxu1 }
 0x14e   : > { %v1327_v31 = vadd.f32 %v2275_v39, %v1267_v27  ;;  %v1861_v32 = vadd.f32 %v1860_v30, %v1859_v26  ;;  %v1750_v33 = vpop.f32.mrf.mxu0 }
 0x14f   : > { %v1862_v34 = vpop.f32.mrf.mxu1 }
 0x150   : > { %1426 = vst [vmem:[%s2280_s20 + $0xb0] sm:$0xff] %v1327_v31  ;;  %v1270_v35 = vadd.f32 %v1861_v32, %v1749_v29  ;;  %v1751_v36 = vpop.f32.mrf.mxu0 }
 0x151   : > { %v1752_v37 = vadd.f32 %v1751_v36, %v1750_v33  ;;  %v1863_v38 = vpop.f32.mrf.mxu1 }
 0x152   : > { %v1328_v40 = vadd.f32 %v2275_v39, %v1270_v35  ;;  %v1864_v41 = vadd.f32 %v1863_v38, %v1862_v34  ;;  %v1753_v42 = vpop.f32.mrf.mxu0 }
 0x153   : > { %v1865_v43 = vpop.f32.mrf.mxu1 }
 0x154   : > { %1427 = vst [vmem:[%s2280_s20 + $0xb8] sm:$0xff] %v1328_v40  ;;  %v1275_v44 = vadd.f32 %v1864_v41, %v1752_v37  ;;  %v1754_v45 = vpop.f32.mrf.mxu0 }
 0x155   : > { %v1755_v46 = vadd.f32 %v1754_v45, %v1753_v42  ;;  %v1866_v47 = vpop.f32.mrf.mxu1 }
 0x156   : > { %v1329_v48 = vadd.f32 %v2275_v39, %v1275_v44  ;;  %v1867_v49 = vadd.f32 %v1866_v47, %v1865_v43  ;;  %v1756_v50 = vpop.f32.mrf.mxu0 }
 0x157   : > { %v1868_v51 = vpop.f32.mrf.mxu1 }
 0x158   : > { %1428 = vst [vmem:[%s2280_s20 + $0xc0] sm:$0xff] %v1329_v48  ;;  %v1278_v52 = vadd.f32 %v1867_v49, %v1755_v46  ;;  %v1757_v53 = vpop.f32.mrf.mxu0 }
 0x159   : > { %v1758_v54 = vadd.f32 %v1757_v53, %v1756_v50  ;;  %v1869_v55 = vpop.f32.mrf.mxu1 }
 0x15a   : > { %v1330_v56 = vadd.f32 %v2275_v39, %v1278_v52  ;;  %v1870_v57 = vadd.f32 %v1869_v55, %v1868_v51  ;;  %v1759_v58 = vpop.f32.mrf.mxu0 }
 0x15b   : > { %v1871_v59 = vpop.f32.mrf.mxu1 }
 0x15c   : > { %1429 = vst [vmem:[%s2280_s20 + $0xc8] sm:$0xff] %v1330_v56  ;;  %v1283_v60 = vadd.f32 %v1870_v57, %v1758_v54  ;;  %v1760_v61 = vpop.f32.mrf.mxu0 }
 0x15d   : > { %v1761_v62 = vadd.f32 %v1760_v61, %v1759_v58  ;;  %v1872_v63 = vpop.f32.mrf.mxu1 }
 0x15e   : > { %v1331_v0 = vadd.f32 %v2275_v39, %v1283_v60  ;;  %v1873_v1 = vadd.f32 %v1872_v63, %v1871_v59  ;;  %v1762_v2 = vpop.f32.mrf.mxu0 }
 0x15f   : > { %v1874_v3 = vpop.f32.mrf.mxu1 }
 0x160   : > { %1430 = vst [vmem:[%s2280_s20 + $0xd0] sm:$0xff] %v1331_v0  ;;  %v1286_v4 = vadd.f32 %v1873_v1, %v1761_v62  ;;  %v1763_v5 = vpop.f32.mrf.mxu0 }
 0x161   : > { %v1764_v6 = vadd.f32 %v1763_v5, %v1762_v2  ;;  %v1875_v7 = vpop.f32.mrf.mxu1 }
 0x162   : > { %v1332_v8 = vadd.f32 %v2275_v39, %v1286_v4  ;;  %v1876_v9 = vadd.f32 %v1875_v7, %v1874_v3  ;;  %v1765_v10 = vpop.f32.mrf.mxu0 }
 0x163   : > { %v1877_v11 = vpop.f32.mrf.mxu1 }
 0x164   : > { %1431 = vst [vmem:[%s2280_s20 + $0xd8] sm:$0xff] %v1332_v8  ;;  %v1291_v12 = vadd.f32 %v1876_v9, %v1764_v6  ;;  %v1766_v13 = vpop.f32.mrf.mxu0 }
 0x165   : > { %v1767_v14 = vadd.f32 %v1766_v13, %v1765_v10  ;;  %v1878_v15 = vpop.f32.mrf.mxu1 }
 0x166   : > { %v1333_v16 = vadd.f32 %v2275_v39, %v1291_v12  ;;  %v1879_v17 = vadd.f32 %v1878_v15, %v1877_v11  ;;  %v1768_v18 = vpop.f32.mrf.mxu0 }
 0x167   : > { %v1880_v19 = vpop.f32.mrf.mxu1 }
 0x168   : > { %1432 = vst [vmem:[%s2280_s20 + $0xe0] sm:$0xff] %v1333_v16  ;;  %v1294_v20 = vadd.f32 %v1879_v17, %v1767_v14  ;;  %v1769_v21 = vpop.f32.mrf.mxu0 }
 0x169   : > { %v1770_v22 = vadd.f32 %v1769_v21, %v1768_v18  ;;  %v1881_v23 = vpop.f32.mrf.mxu1 }
 0x16a   : > { %v1334_v24 = vadd.f32 %v2275_v39, %v1294_v20  ;;  %v1882_v25 = vadd.f32 %v1881_v23, %v1880_v19  ;;  %v1771_v26 = vpop.f32.mrf.mxu0 }
 0x16b   : > { %v1883_v27 = vpop.f32.mrf.mxu1 }
 0x16c   : > { %1433 = vst [vmem:[%s2280_s20 + $0xe8] sm:$0xff] %v1334_v24  ;;  %v1299_v28 = vadd.f32 %v1882_v25, %v1770_v22  ;;  %v1772_v29 = vpop.f32.mrf.mxu0 }
 0x16d   : > { %v1773_v30 = vadd.f32 %v1772_v29, %v1771_v26  ;;  %v1884_v31 = vpop.f32.mrf.mxu1 }
 0x16e   : > { %v1335_v32 = vadd.f32 %v2275_v39, %v1299_v28  ;;  %v1885_v33 = vadd.f32 %v1884_v31, %v1883_v27 }
 0x170   : > { %1434 = vst [vmem:[%s2280_s20 + $0xf0] sm:$0xff] %v1335_v32  ;;  %v1302_v34 = vadd.f32 %v1885_v33, %v1773_v30 }
 0x172   : > { %v1336_v35 = vadd.f32 %v2275_v39, %v1302_v34 }
 0x174   : > { %1435 = vst [vmem:[%s2280_s20 + $0xf8] sm:$0xff] %v1336_v35 }
 0x175 PF: > { %s13_s14 = sadd.s32 1, %s2060_s14   ;;  %s2359_s12 = smov %s2056_s13 }
 0x176   : > { %p10_p5 = scmp.ge.s32.totalorder %s13_s14, 34   ;;  %s2360_s13 = smov %s2362_s15 }
 0x178   :  { %12 = sbr.rel (!%p10_p5) target bundleno = 2 (0x2), region = 76 }

// kernel: eq.22
= control target key start
LH: loop header
LB: loop body
LE: loop exit
PB: predicated region body
PF: predicated region fallthrough
CT: control target
= control target key end

     0   :  { %s133_s10 = smov 120   ;;  %s134_s11 = smov 104   ;;  %vm3_vm0 = vcmask 64512   ;;  %vm9_vm1 = vcmask 1048512   ;;  %vm15_vm2 = vcmask 982912   ;;  %vm21_vm3 = vcmask 917312   ;;  %s209_s0 = inlined_call_operand.vmem [shape: s32[16,8], index: 0, kind: input, shape index: {}]   ;;  %s210_s1 = inlined_call_operand.vmem [shape: s32[128], index: 1, kind: output, shape index: {}]  }
   0x1   :  { %v103_v0 = vld [vmem:[%s209_s0 + $0xf] sm:$0x1]   ;;  %v105_v1 = vld [vmem:[%s209_s0 + $0xd] sm:$0x1]   ;;  %v104_v2 = vld [vmem:[%s209_s0 + $0xe] sm:$0x1]  }
   0x2   :  { %7 = vrot.lane.b32.xlu0 %v103_v0, %s133_s10  ;;  %19 = vrot.lane.b32.xlu1 %v105_v1, %s134_s11  ;;  %v106_v3 = vld [vmem:[%s209_s0 + $0xc] sm:$0x1]   ;;  %s135_s16 = smov 112   ;;  %s136_s17 = smov 96   ;;  %v107_v4 = vld [vmem:[%s209_s0 + $0xb] sm:$0x1]  }
   0x3   :  { %v108_v5 = vld [vmem:[%s209_s0 + $0xa] sm:$0x1]   ;;  %v2_v6 = vld [vmem:[%s209_s0] sm:$0x1]   ;;  %s137_s24 = smov 88   ;;  %s138_s25 = smov 80  }
   0x4   :  { %4 = vst.msk [vmem:[#allocation0] sm:$0x1] %vm3_vm0, %v2_v6   ;;  %v109_v7 = vld [vmem:[%s209_s0 + $0x9] sm:$0x1]   ;;  %v110_v8 = vld [vmem:[%s209_s0 + $0x8] sm:$0x1]  }
   0x5   :  { %s139_s30 = smov 72   ;;  %s140_s2 = smov 64   ;;  %v111_v9 = vld [vmem:[%s209_s0 + $0x7] sm:$0x1]   ;;  %v112_v10 = vld [vmem:[%s209_s0 + $0x6] sm:$0x1]  }
   0x6   :  { %13 = vrot.lane.b32.xlu0 %v104_v2, %s135_s16  ;;  %25 = vrot.lane.b32.xlu1 %v106_v3, %s136_s17  ;;  %s141_s7 = smov 56   ;;  %s142_s8 = smov 48   ;;  %v113_v11 = vld [vmem:[%s209_s0 + $0x5] sm:$0x1]   ;;  %v114_v12 = vld [vmem:[%s209_s0 + $0x4] sm:$0x1]  }
   0x7   :  { %s143_s13 = smov 40   ;;  %s144_s14 = smov 32   ;;  %v115_v13 = vld [vmem:[%s209_s0 + $0x3] sm:$0x1]   ;;  %v116_v14 = vld [vmem:[%s209_s0 + $0x2] sm:$0x1]  }
   0x8   :  { %s145_s19 = smov 24   ;;  %s146_s20 = smov 16   ;;  %v117_v15 = vld [vmem:[%s209_s0 + $0x1] sm:$0x1]   ;;  %vm27_vm4 = vcmask 851712   ;;  %vm33_vm5 = vcmask 786112  }
   0x9   :  { %s147_s0 = smov 8   ;;  %vm39_vm6 = vcmask 720512   ;;  %vm45_vm7 = vcmask 654912   ;;  %vm51_vm8 = vcmask 589312   ;;  %vm57_vm9 = vcmask 523712  }
   0xa   :  { %31 = vrot.lane.b32.xlu0 %v107_v4, %s137_s24  ;;  %37 = vrot.lane.b32.xlu1 %v108_v5, %s138_s25  ;;  %vm63_vm10 = vcmask 458112   ;;  %vm69_vm11 = vcmask 392512   ;;  %vm75_vm12 = vcmask 326912   ;;  %vm81_vm13 = vcmask 261312  }
   0xb   :  { %vm87_vm14 = vcmask 195712   ;;  %vm93_vm15 = vcmask 130112  }
   0xe   :  { %43 = vrot.lane.b32.xlu0 %v109_v7, %s139_s30  ;;  %49 = vrot.lane.b32.xlu1 %v110_v8, %s140_s2 }
  0x12   :  { %55 = vrot.lane.b32.xlu0 %v111_v9, %s141_s7  ;;  %61 = vrot.lane.b32.xlu1 %v112_v10, %s142_s8 }
  0x16   :  { %67 = vrot.lane.b32.xlu0 %v113_v11, %s143_s13  ;;  %73 = vrot.lane.b32.xlu1 %v114_v12, %s144_s14 }
  0x1a   :  { %79 = vrot.lane.b32.xlu0 %v115_v13, %s145_s19  ;;  %85 = vrot.lane.b32.xlu1 %v116_v14, %s146_s20 }
  0x1e   :  { %91 = vrot.lane.b32.xlu0 %v117_v15, %s147_s0 }
  0x74   :  { %v8_v16 = vpop.permute.xlu0 %7   ;;  %v20_v17 = vpop.permute.xlu1 %19  }
  0x75   :  { %10 = vst.msk [vmem:[#allocation0] sm:$0x1] %vm9_vm1, %v8_v16  }
  0x78   :  { %v14_v18 = vpop.permute.xlu0 %13   ;;  %v26_v19 = vpop.permute.xlu1 %25  }
  0x79   :  { %16 = vst.msk [vmem:[#allocation0] sm:$0x1] %vm15_vm2, %v14_v18  }
  0x7a   :  { %22 = vst.msk [vmem:[#allocation0] sm:$0x1] %vm21_vm3, %v20_v17  }
  0x7b   :  { %28 = vst.msk [vmem:[#allocation0] sm:$0x1] %vm27_vm4, %v26_v19  }
  0x7c   :  { %v32_v20 = vpop.permute.xlu0 %31   ;;  %v38_v21 = vpop.permute.xlu1 %37  }
  0x7d   :  { %34 = vst.msk [vmem:[#allocation0] sm:$0x1] %vm33_vm5, %v32_v20  }
  0x7e   :  { %40 = vst.msk [vmem:[#allocation0] sm:$0x1] %vm39_vm6, %v38_v21  }
  0x80   :  { %v44_v22 = vpop.permute.xlu0 %43   ;;  %v50_v23 = vpop.permute.xlu1 %49  }
  0x81   :  { %46 = vst.msk [vmem:[#allocation0] sm:$0x1] %vm45_vm7, %v44_v22  }
  0x82   :  { %52 = vst.msk [vmem:[#allocation0] sm:$0x1] %vm51_vm8, %v50_v23  }
  0x84   :  { %v56_v24 = vpop.permute.xlu0 %55   ;;  %v62_v25 = vpop.permute.xlu1 %61  }
  0x85   :  { %58 = vst.msk [vmem:[#allocation0] sm:$0x1] %vm57_vm9, %v56_v24  }
  0x86   :  { %64 = vst.msk [vmem:[#allocation0] sm:$0x1] %vm63_vm10, %v62_v25  }
  0x88   :  { %v68_v26 = vpop.permute.xlu0 %67   ;;  %v74_v27 = vpop.permute.xlu1 %73  }
  0x89   :  { %70 = vst.msk [vmem:[#allocation0] sm:$0x1] %vm69_vm11, %v68_v26  }
  0x8a   :  { %76 = vst.msk [vmem:[#allocation0] sm:$0x1] %vm75_vm12, %v74_v27  }
  0x8c   :  { %v80_v28 = vpop.permute.xlu0 %79   ;;  %v86_v29 = vpop.permute.xlu1 %85  }
  0x8d   :  { %82 = vst.msk [vmem:[#allocation0] sm:$0x1] %vm81_vm13, %v80_v28  }
  0x8e   :  { %88 = vst.msk [vmem:[#allocation0] sm:$0x1] %vm87_vm14, %v86_v29  }
  0x90   :  { %v92_v30 = vpop.permute.xlu0 %91  }
  0x91   :  { %94 = vst.msk [vmem:[#allocation0] sm:$0x1] %vm93_vm15, %v92_v30  }
  0x98   :  { %v99_v31 = vld [vmem:[#allocation0] sm:$0x1] }
  0x99   :  { %102 = vst [vmem:[%s210_s1] sm:$0x1] %v99_v31 }

// kernel: tile.57
= control target key start
LH: loop header
LB: loop body
LE: loop exit
PB: predicated region body
PF: predicated region fallthrough
CT: control target
= control target key end

     0   :  { %s28_s0 = inlined_call_operand.vmem [shape: f32[8], index: 0, kind: input, shape index: {}]   ;;  %s29_s1 = inlined_call_operand.vmem [shape: f32[16,8], index: 1, kind: output, shape index: {}]  }
   0x1   :  { %v4_v0 = vld [vmem:[%s28_s0] ss:$0 sm:$0xff] }
   0x2   :  { %5 = vst [vmem:[%s29_s1] sm:$0xff] %v4_v0  ;;  %8 = vst [vmem:[%s29_s1 + $0x8] sm:$0xff] %v4_v0 }

// kernel: tile.58
= control target key start
LH: loop header
LB: loop body
LE: loop exit
PB: predicated region body
PF: predicated region fallthrough
CT: control target
= control target key end

     0   :  { %s133_s10 = smov 120   ;;  %s134_s11 = smov 104   ;;  %vm3_vm0 = vcmask 64512   ;;  %vm9_vm1 = vcmask 1048512   ;;  %vm15_vm2 = vcmask 982912   ;;  %vm21_vm3 = vcmask 917312   ;;  %s209_s0 = inlined_call_operand.vmem [shape: f32[16,8], index: 0, kind: input, shape index: {}]   ;;  %s210_s1 = inlined_call_operand.vmem [shape: f32[1,128], index: 1, kind: output, shape index: {}]  }
   0x1   :  { %v103_v0 = vld [vmem:[%s209_s0 + $0xf] sm:$0x1]   ;;  %v105_v1 = vld [vmem:[%s209_s0 + $0xd] sm:$0x1]   ;;  %v104_v2 = vld [vmem:[%s209_s0 + $0xe] sm:$0x1]  }
   0x2   :  { %7 = vrot.lane.b32.xlu0 %v103_v0, %s133_s10  ;;  %19 = vrot.lane.b32.xlu1 %v105_v1, %s134_s11  ;;  %v106_v3 = vld [vmem:[%s209_s0 + $0xc] sm:$0x1]   ;;  %s135_s16 = smov 112   ;;  %s136_s17 = smov 96   ;;  %v107_v4 = vld [vmem:[%s209_s0 + $0xb] sm:$0x1]  }
   0x3   :  { %v108_v5 = vld [vmem:[%s209_s0 + $0xa] sm:$0x1]   ;;  %v2_v6 = vld [vmem:[%s209_s0] sm:$0x1]   ;;  %s137_s24 = smov 88   ;;  %s138_s25 = smov 80  }
   0x4   :  { %4 = vst.msk [vmem:[#allocation0] sm:$0x1] %vm3_vm0, %v2_v6   ;;  %v109_v7 = vld [vmem:[%s209_s0 + $0x9] sm:$0x1]   ;;  %v110_v8 = vld [vmem:[%s209_s0 + $0x8] sm:$0x1]  }
   0x5   :  { %s139_s30 = smov 72   ;;  %s140_s2 = smov 64   ;;  %v111_v9 = vld [vmem:[%s209_s0 + $0x7] sm:$0x1]   ;;  %v112_v10 = vld [vmem:[%s209_s0 + $0x6] sm:$0x1]  }
   0x6   :  { %13 = vrot.lane.b32.xlu0 %v104_v2, %s135_s16  ;;  %25 = vrot.lane.b32.xlu1 %v106_v3, %s136_s17  ;;  %s141_s7 = smov 56   ;;  %s142_s8 = smov 48   ;;  %v113_v11 = vld [vmem:[%s209_s0 + $0x5] sm:$0x1]   ;;  %v114_v12 = vld [vmem:[%s209_s0 + $0x4] sm:$0x1]  }
   0x7   :  { %s143_s13 = smov 40   ;;  %s144_s14 = smov 32   ;;  %v115_v13 = vld [vmem:[%s209_s0 + $0x3] sm:$0x1]   ;;  %v116_v14 = vld [vmem:[%s209_s0 + $0x2] sm:$0x1]  }
   0x8   :  { %s145_s19 = smov 24   ;;  %s146_s20 = smov 16   ;;  %v117_v15 = vld [vmem:[%s209_s0 + $0x1] sm:$0x1]   ;;  %vm27_vm4 = vcmask 851712   ;;  %vm33_vm5 = vcmask 786112  }
   0x9   :  { %s147_s0 = smov 8   ;;  %vm39_vm6 = vcmask 720512   ;;  %vm45_vm7 = vcmask 654912   ;;  %vm51_vm8 = vcmask 589312   ;;  %vm57_vm9 = vcmask 523712  }
   0xa   :  { %31 = vrot.lane.b32.xlu0 %v107_v4, %s137_s24  ;;  %37 = vrot.lane.b32.xlu1 %v108_v5, %s138_s25  ;;  %vm63_vm10 = vcmask 458112   ;;  %vm69_vm11 = vcmask 392512   ;;  %vm75_vm12 = vcmask 326912   ;;  %vm81_vm13 = vcmask 261312  }
   0xb   :  { %vm87_vm14 = vcmask 195712   ;;  %vm93_vm15 = vcmask 130112  }
   0xe   :  { %43 = vrot.lane.b32.xlu0 %v109_v7, %s139_s30  ;;  %49 = vrot.lane.b32.xlu1 %v110_v8, %s140_s2 }
  0x12   :  { %55 = vrot.lane.b32.xlu0 %v111_v9, %s141_s7  ;;  %61 = vrot.lane.b32.xlu1 %v112_v10, %s142_s8 }
  0x16   :  { %67 = vrot.lane.b32.xlu0 %v113_v11, %s143_s13  ;;  %73 = vrot.lane.b32.xlu1 %v114_v12, %s144_s14 }
  0x1a   :  { %79 = vrot.lane.b32.xlu0 %v115_v13, %s145_s19  ;;  %85 = vrot.lane.b32.xlu1 %v116_v14, %s146_s20 }
  0x1e   :  { %91 = vrot.lane.b32.xlu0 %v117_v15, %s147_s0 }
  0x74   :  { %v8_v16 = vpop.permute.xlu0 %7   ;;  %v20_v17 = vpop.permute.xlu1 %19  }
  0x75   :  { %10 = vst.msk [vmem:[#allocation0] sm:$0x1] %vm9_vm1, %v8_v16  }
  0x78   :  { %v14_v18 = vpop.permute.xlu0 %13   ;;  %v26_v19 = vpop.permute.xlu1 %25  }
  0x79   :  { %16 = vst.msk [vmem:[#allocation0] sm:$0x1] %vm15_vm2, %v14_v18  }
  0x7a   :  { %22 = vst.msk [vmem:[#allocation0] sm:$0x1] %vm21_vm3, %v20_v17  }
  0x7b   :  { %28 = vst.msk [vmem:[#allocation0] sm:$0x1] %vm27_vm4, %v26_v19  }
  0x7c   :  { %v32_v20 = vpop.permute.xlu0 %31   ;;  %v38_v21 = vpop.permute.xlu1 %37  }
  0x7d   :  { %34 = vst.msk [vmem:[#allocation0] sm:$0x1] %vm33_vm5, %v32_v20  }
  0x7e   :  { %40 = vst.msk [vmem:[#allocation0] sm:$0x1] %vm39_vm6, %v38_v21  }
  0x80   :  { %v44_v22 = vpop.permute.xlu0 %43   ;;  %v50_v23 = vpop.permute.xlu1 %49  }
  0x81   :  { %46 = vst.msk [vmem:[#allocation0] sm:$0x1] %vm45_vm7, %v44_v22  }
  0x82   :  { %52 = vst.msk [vmem:[#allocation0] sm:$0x1] %vm51_vm8, %v50_v23  }
  0x84   :  { %v56_v24 = vpop.permute.xlu0 %55   ;;  %v62_v25 = vpop.permute.xlu1 %61  }
  0x85   :  { %58 = vst.msk [vmem:[#allocation0] sm:$0x1] %vm57_vm9, %v56_v24  }
  0x86   :  { %64 = vst.msk [vmem:[#allocation0] sm:$0x1] %vm63_vm10, %v62_v25  }
  0x88   :  { %v68_v26 = vpop.permute.xlu0 %67   ;;  %v74_v27 = vpop.permute.xlu1 %73  }
  0x89   :  { %70 = vst.msk [vmem:[#allocation0] sm:$0x1] %vm69_vm11, %v68_v26  }
  0x8a   :  { %76 = vst.msk [vmem:[#allocation0] sm:$0x1] %vm75_vm12, %v74_v27  }
  0x8c   :  { %v80_v28 = vpop.permute.xlu0 %79   ;;  %v86_v29 = vpop.permute.xlu1 %85  }
  0x8d   :  { %82 = vst.msk [vmem:[#allocation0] sm:$0x1] %vm81_vm13, %v80_v28  }
  0x8e   :  { %88 = vst.msk [vmem:[#allocation0] sm:$0x1] %vm87_vm14, %v86_v29  }
  0x90   :  { %v92_v30 = vpop.permute.xlu0 %91  }
  0x91   :  { %94 = vst.msk [vmem:[#allocation0] sm:$0x1] %vm93_vm15, %v92_v30  }
  0x98   :  { %v99_v31 = vld [vmem:[#allocation0] sm:$0x1] }
  0x99   :  { %102 = vst [vmem:[%s210_s1] sm:$0x1] %v99_v31 }

// kernel: sub_encoder_forward.8
= control target key start
LH: loop header
LB: loop body
LE: loop exit
PB: predicated region body
PF: predicated region fallthrough
CT: control target
= control target key end

     0   :  { %s859_s15 = smov 0   ;;  %s1267_s0 = inlined_call_operand.vmem [shape: f32[2,256,128], index: 0, kind: input, shape index: {}]   ;;  %s1268_s1 = inlined_call_operand.vmem [shape: f32[128,128], index: 1, kind: input, shape index: {}]   ;;  %s1269_s2 = inlined_call_operand.vmem [shape: f32[1,128], index: 2, kind: input, shape index: {}]   ;;  %s1270_s3 = inlined_call_operand.vmem [shape: f32[1,128], index: 3, kind: input, shape index: {}]   ;;  %s1271_s4 = inlined_call_operand.vmem [shape: f32[2,256,128], index: 4, kind: output, shape index: {}]  }
   0x1 LB: > { %s695_s16 = sadd.s32 4294967295, %s830_s15   ;;  %p699_p0 = scmp.ge.s32.totalorder %s830_s15, 1  ;;  %s830_s15 = sphi %s859_s15, %s14_s15  }
   0x2   : > { %p162_p1 = scmp.lt.s32.totalorder %s830_s15, 3 }
   0x4   : > { %p163_p2 = pnand %p699_p0, %p162_p1 }
   0x5   : > { %p188_p3 = scmp.lt.s32.totalorder (!%p163_p2), %s695_s16, 1 }
   0x6   : > { %166 = sbr.rel (%p163_p2) target bundleno = 350 (0x15e), region = 36 }
   0xb   : > { %v351_v0 = vld [vmem:[%s1268_s1 + $0x78] sm:$0xff]  ;;  %v832_v1 = vmov 0.0   ;;  %v350_v2 = vld [vmem:[%s1268_s1 + $0x70] sm:$0xff]  ;;  %s1273_s16 = smov (!%p188_p3, %s695_s16), 1  ;;  %v349_v3 = vld [vmem:[%s1268_s1 + $0x68] sm:$0xff]  ;;  %vm833_vm0 = vmmov 0  }
   0xc   : > { %742 = vmatprep.subr.mxu0 %v832_v1  ;;  %777 = vmatprep.subr.mxu1 %v832_v1  ;;  %s706_s23 = sshll.u32 %s1273_s16, 8  ;;  %v348_v4 = vld [vmem:[%s1268_s1 + $0x60] sm:$0xff]  ;;  %v347_v8 = vld [vmem:[%s1268_s1 + $0x58] sm:$0xff]  ;;  %v346_v11 = vld [vmem:[%s1268_s1 + $0x50] sm:$0xff] }
   0xd   : > { %743 = vmatpush3.msra.mxu0 %v351_v0  ;;  %778 = vmatpush3.msra.mxu1 %v351_v0  ;;  %s893_s28 = scalar_lea.vmem %s1267_s0, %s706_s23  ;;  %v345_v14 = vld [vmem:[%s1268_s1 + $0x48] sm:$0xff]  ;;  %v344_v17 = vld [vmem:[%s1268_s1 + $0x40] sm:$0xff]  ;;  %v343_v20 = vld [vmem:[%s1268_s1 + $0x38] sm:$0xff]  ;;  %s1210_s10 = scalar_lea.vmem %s1271_s4, %s706_s23 }
   0xe   : > { %744 = vmatprep.subr.mxu0 %v832_v1  ;;  %779 = vmatprep.subr.mxu1 %v832_v1  ;;  %v896_v5 = vld [vmem:[%s893_s28] sm:$0xff]  ;;  %v899_v6 = vld [vmem:[%s893_s28 + $0x8] sm:$0xff]  ;;  %v902_v7 = vld [vmem:[%s893_s28 + $0x10] sm:$0xff] }
   0xf   : > { %745 = vmatpush3.msra.mxu0 %v350_v2  ;;  %780 = vmatpush3.msra.mxu1 %v350_v2  ;;  %v230_v9 = vadd.f32 %v899_v6, %v896_v5  ;;  %v912_v10 = vld [vmem:[%s893_s28 + $0x18] sm:$0xff]  ;;  %v921_v13 = vld [vmem:[%s893_s28 + $0x20] sm:$0xff]  ;;  %v930_v16 = vld [vmem:[%s893_s28 + $0x28] sm:$0xff]  ;;  %v267_v23 = vmul.f32 %v896_v5, %v896_v5  ;;  %v268_v24 = vmul.f32 %v899_v6, %v899_v6 }
  0x10   : > { %746 = vmatprep.subr.mxu0 %v832_v1  ;;  %781 = vmatprep.subr.mxu1 %v832_v1  ;;  %v939_v19 = vld [vmem:[%s893_s28 + $0x30] sm:$0xff]  ;;  %v948_v22 = vld [vmem:[%s893_s28 + $0x38] sm:$0xff]  ;;  %v961_v27 = vld [vmem:[%s893_s28 + $0x40] sm:$0xff]  ;;  %v269_v28 = vmul.f32 %v902_v7, %v902_v7  ;;  %v270_v32 = vmul.f32 %v912_v10, %v912_v10  ;;  %v271_v37 = vmul.f32 %v921_v13, %v921_v13 }
  0x11   : > { %747 = vmatpush3.msra.mxu0 %v349_v3  ;;  %782 = vmatpush3.msra.mxu1 %v349_v3  ;;  %v231_v12 = vadd.f32 %v230_v9, %v902_v7  ;;  %v342_v25 = vld [vmem:[%s1268_s1 + $0x30] sm:$0xff]  ;;  %v341_v29 = vld [vmem:[%s1268_s1 + $0x28] sm:$0xff]  ;;  %v299_v33 = vadd.f32 %v268_v24, %v267_v23  ;;  %v340_v34 = vld [vmem:[%s1268_s1 + $0x20] sm:$0xff]  ;;  %v272_v42 = vmul.f32 %v930_v16, %v930_v16 }
  0x12   : > { %748 = vmatprep.subr.mxu0 %v832_v1  ;;  %783 = vmatprep.subr.mxu1 %v832_v1  ;;  %v972_v31 = vld [vmem:[%s893_s28 + $0x48] sm:$0xff]  ;;  %v983_v36 = vld [vmem:[%s893_s28 + $0x50] sm:$0xff]  ;;  %v339_v39 = vld [vmem:[%s1268_s1 + $0x18] sm:$0xff]  ;;  %v273_v47 = vmul.f32 %v939_v19, %v939_v19  ;;  %v274_v52 = vmul.f32 %v948_v22, %v948_v22  ;;  %v275_v57 = vmul.f32 %v961_v27, %v961_v27 }
  0x13   : > { %749 = vmatpush3.msra.mxu0 %v348_v4  ;;  %784 = vmatpush3.msra.mxu1 %v348_v4  ;;  %v232_v15 = vadd.f32 %v231_v12, %v912_v10  ;;  %v300_v38 = vadd.f32 %v299_v33, %v269_v28  ;;  %v994_v41 = vld [vmem:[%s893_s28 + $0x58] sm:$0xff]  ;;  %v338_v44 = vld [vmem:[%s1268_s1 + $0x10] sm:$0xff]  ;;  %v1005_v46 = vld [vmem:[%s893_s28 + $0x60] sm:$0xff]  ;;  %v276_v61 = vmul.f32 %v972_v31, %v972_v31 }
  0x14   : > { %750 = vmatprep.subr.mxu0 %v832_v1  ;;  %785 = vmatprep.subr.mxu1 %v832_v1  ;;  %v337_v49 = vld [vmem:[%s1268_s1 + $0x8] sm:$0xff]  ;;  %v336_v54 = vld [vmem:[%s1268_s1] sm:$0xff]  ;;  %v1028_v56 = vld [vmem:[%s893_s28 + $0x70] sm:$0xff]  ;;  %v277_v2 = vmul.f32 %v983_v36, %v983_v36  ;;  %v278_v9 = vmul.f32 %v994_v41, %v994_v41 }
  0x15   : > { %751 = vmatpush3.msra.mxu0 %v347_v8  ;;  %786 = vmatpush3.msra.mxu1 %v347_v8  ;;  %v233_v18 = vadd.f32 %v232_v15, %v921_v13  ;;  %v301_v43 = vadd.f32 %v300_v38, %v270_v32  ;;  %v1016_v51 = vld [vmem:[%s893_s28 + $0x68] sm:$0xff]  ;;  %v1035_v60 = vld [vmem:[%s893_s28 + $0x78] sm:$0xff]  ;;  %v1043_v0 = vld [vmem:[%s893_s28 + $0x80] sm:$0xff] }
  0x16   : > { %752 = vmatprep.subr.mxu0 %v832_v1  ;;  %787 = vmatprep.subr.mxu1 %v832_v1  ;;  %v1049_v8 = vld [vmem:[%s893_s28 + $0x88] sm:$0xff]  ;;  %v1067_v24 = vld [vmem:[%s893_s28 + $0xa0] sm:$0xff] }
  0x17   : > { %753 = vmatpush3.msra.mxu0 %v346_v11  ;;  %788 = vmatpush3.msra.mxu1 %v346_v11  ;;  %v234_v21 = vadd.f32 %v233_v18, %v930_v16  ;;  %v302_v48 = vadd.f32 %v301_v43, %v271_v37  ;;  %v1061_v18 = vld [vmem:[%s893_s28 + $0x98] sm:$0xff] }
  0x18   : > { %754 = vmatprep.subr.mxu0 %v832_v1  ;;  %789 = vmatprep.subr.mxu1 %v832_v1 }
  0x19   : > { %755 = vmatpush3.msra.mxu0 %v345_v14  ;;  %790 = vmatpush3.msra.mxu1 %v345_v14  ;;  %v235_v26 = vadd.f32 %v234_v21, %v939_v19  ;;  %v303_v53 = vadd.f32 %v302_v48, %v272_v42  ;;  %v1055_v14 = vld [vmem:[%s893_s28 + $0x90] sm:$0xff] }
  0x1a   : > { %756 = vmatprep.subr.mxu0 %v832_v1  ;;  %791 = vmatprep.subr.mxu1 %v832_v1 }
  0x1b   : > { %757 = vmatpush3.msra.mxu0 %v344_v17  ;;  %792 = vmatpush3.msra.mxu1 %v344_v17  ;;  %v236_v30 = vadd.f32 %v235_v26, %v948_v22  ;;  %v304_v58 = vadd.f32 %v303_v53, %v273_v47 }
  0x1c   : > { %758 = vmatprep.subr.mxu0 %v832_v1  ;;  %793 = vmatprep.subr.mxu1 %v832_v1 }
  0x1d   : > { %759 = vmatpush3.msra.mxu0 %v343_v20  ;;  %794 = vmatpush3.msra.mxu1 %v343_v20  ;;  %v237_v35 = vadd.f32 %v236_v30, %v961_v27  ;;  %v305_v62 = vadd.f32 %v304_v58, %v274_v52  ;;  %v280_v20 = vmul.f32 %v1016_v51, %v1016_v51 }
  0x1e   : > { %760 = vmatprep.subr.mxu0 %v832_v1  ;;  %795 = vmatprep.subr.mxu1 %v832_v1  ;;  %v282_v30 = vmul.f32 %v1035_v60, %v1035_v60 }
  0x1f   : > { %761 = vmatpush3.msra.mxu0 %v342_v25  ;;  %796 = vmatpush3.msra.mxu1 %v342_v25  ;;  %v238_v40 = vadd.f32 %v237_v35, %v972_v31  ;;  %v306_v3 = vadd.f32 %v305_v62, %v275_v57  ;;  %v281_v25 = vmul.f32 %v1028_v56, %v1028_v56 }
  0x20   : > { %762 = vmatprep.subr.mxu0 %v832_v1  ;;  %797 = vmatprep.subr.mxu1 %v832_v1  ;;  %v283_v35 = vmul.f32 %v1043_v0, %v1043_v0 }
  0x21   : > { %763 = vmatpush3.msra.mxu0 %v341_v29  ;;  %798 = vmatpush3.msra.mxu1 %v341_v29  ;;  %v239_v45 = vadd.f32 %v238_v40, %v983_v36  ;;  %v307_v11 = vadd.f32 %v306_v3, %v276_v61  ;;  %v1073_v29 = vld [vmem:[%s893_s28 + $0xa8] sm:$0xff]  ;;  %v284_v40 = vmul.f32 %v1049_v8, %v1049_v8 }
  0x22   : > { %764 = vmatprep.subr.mxu0 %v832_v1  ;;  %799 = vmatprep.subr.mxu1 %v832_v1  ;;  %v288_v61 = vmul.f32 %v1073_v29, %v1073_v29 }
  0x23   : > { %765 = vmatpush3.msra.mxu0 %v340_v34  ;;  %800 = vmatpush3.msra.mxu1 %v340_v34  ;;  %v240_v50 = vadd.f32 %v239_v45, %v994_v41  ;;  %v308_v15 = vadd.f32 %v307_v11, %v277_v2  ;;  %v1079_v34 = vld [vmem:[%s893_s28 + $0xb0] sm:$0xff]  ;;  %v285_v45 = vmul.f32 %v1055_v14, %v1055_v14  ;;  %v1115_v2 = vld [vmem:[%s893_s28 + $0xe0] sm:$0xff]  ;;  %v1121_v11 = vld [vmem:[%s893_s28 + $0xe8] sm:$0xff] }
  0x24   : > { %766 = vmatprep.subr.mxu0 %v832_v1  ;;  %801 = vmatprep.subr.mxu1 %v832_v1  ;;  %v289_v3 = vmul.f32 %v1079_v34, %v1079_v34 }
  0x25   : > { %767 = vmatpush3.msra.mxu0 %v339_v39  ;;  %802 = vmatpush3.msra.mxu1 %v339_v39  ;;  %v241_v55 = vadd.f32 %v240_v50, %v1005_v46  ;;  %v309_v21 = vadd.f32 %v308_v15, %v278_v9  ;;  %v1085_v39 = vld [vmem:[%s893_s28 + $0xb8] sm:$0xff]  ;;  %v286_v50 = vmul.f32 %v1061_v18, %v1061_v18 }
  0x26   : > { %768 = vmatprep.subr.mxu0 %v832_v1  ;;  %803 = vmatprep.subr.mxu1 %v832_v1 }
  0x27   : > { %769 = vmatpush3.msra.mxu0 %v338_v44  ;;  %804 = vmatpush3.msra.mxu1 %v338_v44  ;;  %v242_v59 = vadd.f32 %v241_v55, %v1016_v51  ;;  %v1091_v44 = vld [vmem:[%s893_s28 + $0xc0] sm:$0xff]  ;;  %v287_v55 = vmul.f32 %v1067_v24, %v1067_v24 }
  0x28   : > { %770 = vmatprep.subr.mxu0 %v832_v1  ;;  %805 = vmatprep.subr.mxu1 %v832_v1 }
  0x29   : > { %771 = vmatpush3.msra.mxu0 %v337_v49  ;;  %774 = vmatprep.mubr.msk.f32.mxu0 %vm833_vm0, %v832_v1  ;;  %v243_v63 = vadd.f32 %v242_v59, %v1028_v56  ;;  %v1109_v59 = vld [vmem:[%s893_s28 + $0xd8] sm:$0xff] }
  0x2a   : > { %772 = vmatprep.subr.mxu0 %v832_v1  ;;  %806 = vmatpush3.msra.mxu1 %v337_v49  ;;  %v1097_v49 = vld [vmem:[%s893_s28 + $0xc8] sm:$0xff] }
  0x2b   : > { %773 = vmatpush3.msra.mxu0 %v336_v54  ;;  %807 = vmatprep.subr.mxu1 %v832_v1  ;;  %v244_v4 = vadd.f32 %v243_v63, %v1035_v60 }
  0x2c   : > { %808 = vmatpush3.msra.mxu1 %v336_v54  ;;  %809 = vmatprep.mubr.msk.f32.mxu1 %vm833_vm0, %v832_v1  ;;  %v279_v1 = vmul.f32 %v1005_v46, %v1005_v46  ;;  %v1103_v54 = vld [vmem:[%s893_s28 + $0xd0] sm:$0xff] }
  0x2d   : > { %v245_v12 = vadd.f32 %v244_v4, %v1043_v0 }
  0x2e   : > { %v310_v26 = vadd.f32 %v309_v21, %v279_v1 }
  0x2f   : > { %v246_v17 = vadd.f32 %v245_v12, %v1049_v8  ;;  %v290_v12 = vmul.f32 %v1085_v39, %v1085_v39 }
  0x30   : > { %v311_v32 = vadd.f32 %v310_v26, %v280_v20  ;;  %v291_v20 = vmul.f32 %v1091_v44, %v1091_v44  ;;  %v292_v26 = vmul.f32 %v1097_v49, %v1097_v49 }
  0x31   : > { %v247_v23 = vadd.f32 %v246_v17, %v1055_v14  ;;  %v1127_v17 = vld [vmem:[%s893_s28 + $0xf0] sm:$0xff] }
  0x32   : > { %v312_v37 = vadd.f32 %v311_v32, %v281_v25  ;;  %v1133_v25 = vld [vmem:[%s893_s28 + $0xf8] sm:$0xff]  ;;  %v293_v32 = vmul.f32 %v1103_v54, %v1103_v54 }
  0x33   : > { %v248_v28 = vadd.f32 %v247_v23, %v1061_v18 }
  0x34   : > { %v313_v42 = vadd.f32 %v312_v37, %v282_v30  ;;  %v294_v37 = vmul.f32 %v1109_v59, %v1109_v59 }
  0x35   : > { %v249_v33 = vadd.f32 %v248_v28, %v1067_v24 }
  0x36   : > { %v314_v47 = vadd.f32 %v313_v42, %v283_v35  ;;  %v295_v42 = vmul.f32 %v1115_v2, %v1115_v2 }
  0x37   : > { %v250_v38 = vadd.f32 %v249_v33, %v1073_v29 }
  0x38   : > { %v315_v52 = vadd.f32 %v314_v47, %v284_v40  ;;  %v296_v47 = vmul.f32 %v1121_v11, %v1121_v11 }
  0x39   : > { %v251_v43 = vadd.f32 %v250_v38, %v1079_v34 }
  0x3a   : > { %v316_v57 = vadd.f32 %v315_v52, %v285_v45  ;;  %v297_v52 = vmul.f32 %v1127_v17, %v1127_v17 }
  0x3b   : > { %v252_v48 = vadd.f32 %v251_v43, %v1085_v39 }
  0x3c   : > { %v317_v62 = vadd.f32 %v316_v57, %v286_v50  ;;  %v298_v57 = vmul.f32 %v1133_v25, %v1133_v25 }
  0x3d   : > { %v253_v53 = vadd.f32 %v252_v48, %v1091_v44 }
  0x3e   : > { %v318_v4 = vadd.f32 %v317_v62, %v287_v55 }
  0x3f   : > { %v254_v58 = vadd.f32 %v253_v53, %v1097_v49 }
  0x40   : > { %v319_v1 = vadd.f32 %v318_v4, %v288_v61 }
  0x41   : > { %v255_v63 = vadd.f32 %v254_v58, %v1103_v54 }
  0x42   : > { %v320_v21 = vadd.f32 %v319_v1, %v289_v3 }
  0x43   : > { %v256_v9 = vadd.f32 %v255_v63, %v1109_v59 }
  0x44   : > { %v321_v28 = vadd.f32 %v320_v21, %v290_v12 }
  0x45   : > { %v257_v15 = vadd.f32 %v256_v9, %v1115_v2 }
  0x46   : > { %v322_v33 = vadd.f32 %v321_v28, %v291_v20 }
  0x47   : > { %v258_v23 = vadd.f32 %v257_v15, %v1121_v11 }
  0x48   : > { %v323_v38 = vadd.f32 %v322_v33, %v292_v26 }
  0x49   : > { %v259_v30 = vadd.f32 %v258_v23, %v1127_v17 }
  0x4a   : > { %v324_v43 = vadd.f32 %v323_v38, %v293_v32 }
  0x4b   : > { %v260_v35 = vadd.f32 %v259_v30, %v1133_v25 }
  0x4c   : > { %v325_v48 = vadd.f32 %v324_v43, %v294_v37  ;;  %v502_v37 = vlaneseq }
  0x4d   : > { %v261_v40 = vrot.slane %v260_v35, 4 }
  0x4e   : > { %v326_v53 = vadd.f32 %v325_v48, %v295_v42  ;;  %v503_v38 = vshrl.u32 %v502_v37, 7 }
  0x4f   : > { %v262_v45 = vadd.f32 %v261_v40, %v260_v35  ;;  %v497_v40 = vld [vmem:[%s1269_s2] sm:$0x1] }
  0x50   : > { %v327_v58 = vadd.f32 %v326_v53, %v296_v47  ;;  %v504_v42 = vsub.s32 0, %v503_v38  ;;  %v499_v47 = vld [vmem:[%s1270_s3] sm:$0x1] }
  0x51   : > { %v263_v50 = vrot.slane %v262_v45, 2 }
  0x52   : > { %v328_v62 = vadd.f32 %v327_v58, %v297_v52 }
  0x53   : > { %v264_v55 = vadd.f32 %v263_v50, %v262_v45 }
  0x54   : > { %v329_v3 = vadd.f32 %v328_v62, %v298_v57 }
  0x55   : > { %v265_v61 = vrot.slane %v264_v55, 1 }
  0x56   : > { %v330_v4 = vrot.slane %v329_v3, 4 }
  0x57   : > { %v266_v63 = vadd.f32 %v265_v61, %v264_v55 }
  0x58   : > { %v331_v9 = vadd.f32 %v330_v4, %v329_v3 }
  0x59   : > { %775 = vmatmul.mubr.f32.vlgmr.msra.gmra.mxu0 %v266_v63 }
  0x5a   : > { %v332_v12 = vrot.slane %v331_v9, 2 }
  0x5c   : > { %v333_v1 = vadd.f32 %v332_v12, %v331_v9 }
  0x5e   : > { %v334_v15 = vrot.slane %v333_v1, 1 }
  0x60   : > { %v335_v20 = vadd.f32 %v334_v15, %v333_v1 }
  0x62   : > { %810 = vmatmul.mubr.f32.vlgmr.msra.gmra.mxu1 %v335_v20 }
 0x119   : > { %v418_v21 = vpop.f32.mrf.mxu0 }
 0x11a   : > { %v492_v26 = vmul.f32 %v418_v21, %v418_v21 }
 0x11b   : > { %v776_v23 = vpop.f32.mrf.mxu0 }
 0x122   : > { %v488_v28 = vpop.f32.mrf.mxu1 }
 0x123   : > { %v493_v30 = vsub.f32 %v488_v28, %v492_v26 }
 0x124   : > { %v811_v32 = vpop.f32.mrf.mxu1 }
 0x125   : > { %v494_v33 = vmax.f32 %v493_v30, 0.0 }
 0x127   : > { %v495_v35 = vadd.f32 1e-05, %v494_v33 }
 0x129   : > { %822 = vrsqrt.f32 %v495_v35 }
 0x136   : > { %v823_v43 = vpop.eup %822 }
 0x137   : > { %v498_v45 = vmul.f32 %v823_v43, %v497_v40 }
 0x139   : > { %v500_v48 = vmul.f32 %v498_v45, %v418_v21  ;;  %v505_v50 = vrot.slane %v498_v45, %v504_v42 }
 0x13b   : > { %v501_v52 = vsub.f32 %v499_v47, %v500_v48  ;;  %v506_v53 = vmul.f32 %v505_v50, %v896_v5  ;;  %v507_v55 = vmul.f32 %v505_v50, %v899_v6  ;;  %v508_v57 = vmul.f32 %v505_v50, %v902_v7 }
 0x13c   : > { %v509_v58 = vmul.f32 %v505_v50, %v912_v10  ;;  %v510_v61 = vmul.f32 %v505_v50, %v921_v13  ;;  %v511_v62 = vmul.f32 %v505_v50, %v930_v16  ;;  %v512_v63 = vmul.f32 %v505_v50, %v939_v19 }
 0x13d   : > { %v513_v3 = vmul.f32 %v505_v50, %v948_v22  ;;  %v514_v4 = vmul.f32 %v505_v50, %v961_v27  ;;  %v515_v9 = vmul.f32 %v505_v50, %v972_v31  ;;  %v516_v5 = vmul.f32 %v505_v50, %v983_v36 }
 0x13e   : > { %v517_v6 = vmul.f32 %v505_v50, %v994_v41  ;;  %v518_v7 = vmul.f32 %v505_v50, %v1005_v46  ;;  %v519_v10 = vmul.f32 %v505_v50, %v1016_v51  ;;  %v520_v13 = vmul.f32 %v505_v50, %v1028_v56 }
 0x13f   : > { %v521_v16 = vmul.f32 %v505_v50, %v1035_v60  ;;  %v522_v19 = vmul.f32 %v505_v50, %v1043_v0  ;;  %v523_v22 = vmul.f32 %v505_v50, %v1049_v8  ;;  %v524_v27 = vmul.f32 %v505_v50, %v1055_v14 }
 0x140   : > { %v525_v31 = vmul.f32 %v505_v50, %v1061_v18  ;;  %v526_v36 = vmul.f32 %v505_v50, %v1067_v24  ;;  %v527_v41 = vmul.f32 %v505_v50, %v1073_v29  ;;  %v528_v46 = vmul.f32 %v505_v50, %v1079_v34 }
 0x141   : > { %v529_v51 = vmul.f32 %v505_v50, %v1085_v39  ;;  %v530_v56 = vmul.f32 %v505_v50, %v1091_v44  ;;  %v531_v60 = vmul.f32 %v505_v50, %v1097_v49  ;;  %v532_v0 = vmul.f32 %v505_v50, %v1103_v54 }
 0x142   : > { %v533_v8 = vmul.f32 %v505_v50, %v1109_v59  ;;  %v542_v12 = vrot.slane %v501_v52, %v504_v42  ;;  %v534_v14 = vmul.f32 %v505_v50, %v1115_v2  ;;  %v535_v18 = vmul.f32 %v505_v50, %v1121_v11 }
 0x143   : > { %v536_v24 = vmul.f32 %v505_v50, %v1127_v17  ;;  %v537_v29 = vmul.f32 %v505_v50, %v1133_v25 }
 0x144   : > { %v544_v34 = vadd.f32 %v542_v12, %v506_v53  ;;  %v545_v1 = vadd.f32 %v542_v12, %v507_v55  ;;  %v546_v39 = vadd.f32 %v542_v12, %v508_v57  ;;  %v547_v15 = vadd.f32 %v542_v12, %v509_v58 }
 0x145   : > { %v548_v44 = vadd.f32 %v542_v12, %v510_v61  ;;  %v549_v20 = vadd.f32 %v542_v12, %v511_v62  ;;  %v550_v49 = vadd.f32 %v542_v12, %v512_v63  ;;  %v551_v21 = vadd.f32 %v542_v12, %v513_v3 }
 0x146   : > { %v552_v54 = vadd.f32 %v542_v12, %v514_v4  ;;  %v553_v23 = vadd.f32 %v542_v12, %v515_v9  ;;  %v554_v59 = vadd.f32 %v542_v12, %v516_v5  ;;  %v555_v26 = vadd.f32 %v542_v12, %v517_v6 }
 0x147   : > { %v556_v28 = vadd.f32 %v542_v12, %v518_v7  ;;  %v557_v2 = vadd.f32 %v542_v12, %v519_v10  ;;  %v558_v11 = vadd.f32 %v542_v12, %v520_v13  ;;  %v559_v30 = vadd.f32 %v542_v12, %v521_v16 }
 0x148   : > { %v560_v17 = vadd.f32 %v542_v12, %v522_v19  ;;  %v561_v32 = vadd.f32 %v542_v12, %v523_v22  ;;  %v562_v25 = vadd.f32 %v542_v12, %v524_v27  ;;  %v563_v33 = vadd.f32 %v542_v12, %v525_v31 }
 0x149   : > { %v1189_v35 = vadd.f32 %v542_v12, %v526_v36  ;;  %v1191_v37 = vadd.f32 %v542_v12, %v527_v41  ;;  %v1193_v38 = vadd.f32 %v542_v12, %v528_v46  ;;  %v1195_v40 = vadd.f32 %v542_v12, %v529_v51 }
 0x14a   : > { %v1197_v42 = vadd.f32 %v542_v12, %v530_v56  ;;  %v1199_v43 = vadd.f32 %v542_v12, %v531_v60  ;;  %v1201_v45 = vadd.f32 %v542_v12, %v532_v0  ;;  %v1203_v47 = vadd.f32 %v542_v12, %v533_v8 }
 0x14b   : > { %v1212_v48 = vadd.f32 %v542_v12, %v534_v14  ;;  %v1214_v50 = vadd.f32 %v542_v12, %v535_v18  ;;  %v1216_v52 = vadd.f32 %v542_v12, %v536_v24  ;;  %v1218_v53 = vadd.f32 %v542_v12, %v537_v29 }
 0x14c   : > { %v576_v55 = vmax.f32 %v544_v34, 0.0  ;;  %v577_v57 = vmax.f32 %v545_v1, 0.0  ;;  %v578_v58 = vmax.f32 %v546_v39, 0.0  ;;  %v579_v61 = vmax.f32 %v547_v15, 0.0 }
 0x14d   : > { %v580_v62 = vmax.f32 %v548_v44, 0.0  ;;  %v581_v63 = vmax.f32 %v549_v20, 0.0  ;;  %v582_v3 = vmax.f32 %v550_v49, 0.0  ;;  %v583_v4 = vmax.f32 %v551_v21, 0.0 }
 0x14e   : > { %v584_v9 = vmax.f32 %v552_v54, 0.0  ;;  %v585_v5 = vmax.f32 %v553_v23, 0.0  ;;  %v586_v6 = vmax.f32 %v554_v59, 0.0  ;;  %v587_v7 = vmax.f32 %v555_v26, 0.0  ;;  %608 = vst [vmem:[%s1210_s10] sm:$0xff] %v576_v55  ;;  %609 = vst [vmem:[%s1210_s10 + $0x8] sm:$0xff] %v577_v57 }
 0x14f   : > { %610 = vst [vmem:[%s1210_s10 + $0x10] sm:$0xff] %v578_v58  ;;  %611 = vst [vmem:[%s1210_s10 + $0x18] sm:$0xff] %v579_v61  ;;  %v588_v10 = vmax.f32 %v556_v28, 0.0  ;;  %v589_v13 = vmax.f32 %v557_v2, 0.0  ;;  %v590_v16 = vmax.f32 %v558_v11, 0.0  ;;  %v591_v19 = vmax.f32 %v559_v30, 0.0 }
 0x150   : > { %612 = vst [vmem:[%s1210_s10 + $0x20] sm:$0xff] %v580_v62  ;;  %613 = vst [vmem:[%s1210_s10 + $0x28] sm:$0xff] %v581_v63  ;;  %v592_v22 = vmax.f32 %v560_v17, 0.0  ;;  %v593_v27 = vmax.f32 %v561_v32, 0.0  ;;  %v594_v31 = vmax.f32 %v562_v25, 0.0  ;;  %v595_v36 = vmax.f32 %v563_v33, 0.0 }
 0x151   : > { %614 = vst [vmem:[%s1210_s10 + $0x30] sm:$0xff] %v582_v3  ;;  %615 = vst [vmem:[%s1210_s10 + $0x38] sm:$0xff] %v583_v4  ;;  %v596_v41 = vmax.f32 %v1189_v35, 0.0  ;;  %v597_v46 = vmax.f32 %v1191_v37, 0.0  ;;  %v598_v51 = vmax.f32 %v1193_v38, 0.0  ;;  %v599_v56 = vmax.f32 %v1195_v40, 0.0 }
 0x152   : > { %616 = vst [vmem:[%s1210_s10 + $0x40] sm:$0xff] %v584_v9  ;;  %617 = vst [vmem:[%s1210_s10 + $0x48] sm:$0xff] %v585_v5  ;;  %v600_v60 = vmax.f32 %v1197_v42, 0.0  ;;  %v601_v0 = vmax.f32 %v1199_v43, 0.0  ;;  %v602_v8 = vmax.f32 %v1201_v45, 0.0  ;;  %v603_v12 = vmax.f32 %v1203_v47, 0.0 }
 0x153   : > { %618 = vst [vmem:[%s1210_s10 + $0x50] sm:$0xff] %v586_v6  ;;  %619 = vst [vmem:[%s1210_s10 + $0x58] sm:$0xff] %v587_v7  ;;  %v604_v14 = vmax.f32 %v1212_v48, 0.0  ;;  %v605_v18 = vmax.f32 %v1214_v50, 0.0  ;;  %v606_v24 = vmax.f32 %v1216_v52, 0.0  ;;  %v607_v29 = vmax.f32 %v1218_v53, 0.0 }
 0x154   : > { %620 = vst [vmem:[%s1210_s10 + $0x60] sm:$0xff] %v588_v10  ;;  %621 = vst [vmem:[%s1210_s10 + $0x68] sm:$0xff] %v589_v13 }
 0x155   : > { %622 = vst [vmem:[%s1210_s10 + $0x70] sm:$0xff] %v590_v16  ;;  %623 = vst [vmem:[%s1210_s10 + $0x78] sm:$0xff] %v591_v19 }
 0x156   : > { %624 = vst [vmem:[%s1210_s10 + $0x80] sm:$0xff] %v592_v22  ;;  %625 = vst [vmem:[%s1210_s10 + $0x88] sm:$0xff] %v593_v27 }
 0x157   : > { %626 = vst [vmem:[%s1210_s10 + $0x90] sm:$0xff] %v594_v31  ;;  %627 = vst [vmem:[%s1210_s10 + $0x98] sm:$0xff] %v595_v36 }
 0x158   : > { %628 = vst [vmem:[%s1210_s10 + $0xa0] sm:$0xff] %v596_v41  ;;  %629 = vst [vmem:[%s1210_s10 + $0xa8] sm:$0xff] %v597_v46 }
 0x159   : > { %630 = vst [vmem:[%s1210_s10 + $0xb0] sm:$0xff] %v598_v51  ;;  %631 = vst [vmem:[%s1210_s10 + $0xb8] sm:$0xff] %v599_v56 }
 0x15a   : > { %632 = vst [vmem:[%s1210_s10 + $0xc0] sm:$0xff] %v600_v60  ;;  %633 = vst [vmem:[%s1210_s10 + $0xc8] sm:$0xff] %v601_v0 }
 0x15b   : > { %634 = vst [vmem:[%s1210_s10 + $0xd0] sm:$0xff] %v602_v8  ;;  %635 = vst [vmem:[%s1210_s10 + $0xd8] sm:$0xff] %v603_v12 }
 0x15c   : > { %636 = vst [vmem:[%s1210_s10 + $0xe0] sm:$0xff] %v604_v14  ;;  %637 = vst [vmem:[%s1210_s10 + $0xe8] sm:$0xff] %v605_v18 }
 0x15d   : > { %638 = vst [vmem:[%s1210_s10 + $0xf0] sm:$0xff] %v606_v24  ;;  %639 = vst [vmem:[%s1210_s10 + $0xf8] sm:$0xff] %v607_v29 }
 0x15e PF: > { %s14_s15 = sadd.s32 1, %s830_s15  }
 0x15f   : > { %p11_p4 = scmp.ge.s32.totalorder %s14_s15, 4  }
 0x161   :  { %13 = sbr.rel (!%p11_p4) target bundleno = 1 (0x1), region = 66 }

// kernel: tile.67
= control target key start
LH: loop header
LB: loop body
LE: loop exit
PB: predicated region body
PF: predicated region fallthrough
CT: control target
= control target key end

     0   :  { %s22_s0 = inlined_call_operand.vmem [shape: s32[16], index: 0, kind: input, shape index: {}]   ;;  %s23_s1 = inlined_call_operand.vmem [shape: s32[8,16], index: 1, kind: output, shape index: {}]  }
   0x1   :  { %v4_v0 = vld [vmem:[%s22_s0] ss:$0 sm:$0xff] }
   0x2   :  { %5 = vst [vmem:[%s23_s1] sm:$0xff] %v4_v0 }

// kernel: eq.29
= control target key start
LH: loop header
LB: loop body
LE: loop exit
PB: predicated region body
PF: predicated region fallthrough
CT: control target
= control target key end

     0   :  { %s69_s10 = smov 112   ;;  %s70_s11 = smov 80   ;;  %vm3_vm0 = vcmask 130048   ;;  %vm9_vm1 = vcmask 1048448   ;;  %vm15_vm2 = vcmask 917248   ;;  %vm21_vm3 = vcmask 786048   ;;  %s113_s0 = inlined_call_operand.vmem [shape: s32[8,16], index: 0, kind: input, shape index: {}]   ;;  %s114_s1 = inlined_call_operand.vmem [shape: s32[128], index: 1, kind: output, shape index: {}]  }
   0x1   :  { %v55_v0 = vld [vmem:[%s113_s0 + $0x7] sm:$0x1]   ;;  %v57_v1 = vld [vmem:[%s113_s0 + $0x5] sm:$0x1]   ;;  %v56_v2 = vld [vmem:[%s113_s0 + $0x6] sm:$0x1]  }
   0x2   :  { %7 = vrot.lane.b32.xlu0 %v55_v0, %s69_s10  ;;  %19 = vrot.lane.b32.xlu1 %v57_v1, %s70_s11  ;;  %v58_v3 = vld [vmem:[%s113_s0 + $0x4] sm:$0x1]   ;;  %v2_v4 = vld [vmem:[%s113_s0] sm:$0x1]   ;;  %s71_s18 = smov 96   ;;  %s72_s19 = smov 64  }
   0x3   :  { %4 = vst.msk [vmem:[#allocation0] sm:$0x1] %vm3_vm0, %v2_v4   ;;  %v59_v5 = vld [vmem:[%s113_s0 + $0x3] sm:$0x1]   ;;  %v60_v6 = vld [vmem:[%s113_s0 + $0x2] sm:$0x1]  }
   0x4   :  { %s73_s24 = smov 48   ;;  %s74_s25 = smov 32   ;;  %v61_v7 = vld [vmem:[%s113_s0 + $0x1] sm:$0x1]   ;;  %vm27_vm4 = vcmask 654848   ;;  %vm33_vm5 = vcmask 523648  }
   0x5   :  { %s75_s0 = smov 16   ;;  %vm39_vm6 = vcmask 392448   ;;  %vm45_vm7 = vcmask 261248  }
   0x6   :  { %13 = vrot.lane.b32.xlu0 %v56_v2, %s71_s18  ;;  %25 = vrot.lane.b32.xlu1 %v58_v3, %s72_s19 }
   0xa   :  { %31 = vrot.lane.b32.xlu0 %v59_v5, %s73_s24  ;;  %37 = vrot.lane.b32.xlu1 %v60_v6, %s74_s25 }
   0xe   :  { %43 = vrot.lane.b32.xlu0 %v61_v7, %s75_s0 }
  0x74   :  { %v8_v8 = vpop.permute.xlu0 %7   ;;  %v20_v9 = vpop.permute.xlu1 %19  }
  0x75   :  { %10 = vst.msk [vmem:[#allocation0] sm:$0x1] %vm9_vm1, %v8_v8  }
  0x78   :  { %v14_v10 = vpop.permute.xlu0 %13   ;;  %v26_v11 = vpop.permute.xlu1 %25  }
  0x79   :  { %16 = vst.msk [vmem:[#allocation0] sm:$0x1] %vm15_vm2, %v14_v10  }
  0x7a   :  { %22 = vst.msk [vmem:[#allocation0] sm:$0x1] %vm21_vm3, %v20_v9  }
  0x7b   :  { %28 = vst.msk [vmem:[#allocation0] sm:$0x1] %vm27_vm4, %v26_v11  }
  0x7c   :  { %v32_v12 = vpop.permute.xlu0 %31   ;;  %v38_v13 = vpop.permute.xlu1 %37  }
  0x7d   :  { %34 = vst.msk [vmem:[#allocation0] sm:$0x1] %vm33_vm5, %v32_v12  }
  0x7e   :  { %40 = vst.msk [vmem:[#allocation0] sm:$0x1] %vm39_vm6, %v38_v13  }
  0x80   :  { %v44_v14 = vpop.permute.xlu0 %43  }
  0x81   :  { %46 = vst.msk [vmem:[#allocation0] sm:$0x1] %vm45_vm7, %v44_v14  }
  0x88   :  { %v51_v15 = vld [vmem:[#allocation0] sm:$0x1] }
  0x89   :  { %54 = vst [vmem:[%s114_s1] sm:$0x1] %v51_v15 }

// kernel: tile.73
= control target key start
LH: loop header
LB: loop body
LE: loop exit
PB: predicated region body
PF: predicated region fallthrough
CT: control target
= control target key end

     0   :  { %s22_s0 = inlined_call_operand.vmem [shape: f32[16], index: 0, kind: input, shape index: {}]   ;;  %s23_s1 = inlined_call_operand.vmem [shape: f32[8,16], index: 1, kind: output, shape index: {}]  }
   0x1   :  { %v4_v0 = vld [vmem:[%s22_s0] ss:$0 sm:$0xff] }
   0x2   :  { %5 = vst [vmem:[%s23_s1] sm:$0xff] %v4_v0 }

// kernel: tile.74
= control target key start
LH: loop header
LB: loop body
LE: loop exit
PB: predicated region body
PF: predicated region fallthrough
CT: control target
= control target key end

     0   :  { %s69_s10 = smov 112   ;;  %s70_s11 = smov 80   ;;  %vm3_vm0 = vcmask 130048   ;;  %vm9_vm1 = vcmask 1048448   ;;  %vm15_vm2 = vcmask 917248   ;;  %vm21_vm3 = vcmask 786048   ;;  %s113_s0 = inlined_call_operand.vmem [shape: f32[8,16], index: 0, kind: input, shape index: {}]   ;;  %s114_s1 = inlined_call_operand.vmem [shape: f32[1,128], index: 1, kind: output, shape index: {}]  }
   0x1   :  { %v55_v0 = vld [vmem:[%s113_s0 + $0x7] sm:$0x1]   ;;  %v57_v1 = vld [vmem:[%s113_s0 + $0x5] sm:$0x1]   ;;  %v56_v2 = vld [vmem:[%s113_s0 + $0x6] sm:$0x1]  }
   0x2   :  { %7 = vrot.lane.b32.xlu0 %v55_v0, %s69_s10  ;;  %19 = vrot.lane.b32.xlu1 %v57_v1, %s70_s11  ;;  %v58_v3 = vld [vmem:[%s113_s0 + $0x4] sm:$0x1]   ;;  %v2_v4 = vld [vmem:[%s113_s0] sm:$0x1]   ;;  %s71_s18 = smov 96   ;;  %s72_s19 = smov 64  }
   0x3   :  { %4 = vst.msk [vmem:[#allocation0] sm:$0x1] %vm3_vm0, %v2_v4   ;;  %v59_v5 = vld [vmem:[%s113_s0 + $0x3] sm:$0x1]   ;;  %v60_v6 = vld [vmem:[%s113_s0 + $0x2] sm:$0x1]  }
   0x4   :  { %s73_s24 = smov 48   ;;  %s74_s25 = smov 32   ;;  %v61_v7 = vld [vmem:[%s113_s0 + $0x1] sm:$0x1]   ;;  %vm27_vm4 = vcmask 654848   ;;  %vm33_vm5 = vcmask 523648  }
   0x5   :  { %s75_s0 = smov 16   ;;  %vm39_vm6 = vcmask 392448   ;;  %vm45_vm7 = vcmask 261248  }
   0x6   :  { %13 = vrot.lane.b32.xlu0 %v56_v2, %s71_s18  ;;  %25 = vrot.lane.b32.xlu1 %v58_v3, %s72_s19 }
   0xa   :  { %31 = vrot.lane.b32.xlu0 %v59_v5, %s73_s24  ;;  %37 = vrot.lane.b32.xlu1 %v60_v6, %s74_s25 }
   0xe   :  { %43 = vrot.lane.b32.xlu0 %v61_v7, %s75_s0 }
  0x74   :  { %v8_v8 = vpop.permute.xlu0 %7   ;;  %v20_v9 = vpop.permute.xlu1 %19  }
  0x75   :  { %10 = vst.msk [vmem:[#allocation0] sm:$0x1] %vm9_vm1, %v8_v8  }
  0x78   :  { %v14_v10 = vpop.permute.xlu0 %13   ;;  %v26_v11 = vpop.permute.xlu1 %25  }
  0x79   :  { %16 = vst.msk [vmem:[#allocation0] sm:$0x1] %vm15_vm2, %v14_v10  }
  0x7a   :  { %22 = vst.msk [vmem:[#allocation0] sm:$0x1] %vm21_vm3, %v20_v9  }
  0x7b   :  { %28 = vst.msk [vmem:[#allocation0] sm:$0x1] %vm27_vm4, %v26_v11  }
  0x7c   :  { %v32_v12 = vpop.permute.xlu0 %31   ;;  %v38_v13 = vpop.permute.xlu1 %37  }
  0x7d   :  { %34 = vst.msk [vmem:[#allocation0] sm:$0x1] %vm33_vm5, %v32_v12  }
  0x7e   :  { %40 = vst.msk [vmem:[#allocation0] sm:$0x1] %vm39_vm6, %v38_v13  }
  0x80   :  { %v44_v14 = vpop.permute.xlu0 %43  }
  0x81   :  { %46 = vst.msk [vmem:[#allocation0] sm:$0x1] %vm45_vm7, %v44_v14  }
  0x88   :  { %v51_v15 = vld [vmem:[#allocation0] sm:$0x1] }
  0x89   :  { %54 = vst [vmem:[%s114_s1] sm:$0x1] %v51_v15 }

// kernel: sub_encoder_forward.10
= control target key start
LH: loop header
LB: loop body
LE: loop exit
PB: predicated region body
PF: predicated region fallthrough
CT: control target
= control target key end

     0   :  { %s667_s15 = smov 0   ;;  %s837_s0 = inlined_call_operand.vmem [shape: f32[2,64,128], index: 0, kind: input, shape index: {}]   ;;  %s838_s1 = inlined_call_operand.vmem [shape: f32[128,128], index: 1, kind: input, shape index: {}]   ;;  %s839_s2 = inlined_call_operand.vmem [shape: f32[1,128], index: 2, kind: input, shape index: {}]   ;;  %s840_s3 = inlined_call_operand.vmem [shape: f32[1,128], index: 3, kind: input, shape index: {}]   ;;  %s841_s4 = inlined_call_operand.vmem [shape: f32[2,64,128], index: 4, kind: output, shape index: {}]  }
   0x1 LB: > { %s503_s16 = sadd.s32 4294967295, %s638_s15   ;;  %p507_p0 = scmp.ge.s32.totalorder %s638_s15, 1  ;;  %s638_s15 = sphi %s667_s15, %s14_s15  }
   0x2   : > { %p162_p1 = scmp.lt.s32.totalorder %s638_s15, 3 }
   0x4   : > { %p163_p2 = pnand %p507_p0, %p162_p1 }
   0x5   : > { %p188_p3 = scmp.lt.s32.totalorder (!%p163_p2), %s503_s16, 1 }
   0x6   : > { %166 = sbr.rel (%p163_p2) target bundleno = 275 (0x113), region = 36 }
   0xb   : > { %v255_v0 = vld [vmem:[%s838_s1 + $0x78] sm:$0xff]  ;;  %v640_v1 = vmov 0.0   ;;  %v254_v2 = vld [vmem:[%s838_s1 + $0x70] sm:$0xff]  ;;  %s843_s16 = smov (!%p188_p3, %s503_s16), 1  ;;  %v253_v3 = vld [vmem:[%s838_s1 + $0x68] sm:$0xff]  ;;  %vm641_vm0 = vmmov 0  }
   0xc   : > { %550 = vmatprep.subr.mxu0 %v640_v1  ;;  %585 = vmatprep.subr.mxu1 %v640_v1  ;;  %s514_s23 = sshll.u32 %s843_s16, 6  ;;  %v252_v4 = vld [vmem:[%s838_s1 + $0x60] sm:$0xff]  ;;  %v251_v8 = vld [vmem:[%s838_s1 + $0x58] sm:$0xff]  ;;  %v250_v14 = vld [vmem:[%s838_s1 + $0x50] sm:$0xff] }
   0xd   : > { %551 = vmatpush3.msra.mxu0 %v255_v0  ;;  %586 = vmatpush3.msra.mxu1 %v255_v0  ;;  %s701_s28 = scalar_lea.vmem %s837_s0, %s514_s23  ;;  %v249_v19 = vld [vmem:[%s838_s1 + $0x48] sm:$0xff]  ;;  %v248_v24 = vld [vmem:[%s838_s1 + $0x40] sm:$0xff]  ;;  %v247_v29 = vld [vmem:[%s838_s1 + $0x38] sm:$0xff]  ;;  %s197_s10 = scalar_lea.vmem %s841_s4, %s514_s23 }
   0xe   : > { %552 = vmatprep.subr.mxu0 %v640_v1  ;;  %587 = vmatprep.subr.mxu1 %v640_v1  ;;  %v704_v5 = vld [vmem:[%s701_s28] sm:$0xff]  ;;  %v707_v6 = vld [vmem:[%s701_s28 + $0x8] sm:$0xff]  ;;  %v710_v7 = vld [vmem:[%s701_s28 + $0x10] sm:$0xff] }
   0xf   : > { %553 = vmatpush3.msra.mxu0 %v254_v2  ;;  %588 = vmatpush3.msra.mxu1 %v254_v2  ;;  %v718_v9 = vld [vmem:[%s701_s28 + $0x18] sm:$0xff]  ;;  %v206_v10 = vadd.f32 %v707_v6, %v704_v5  ;;  %v219_v11 = vmul.f32 %v704_v5, %v704_v5  ;;  %v220_v12 = vmul.f32 %v707_v6, %v707_v6  ;;  %v734_v15 = vld [vmem:[%s701_s28 + $0x20] sm:$0xff]  ;;  %v745_v20 = vld [vmem:[%s701_s28 + $0x28] sm:$0xff] }
  0x10   : > { %554 = vmatprep.subr.mxu0 %v640_v1  ;;  %589 = vmatprep.subr.mxu1 %v640_v1  ;;  %v221_v13 = vmul.f32 %v710_v7, %v710_v7  ;;  %v222_v17 = vmul.f32 %v718_v9, %v718_v9  ;;  %v223_v22 = vmul.f32 %v734_v15, %v734_v15  ;;  %v756_v25 = vld [vmem:[%s701_s28 + $0x30] sm:$0xff]  ;;  %v767_v30 = vld [vmem:[%s701_s28 + $0x38] sm:$0xff]  ;;  %v245_v38 = vld [vmem:[%s838_s1 + $0x28] sm:$0xff] }
  0x11   : > { %555 = vmatpush3.msra.mxu0 %v253_v3  ;;  %590 = vmatpush3.msra.mxu1 %v253_v3  ;;  %v207_v16 = vadd.f32 %v206_v10, %v710_v7  ;;  %v227_v18 = vadd.f32 %v220_v12, %v219_v11  ;;  %v224_v27 = vmul.f32 %v745_v20, %v745_v20  ;;  %v246_v34 = vld [vmem:[%s838_s1 + $0x30] sm:$0xff]  ;;  %v244_v41 = vld [vmem:[%s838_s1 + $0x20] sm:$0xff]  ;;  %v243_v44 = vld [vmem:[%s838_s1 + $0x18] sm:$0xff] }
  0x12   : > { %556 = vmatprep.subr.mxu0 %v640_v1  ;;  %591 = vmatprep.subr.mxu1 %v640_v1  ;;  %v225_v32 = vmul.f32 %v756_v25, %v756_v25  ;;  %v226_v36 = vmul.f32 %v767_v30, %v767_v30  ;;  %v242_v47 = vld [vmem:[%s838_s1 + $0x10] sm:$0xff]  ;;  %v241_v50 = vld [vmem:[%s838_s1 + $0x8] sm:$0xff]  ;;  %v240_v53 = vld [vmem:[%s838_s1] sm:$0xff] }
  0x13   : > { %557 = vmatpush3.msra.mxu0 %v252_v4  ;;  %592 = vmatpush3.msra.mxu1 %v252_v4  ;;  %v208_v21 = vadd.f32 %v207_v16, %v718_v9  ;;  %v228_v23 = vadd.f32 %v227_v18, %v221_v13  ;;  %v406_v4 = vlaneseq  ;;  %v401_v10 = vld [vmem:[%s839_s2] sm:$0x1] }
  0x14   : > { %558 = vmatprep.subr.mxu0 %v640_v1  ;;  %593 = vmatprep.subr.mxu1 %v640_v1  ;;  %v403_v13 = vld [vmem:[%s840_s3] sm:$0x1] }
  0x15   : > { %559 = vmatpush3.msra.mxu0 %v251_v8  ;;  %594 = vmatpush3.msra.mxu1 %v251_v8  ;;  %v209_v26 = vadd.f32 %v208_v21, %v734_v15  ;;  %v229_v28 = vadd.f32 %v228_v23, %v222_v17  ;;  %v407_v8 = vshrl.u32 %v406_v4, 7 }
  0x16   : > { %560 = vmatprep.subr.mxu0 %v640_v1  ;;  %595 = vmatprep.subr.mxu1 %v640_v1 }
  0x17   : > { %561 = vmatpush3.msra.mxu0 %v250_v14  ;;  %596 = vmatpush3.msra.mxu1 %v250_v14  ;;  %v210_v31 = vadd.f32 %v209_v26, %v745_v20  ;;  %v230_v33 = vadd.f32 %v229_v28, %v223_v22  ;;  %v408_v11 = vsub.s32 0, %v407_v8 }
  0x18   : > { %562 = vmatprep.subr.mxu0 %v640_v1  ;;  %597 = vmatprep.subr.mxu1 %v640_v1 }
  0x19   : > { %563 = vmatpush3.msra.mxu0 %v249_v19  ;;  %598 = vmatpush3.msra.mxu1 %v249_v19  ;;  %v211_v35 = vadd.f32 %v210_v31, %v756_v25  ;;  %v231_v37 = vadd.f32 %v230_v33, %v224_v27 }
  0x1a   : > { %564 = vmatprep.subr.mxu0 %v640_v1  ;;  %599 = vmatprep.subr.mxu1 %v640_v1 }
  0x1b   : > { %565 = vmatpush3.msra.mxu0 %v248_v24  ;;  %600 = vmatpush3.msra.mxu1 %v248_v24  ;;  %v212_v39 = vadd.f32 %v211_v35, %v767_v30  ;;  %v232_v40 = vadd.f32 %v231_v37, %v225_v32 }
  0x1c   : > { %566 = vmatprep.subr.mxu0 %v640_v1  ;;  %601 = vmatprep.subr.mxu1 %v640_v1 }
  0x1d   : > { %567 = vmatpush3.msra.mxu0 %v247_v29  ;;  %602 = vmatpush3.msra.mxu1 %v247_v29  ;;  %v213_v42 = vrot.slane %v212_v39, 4  ;;  %v233_v43 = vadd.f32 %v232_v40, %v226_v36 }
  0x1e   : > { %568 = vmatprep.subr.mxu0 %v640_v1  ;;  %603 = vmatprep.subr.mxu1 %v640_v1 }
  0x1f   : > { %569 = vmatpush3.msra.mxu0 %v246_v34  ;;  %604 = vmatpush3.msra.mxu1 %v246_v34  ;;  %v214_v45 = vadd.f32 %v213_v42, %v212_v39  ;;  %v234_v46 = vrot.slane %v233_v43, 4 }
  0x20   : > { %570 = vmatprep.subr.mxu0 %v640_v1  ;;  %605 = vmatprep.subr.mxu1 %v640_v1 }
  0x21   : > { %571 = vmatpush3.msra.mxu0 %v245_v38  ;;  %606 = vmatpush3.msra.mxu1 %v245_v38  ;;  %v215_v48 = vrot.slane %v214_v45, 2  ;;  %v235_v49 = vadd.f32 %v234_v46, %v233_v43 }
  0x22   : > { %572 = vmatprep.subr.mxu0 %v640_v1  ;;  %607 = vmatprep.subr.mxu1 %v640_v1 }
  0x23   : > { %573 = vmatpush3.msra.mxu0 %v244_v41  ;;  %608 = vmatpush3.msra.mxu1 %v244_v41  ;;  %v216_v51 = vadd.f32 %v215_v48, %v214_v45  ;;  %v236_v52 = vrot.slane %v235_v49, 2 }
  0x24   : > { %574 = vmatprep.subr.mxu0 %v640_v1  ;;  %609 = vmatprep.subr.mxu1 %v640_v1 }
  0x25   : > { %575 = vmatpush3.msra.mxu0 %v243_v44  ;;  %610 = vmatpush3.msra.mxu1 %v243_v44  ;;  %v217_v54 = vrot.slane %v216_v51, 1  ;;  %v237_v55 = vadd.f32 %v236_v52, %v235_v49 }
  0x26   : > { %576 = vmatprep.subr.mxu0 %v640_v1  ;;  %611 = vmatprep.subr.mxu1 %v640_v1 }
  0x27   : > { %577 = vmatpush3.msra.mxu0 %v242_v47  ;;  %612 = vmatpush3.msra.mxu1 %v242_v47  ;;  %v218_v56 = vadd.f32 %v217_v54, %v216_v51  ;;  %v238_v57 = vrot.slane %v237_v55, 1 }
  0x28   : > { %578 = vmatprep.subr.mxu0 %v640_v1  ;;  %613 = vmatprep.subr.mxu1 %v640_v1 }
  0x29   : > { %579 = vmatpush3.msra.mxu0 %v241_v50  ;;  %582 = vmatprep.mubr.msk.f32.mxu0 %vm641_vm0, %v640_v1  ;;  %v239_v58 = vadd.f32 %v238_v57, %v237_v55 }
  0x2a   : > { %580 = vmatprep.subr.mxu0 %v640_v1  ;;  %614 = vmatpush3.msra.mxu1 %v241_v50 }
  0x2b   : > { %581 = vmatpush3.msra.mxu0 %v240_v53  ;;  %615 = vmatprep.subr.mxu1 %v640_v1 }
  0x2c   : > { %583 = vmatmul.mubr.f32.vlgmr.msra.gmra.mxu0 %v218_v56  ;;  %616 = vmatpush3.msra.mxu1 %v240_v53 }
  0x2d   : > { %617 = vmatprep.mubr.msk.f32.mxu1 %vm641_vm0, %v640_v1 }
  0x2e   : > { %618 = vmatmul.mubr.f32.vlgmr.msra.gmra.mxu1 %v239_v58 }
  0xec   : > { %v322_v59 = vpop.f32.mrf.mxu0 }
  0xed   : > { %v396_v60 = vmul.f32 %v322_v59, %v322_v59 }
  0xee   : > { %v584_v61 = vpop.f32.mrf.mxu0  ;;  %v392_v62 = vpop.f32.mrf.mxu1 }
  0xef   : > { %v397_v63 = vsub.f32 %v392_v62, %v396_v60 }
  0xf0   : > { %v619_v0 = vpop.f32.mrf.mxu1 }
  0xf1   : > { %v398_v2 = vmax.f32 %v397_v63, 0.0 }
  0xf3   : > { %v399_v3 = vadd.f32 1e-05, %v398_v2 }
  0xf5   : > { %630 = vrsqrt.f32 %v399_v3 }
 0x102   : > { %v631_v12 = vpop.eup %630 }
 0x103   : > { %v402_v1 = vmul.f32 %v631_v12, %v401_v10 }
 0x105   : > { %v404_v14 = vmul.f32 %v402_v1, %v322_v59  ;;  %v409_v16 = vrot.slane %v402_v1, %v408_v11 }
 0x107   : > { %v405_v17 = vsub.f32 %v403_v13, %v404_v14  ;;  %v410_v18 = vmul.f32 %v409_v16, %v704_v5  ;;  %v411_v19 = vmul.f32 %v409_v16, %v707_v6  ;;  %v412_v21 = vmul.f32 %v409_v16, %v710_v7 }
 0x108   : > { %v413_v22 = vmul.f32 %v409_v16, %v718_v9  ;;  %v414_v24 = vmul.f32 %v409_v16, %v734_v15  ;;  %v415_v26 = vmul.f32 %v409_v16, %v745_v20  ;;  %v416_v27 = vmul.f32 %v409_v16, %v756_v25 }
 0x109   : > { %v422_v23 = vrot.slane %v405_v17, %v408_v11  ;;  %v417_v28 = vmul.f32 %v409_v16, %v767_v30 }
 0x10b   : > { %v424_v29 = vadd.f32 %v422_v23, %v410_v18  ;;  %v425_v31 = vadd.f32 %v422_v23, %v411_v19  ;;  %v426_v32 = vadd.f32 %v422_v23, %v412_v21  ;;  %v427_v33 = vadd.f32 %v422_v23, %v413_v22 }
 0x10c   : > { %v428_v5 = vadd.f32 %v422_v23, %v414_v24  ;;  %v429_v6 = vadd.f32 %v422_v23, %v415_v26  ;;  %v430_v7 = vadd.f32 %v422_v23, %v416_v27  ;;  %v431_v9 = vadd.f32 %v422_v23, %v417_v28 }
 0x10d   : > { %v432_v15 = vmax.f32 %v424_v29, 0.0  ;;  %v433_v34 = vmax.f32 %v425_v31, 0.0  ;;  %v434_v20 = vmax.f32 %v426_v32, 0.0  ;;  %v435_v35 = vmax.f32 %v427_v33, 0.0 }
 0x10e   : > { %v436_v25 = vmax.f32 %v428_v5, 0.0  ;;  %v437_v36 = vmax.f32 %v429_v6, 0.0  ;;  %v438_v30 = vmax.f32 %v430_v7, 0.0  ;;  %v439_v37 = vmax.f32 %v431_v9, 0.0 }
 0x10f   : > { %440 = vst [vmem:[%s197_s10] sm:$0xff] %v432_v15  ;;  %441 = vst [vmem:[%s197_s10 + $0x8] sm:$0xff] %v433_v34 }
 0x110   : > { %442 = vst [vmem:[%s197_s10 + $0x10] sm:$0xff] %v434_v20  ;;  %443 = vst [vmem:[%s197_s10 + $0x18] sm:$0xff] %v435_v35 }
 0x111   : > { %444 = vst [vmem:[%s197_s10 + $0x20] sm:$0xff] %v436_v25  ;;  %445 = vst [vmem:[%s197_s10 + $0x28] sm:$0xff] %v437_v36 }
 0x112   : > { %446 = vst [vmem:[%s197_s10 + $0x30] sm:$0xff] %v438_v30  ;;  %447 = vst [vmem:[%s197_s10 + $0x38] sm:$0xff] %v439_v37 }
 0x113 PF: > { %s14_s15 = sadd.s32 1, %s638_s15  }
 0x114   : > { %p11_p4 = scmp.ge.s32.totalorder %s14_s15, 4  }
 0x116   :  { %13 = sbr.rel (!%p11_p4) target bundleno = 1 (0x1), region = 66 }

// kernel: sub_encoder_forward.9
= control target key start
LH: loop header
LB: loop body
LE: loop exit
PB: predicated region body
PF: predicated region fallthrough
CT: control target
= control target key end

     0   :  { %s2082_s12 = smov 0   ;;  %s2084_s13 = smov 0   ;;  %s2355_s0 = inlined_call_operand.vmem [shape: bf16[1024,512], index: 0, kind: input, shape index: {}]   ;;  %s2356_s1 = inlined_call_operand.vmem [shape: bf16[512,128], index: 1, kind: input, shape index: {}]   ;;  %s2357_s2 = inlined_call_operand.vmem [shape: f32[1,128], index: 2, kind: input, shape index: {}]   ;;  %s2358_s3 = inlined_call_operand.vmem [shape: f32[1024,128], index: 3, kind: output, shape index: {}]  }
   0x1   :  { %s2086_s14 = smov 0  }
   0x2 LB: > { %s32_s15 = sadd.s32 1, %s2056_s13  ;;  %p1556_p0 = scmp.ge.s32.totalorder %s2060_s14, 1  ;;  %s2060_s14 = sphi %s2086_s14, %s13_s14   ;;  %s2056_s13 = sphi %s2084_s13, %s2360_s13   ;;  %s2052_s12 = sphi %s2082_s12, %s2359_s12  }
   0x3   : > { %p34_p1 = scmp.ge.s32.totalorder %s32_s15, 4  ;;  %p191_p2 = scmp.lt.s32.totalorder %s2060_s14, 5 }
   0x5   : > { %s2362_s15 = smov (%p34_p1, %s32_s15), 0  ;;  %p192_p3 = pnand %p1556_p0, %p191_p2 }
   0x6   : > { %s1557_s25 = sshll.u32 (!%p192_p3), %s2052_s12, 5 }
   0x7   : > { %195 = sbr.rel (%p192_p3) target bundleno = 373 (0x175), region = 32  ;;  %p236_p4 = scmp.lt.s32.totalorder (!%p192_p3), %s1557_s25, 127 }
   0xc   : > { %v1910_v0 = vld [vmem:[%s2356_s1 + $0x78] sm:$0xff]   ;;  %v1914_v4 = vld [vmem:[%s2356_s1 + $0x70] sm:$0xff]   ;;  %v1918_v8 = vld [vmem:[%s2356_s1 + $0x68] sm:$0xff]   ;;  %s2364_s25 = smov (!%p236_p4, %s1557_s25), 127 }
   0xd   : > { %v1911_v1 = vld [vmem:[%s2356_s1 + $0xf8] sm:$0xff]   ;;  %1662 = vmatprep.subr.bf16.mxu0 %v1910_v0  ;;  %v1915_v5 = vld [vmem:[%s2356_s1 + $0xf0] sm:$0xff]   ;;  %v1919_v9 = vld [vmem:[%s2356_s1 + $0xe8] sm:$0xff]   ;;  %s1661_s24 = sshll.u32 %s2364_s25, 4  ;;  %s1561_s11 = sshll.u32 %s2364_s25, 3 }
   0xe   : > { %v1912_v2 = vld [vmem:[%s2356_s1 + $0x38] sm:$0xff]   ;;  %1774 = vmatprep.subr.bf16.mxu1 %v1911_v1  ;;  %v1916_v6 = vld [vmem:[%s2356_s1 + $0x30] sm:$0xff]   ;;  %v1920_v10 = vld [vmem:[%s2356_s1 + $0x28] sm:$0xff]   ;;  %s2199_s12 = scalar_lea.vmem %s2355_s0, %s1661_s24  ;;  %s2280_s20 = scalar_lea.vmem %s2358_s3, %s1561_s11 }
   0xf   : > { %v1913_v3 = vld [vmem:[%s2356_s1 + $0xb8] sm:$0xff]   ;;  %1663 = vmatpush3.bf16.msra.mxu0 %v1912_v2  ;;  %v1917_v7 = vld [vmem:[%s2356_s1 + $0xb0] sm:$0xff]   ;;  %v1921_v11 = vld [vmem:[%s2356_s1 + $0xa8] sm:$0xff]  }
  0x10   : > { %1775 = vmatpush3.bf16.msra.mxu1 %v1913_v3  ;;  %1664 = vmatprep.subr.bf16.mxu0 %v1914_v4  ;;  %v1922_v12 = vld [vmem:[%s2356_s1 + $0x60] sm:$0xff]   ;;  %v1926_v16 = vld [vmem:[%s2356_s1 + $0x58] sm:$0xff]   ;;  %v1930_v20 = vld [vmem:[%s2356_s1 + $0x50] sm:$0xff]  }
  0x11   : > { %1776 = vmatprep.subr.bf16.mxu1 %v1915_v5  ;;  %v1923_v13 = vld [vmem:[%s2356_s1 + $0xe0] sm:$0xff]   ;;  %v1927_v17 = vld [vmem:[%s2356_s1 + $0xd8] sm:$0xff]   ;;  %v1931_v21 = vld [vmem:[%s2356_s1 + $0xd0] sm:$0xff]  }
  0x12   : > { %v1924_v14 = vld [vmem:[%s2356_s1 + $0x20] sm:$0xff]   ;;  %v1928_v18 = vld [vmem:[%s2356_s1 + $0x18] sm:$0xff]   ;;  %v1932_v22 = vld [vmem:[%s2356_s1 + $0x10] sm:$0xff]  }
  0x13   : > { %1665 = vmatpush3.bf16.msra.mxu0 %v1916_v6  ;;  %v1925_v15 = vld [vmem:[%s2356_s1 + $0xa0] sm:$0xff]   ;;  %v1929_v19 = vld [vmem:[%s2356_s1 + $0x98] sm:$0xff]   ;;  %v1933_v23 = vld [vmem:[%s2356_s1 + $0x90] sm:$0xff]  }
  0x14   : > { %1777 = vmatpush3.bf16.msra.mxu1 %v1917_v7  ;;  %1666 = vmatprep.subr.bf16.mxu0 %v1918_v8  ;;  %v1934_v24 = vld [vmem:[%s2356_s1 + $0x48] sm:$0xff]   ;;  %v1938_v28 = vld [vmem:[%s2356_s1 + $0x40] sm:$0xff]  }
  0x15   : > { %1778 = vmatprep.subr.bf16.mxu1 %v1919_v9  ;;  %v1935_v25 = vld [vmem:[%s2356_s1 + $0xc8] sm:$0xff]   ;;  %v1939_v29 = vld [vmem:[%s2356_s1 + $0xc0] sm:$0xff]  }
  0x16   : > { %v1936_v26 = vld [vmem:[%s2356_s1 + $0x8] sm:$0xff]   ;;  %v1940_v30 = vld [vmem:[%s2356_s1] sm:$0xff]  }
  0x17   : > { %1667 = vmatpush3.bf16.msra.mxu0 %v1920_v10  ;;  %v1937_v27 = vld [vmem:[%s2356_s1 + $0x88] sm:$0xff]   ;;  %v1941_v31 = vld [vmem:[%s2356_s1 + $0x80] sm:$0xff]  }
  0x18   : > { %1779 = vmatpush3.bf16.msra.mxu1 %v1921_v11  ;;  %1668 = vmatprep.subr.bf16.mxu0 %v1922_v12  ;;  %v1942_v32 = vld [vmem:[%s2199_s12] ss:$16 sps:$4 sm:$0xff]   ;;  %v1944_v33 = vld [vmem:[%s2199_s12 + $0x4] ss:$16 sps:$4 sm:$0xff]   ;;  %v1945_v34 = vld [vmem:[%s2199_s12 + $0x8] ss:$16 sps:$4 sm:$0xff]  }
  0x19   : > { %1780 = vmatprep.subr.bf16.mxu1 %v1923_v13  ;;  %v1947_v35 = vld [vmem:[%s2199_s12 + $0xc] ss:$16 sps:$4 sm:$0xff]   ;;  %1015 = vmatprep.mubr.bf16.mxu0 %v1944_v33  ;;  %v1948_v36 = vld [vmem:[%s2199_s12 + $0x24] ss:$16 sps:$4 sm:$0xff]   ;;  %v1952_v38 = vld [vmem:[%s2199_s12 + $0x20] ss:$16 sps:$4 sm:$0xff]  }
  0x1a   : > { %1176 = vmatprep.mubr.bf16.mxu1 %v1947_v35  ;;  %v1950_v37 = vld [vmem:[%s2199_s12 + $0x2c] ss:$16 sps:$4 sm:$0xff]   ;;  %v1953_v39 = vld [vmem:[%s2199_s12 + $0x28] ss:$16 sps:$4 sm:$0xff]   ;;  %v1954_v40 = vld [vmem:[%s2199_s12 + $0x44] ss:$16 sps:$4 sm:$0xff]  }
  0x1b   : > { %1669 = vmatpush3.bf16.msra.mxu0 %v1924_v14  ;;  %v1956_v41 = vld [vmem:[%s2199_s12 + $0x4c] ss:$16 sps:$4 sm:$0xff]   ;;  %v1958_v42 = vld [vmem:[%s2199_s12 + $0x40] ss:$16 sps:$4 sm:$0xff]   ;;  %v1959_v43 = vld [vmem:[%s2199_s12 + $0x48] ss:$16 sps:$4 sm:$0xff]  }
  0x1c   : > { %1781 = vmatpush3.bf16.msra.mxu1 %v1925_v15  ;;  %1670 = vmatprep.subr.bf16.mxu0 %v1926_v16  ;;  %v1960_v44 = vld [vmem:[%s2199_s12 + $0x64] ss:$16 sps:$4 sm:$0xff]   ;;  %v1962_v45 = vld [vmem:[%s2199_s12 + $0x6c] ss:$16 sps:$4 sm:$0xff]   ;;  %v1964_v46 = vld [vmem:[%s2199_s12 + $0x60] ss:$16 sps:$4 sm:$0xff]  }
  0x1d   : > { %1782 = vmatprep.subr.bf16.mxu1 %v1927_v17  ;;  %v1965_v47 = vld [vmem:[%s2199_s12 + $0x68] ss:$16 sps:$4 sm:$0xff]   ;;  %v1966_v48 = vld [vmem:[%s2199_s12 + $0x84] ss:$16 sps:$4 sm:$0xff]   ;;  %v1968_v49 = vld [vmem:[%s2199_s12 + $0x8c] ss:$16 sps:$4 sm:$0xff]  }
  0x1e   : > { %v1970_v50 = vld [vmem:[%s2199_s12 + $0x80] ss:$16 sps:$4 sm:$0xff]   ;;  %v1971_v51 = vld [vmem:[%s2199_s12 + $0x88] ss:$16 sps:$4 sm:$0xff]   ;;  %v1972_v52 = vld [vmem:[%s2199_s12 + $0xa4] ss:$16 sps:$4 sm:$0xff]  }
  0x1f   : > { %1671 = vmatpush3.bf16.msra.mxu0 %v1928_v18  ;;  %v1974_v53 = vld [vmem:[%s2199_s12 + $0xac] ss:$16 sps:$4 sm:$0xff]   ;;  %v1976_v54 = vld [vmem:[%s2199_s12 + $0xa0] ss:$16 sps:$4 sm:$0xff]   ;;  %v1977_v55 = vld [vmem:[%s2199_s12 + $0xa8] ss:$16 sps:$4 sm:$0xff]  }
  0x20   : > { %1783 = vmatpush3.bf16.msra.mxu1 %v1929_v19  ;;  %1672 = vmatprep.subr.bf16.mxu0 %v1930_v20  ;;  %v1978_v56 = vld [vmem:[%s2199_s12 + $0xc4] ss:$16 sps:$4 sm:$0xff]   ;;  %v1980_v57 = vld [vmem:[%s2199_s12 + $0xcc] ss:$16 sps:$4 sm:$0xff]   ;;  %v1982_v58 = vld [vmem:[%s2199_s12 + $0xc0] ss:$16 sps:$4 sm:$0xff]  }
  0x21   : > { %1784 = vmatprep.subr.bf16.mxu1 %v1931_v21  ;;  %v1983_v59 = vld [vmem:[%s2199_s12 + $0xc8] ss:$16 sps:$4 sm:$0xff]   ;;  %v1984_v60 = vld [vmem:[%s2199_s12 + $0xe4] ss:$16 sps:$4 sm:$0xff]   ;;  %v1986_v61 = vld [vmem:[%s2199_s12 + $0xec] ss:$16 sps:$4 sm:$0xff]  }
  0x22   : > { %v1988_v62 = vld [vmem:[%s2199_s12 + $0xe0] ss:$16 sps:$4 sm:$0xff]   ;;  %v1989_v63 = vld [vmem:[%s2199_s12 + $0xe8] ss:$16 sps:$4 sm:$0xff]   ;;  %v1990_v0 = vld [vmem:[%s2199_s12 + $0x104] ss:$16 sps:$4 sm:$0xff]  }
  0x23   : > { %1673 = vmatpush3.bf16.msra.mxu0 %v1932_v22  ;;  %v1992_v1 = vld [vmem:[%s2199_s12 + $0x10c] ss:$16 sps:$4 sm:$0xff]   ;;  %v1994_v2 = vld [vmem:[%s2199_s12 + $0x100] ss:$16 sps:$4 sm:$0xff]   ;;  %v1995_v3 = vld [vmem:[%s2199_s12 + $0x108] ss:$16 sps:$4 sm:$0xff]  }
  0x24   : > { %1785 = vmatpush3.bf16.msra.mxu1 %v1933_v23  ;;  %1674 = vmatprep.subr.bf16.mxu0 %v1934_v24  ;;  %v1996_v4 = vld [vmem:[%s2199_s12 + $0x124] ss:$16 sps:$4 sm:$0xff]   ;;  %v1998_v5 = vld [vmem:[%s2199_s12 + $0x12c] ss:$16 sps:$4 sm:$0xff]   ;;  %v2000_v6 = vld [vmem:[%s2199_s12 + $0x120] ss:$16 sps:$4 sm:$0xff]  }
  0x25   : > { %1786 = vmatprep.subr.bf16.mxu1 %v1935_v25  ;;  %v2001_v7 = vld [vmem:[%s2199_s12 + $0x128] ss:$16 sps:$4 sm:$0xff]   ;;  %v2002_v8 = vld [vmem:[%s2199_s12 + $0x144] ss:$16 sps:$4 sm:$0xff]   ;;  %v2004_v9 = vld [vmem:[%s2199_s12 + $0x14c] ss:$16 sps:$4 sm:$0xff]  }
  0x26   : > { %v2006_v10 = vld [vmem:[%s2199_s12 + $0x140] ss:$16 sps:$4 sm:$0xff]   ;;  %v2007_v11 = vld [vmem:[%s2199_s12 + $0x148] ss:$16 sps:$4 sm:$0xff]   ;;  %v2008_v12 = vld [vmem:[%s2199_s12 + $0x164] ss:$16 sps:$4 sm:$0xff]  }
  0x27   : > { %1675 = vmatpush3.bf16.msra.mxu0 %v1936_v26  ;;  %v2010_v13 = vld [vmem:[%s2199_s12 + $0x16c] ss:$16 sps:$4 sm:$0xff]   ;;  %v2012_v14 = vld [vmem:[%s2199_s12 + $0x160] ss:$16 sps:$4 sm:$0xff]   ;;  %v2013_v15 = vld [vmem:[%s2199_s12 + $0x168] ss:$16 sps:$4 sm:$0xff]  }
  0x28   : > { %1787 = vmatpush3.bf16.msra.mxu1 %v1937_v27  ;;  %1676 = vmatprep.subr.bf16.mxu0 %v1938_v28  ;;  %v2014_v16 = vld [vmem:[%s2199_s12 + $0x184] ss:$16 sps:$4 sm:$0xff]   ;;  %v2016_v17 = vld [vmem:[%s2199_s12 + $0x18c] ss:$16 sps:$4 sm:$0xff]   ;;  %v2018_v18 = vld [vmem:[%s2199_s12 + $0x180] ss:$16 sps:$4 sm:$0xff]  }
  0x29   : > { %1788 = vmatprep.subr.bf16.mxu1 %v1939_v29  ;;  %v2019_v19 = vld [vmem:[%s2199_s12 + $0x188] ss:$16 sps:$4 sm:$0xff]   ;;  %v2020_v20 = vld [vmem:[%s2199_s12 + $0x1a4] ss:$16 sps:$4 sm:$0xff]   ;;  %v2022_v21 = vld [vmem:[%s2199_s12 + $0x1ac] ss:$16 sps:$4 sm:$0xff]  }
  0x2a   : > { %v2024_v22 = vld [vmem:[%s2199_s12 + $0x1a0] ss:$16 sps:$4 sm:$0xff]   ;;  %v2025_v23 = vld [vmem:[%s2199_s12 + $0x1a8] ss:$16 sps:$4 sm:$0xff]   ;;  %v2026_v24 = vld [vmem:[%s2199_s12 + $0x1c4] ss:$16 sps:$4 sm:$0xff]  }
  0x2b   : > { %1677 = vmatpush3.bf16.msra.mxu0 %v1940_v30  ;;  %v2028_v25 = vld [vmem:[%s2199_s12 + $0x1cc] ss:$16 sps:$4 sm:$0xff]   ;;  %v2030_v26 = vld [vmem:[%s2199_s12 + $0x1c0] ss:$16 sps:$4 sm:$0xff]   ;;  %v2031_v27 = vld [vmem:[%s2199_s12 + $0x1c8] ss:$16 sps:$4 sm:$0xff]  }
  0x2c   : > { %1789 = vmatpush3.bf16.msra.mxu1 %v1941_v31  ;;  %v2032_v28 = vld [vmem:[%s2199_s12 + $0x1e4] ss:$16 sps:$4 sm:$0xff]   ;;  %v2034_v29 = vld [vmem:[%s2199_s12 + $0x1ec] ss:$16 sps:$4 sm:$0xff]   ;;  %v2036_v30 = vld [vmem:[%s2199_s12 + $0x1e0] ss:$16 sps:$4 sm:$0xff]  }
  0x2d   : > { %v2037_v31 = vld [vmem:[%s2199_s12 + $0x1e8] ss:$16 sps:$4 sm:$0xff]  }
  0x2e   : > { %1016 = vmatmul.mubr.bf16.vlgmr.msra.gmra.mxu0 %v1942_v32 }
  0x2f   : > { %1177 = vmatmul.mubr.bf16.vlgmr.msra.gmra.mxu1 %v1945_v34  ;;  %1023 = vmatprep.mubr.bf16.mxu0 %v1948_v36 }
  0x30   : > { %1184 = vmatprep.mubr.bf16.mxu1 %v1950_v37 }
  0x36   : > { %1024 = vmatmul.mubr.bf16.gmra.mxu0 %v1952_v38 }
  0x37   : > { %1185 = vmatmul.mubr.bf16.gmra.mxu1 %v1953_v39  ;;  %1031 = vmatprep.mubr.bf16.mxu0 %v1954_v40  ;;  %v2275_v39 = vld [vmem:[%s2357_s2] ss:$0 sm:$0xff] }
  0x38   : > { %1192 = vmatprep.mubr.bf16.mxu1 %v1956_v41 }
  0x3e   : > { %1032 = vmatmul.mubr.bf16.gmra.mxu0 %v1958_v42 }
  0x3f   : > { %1193 = vmatmul.mubr.bf16.gmra.mxu1 %v1959_v43  ;;  %1039 = vmatprep.mubr.bf16.mxu0 %v1960_v44 }
  0x40   : > { %1200 = vmatprep.mubr.bf16.mxu1 %v1962_v45 }
  0x46   : > { %1040 = vmatmul.mubr.bf16.gmra.mxu0 %v1964_v46 }
  0x47   : > { %1201 = vmatmul.mubr.bf16.gmra.mxu1 %v1965_v47  ;;  %1047 = vmatprep.mubr.bf16.mxu0 %v1966_v48 }
  0x48   : > { %1208 = vmatprep.mubr.bf16.mxu1 %v1968_v49 }
  0x4e   : > { %1048 = vmatmul.mubr.bf16.gmra.mxu0 %v1970_v50 }
  0x4f   : > { %1209 = vmatmul.mubr.bf16.gmra.mxu1 %v1971_v51  ;;  %1055 = vmatprep.mubr.bf16.mxu0 %v1972_v52 }
  0x50   : > { %1216 = vmatprep.mubr.bf16.mxu1 %v1974_v53 }
  0x56   : > { %1056 = vmatmul.mubr.bf16.gmra.mxu0 %v1976_v54 }
  0x57   : > { %1217 = vmatmul.mubr.bf16.gmra.mxu1 %v1977_v55  ;;  %1063 = vmatprep.mubr.bf16.mxu0 %v1978_v56 }
  0x58   : > { %1224 = vmatprep.mubr.bf16.mxu1 %v1980_v57 }
  0x5e   : > { %1064 = vmatmul.mubr.bf16.gmra.mxu0 %v1982_v58 }
  0x5f   : > { %1225 = vmatmul.mubr.bf16.gmra.mxu1 %v1983_v59  ;;  %1071 = vmatprep.mubr.bf16.mxu0 %v1984_v60 }
  0x60   : > { %1232 = vmatprep.mubr.bf16.mxu1 %v1986_v61 }
  0x66   : > { %1072 = vmatmul.mubr.bf16.gmra.mxu0 %v1988_v62 }
  0x67   : > { %1233 = vmatmul.mubr.bf16.gmra.mxu1 %v1989_v63  ;;  %1079 = vmatprep.mubr.bf16.mxu0 %v1990_v0 }
  0x68   : > { %1240 = vmatprep.mubr.bf16.mxu1 %v1992_v1 }
  0x6e   : > { %1080 = vmatmul.mubr.bf16.gmra.mxu0 %v1994_v2 }
  0x6f   : > { %1241 = vmatmul.mubr.bf16.gmra.mxu1 %v1995_v3  ;;  %1087 = vmatprep.mubr.bf16.mxu0 %v1996_v4 }
  0x70   : > { %1248 = vmatprep.mubr.bf16.mxu1 %v1998_v5 }
  0x76   : > { %1088 = vmatmul.mubr.bf16.gmra.mxu0 %v2000_v6 }
  0x77   : > { %1249 = vmatmul.mubr.bf16.gmra.mxu1 %v2001_v7  ;;  %1095 = vmatprep.mubr.bf16.mxu0 %v2002_v8 }
  0x78   : > { %1256 = vmatprep.mubr.bf16.mxu1 %v2004_v9 }
  0x7e   : > { %1096 = vmatmul.mubr.bf16.gmra.mxu0 %v2006_v10 }
  0x7f   : > { %1257 = vmatmul.mubr.bf16.gmra.mxu1 %v2007_v11  ;;  %1103 = vmatprep.mubr.bf16.mxu0 %v2008_v12 }
  0x80   : > { %1264 = vmatprep.mubr.bf16.mxu1 %v2010_v13 }
  0x86   : > { %1104 = vmatmul.mubr.bf16.gmra.mxu0 %v2012_v14 }
  0x87   : > { %1265 = vmatmul.mubr.bf16.gmra.mxu1 %v2013_v15  ;;  %1111 = vmatprep.mubr.bf16.mxu0 %v2014_v16 }
  0x88   : > { %1272 = vmatprep.mubr.bf16.mxu1 %v2016_v17 }
  0x8e   : > { %1112 = vmatmul.mubr.bf16.gmra.mxu0 %v2018_v18 }
  0x8f   : > { %1273 = vmatmul.mubr.bf16.gmra.mxu1 %v2019_v19  ;;  %1119 = vmatprep.mubr.bf16.mxu0 %v2020_v20 }
  0x90   : > { %1280 = vmatprep.mubr.bf16.mxu1 %v2022_v21 }
  0x96   : > { %1120 = vmatmul.mubr.bf16.gmra.mxu0 %v2024_v22 }
  0x97   : > { %1281 = vmatmul.mubr.bf16.gmra.mxu1 %v2025_v23  ;;  %1127 = vmatprep.mubr.bf16.mxu0 %v2026_v24 }
  0x98   : > { %1288 = vmatprep.mubr.bf16.mxu1 %v2028_v25 }
  0x9e   : > { %1128 = vmatmul.mubr.bf16.gmra.mxu0 %v2030_v26 }
  0x9f   : > { %1289 = vmatmul.mubr.bf16.gmra.mxu1 %v2031_v27  ;;  %1135 = vmatprep.mubr.bf16.mxu0 %v2032_v28 }
  0xa0   : > { %1296 = vmatprep.mubr.bf16.mxu1 %v2034_v29 }
  0xa6   : > { %1136 = vmatmul.mubr.bf16.gmra.mxu0 %v2036_v30 }
  0xa7   : > { %1297 = vmatmul.mubr.bf16.gmra.mxu1 %v2037_v31 }
  0xee   : > { %v1678_v32 = vpop.f32.mrf.mxu0 }
  0xef   : > { %v1790_v33 = vpop.f32.mrf.mxu1 }
  0xf0   : > { %v1679_v34 = vpop.f32.mrf.mxu0 }
  0xf1   : > { %v1680_v35 = vadd.f32 %v1679_v34, %v1678_v32  ;;  %v1791_v36 = vpop.f32.mrf.mxu1 }
  0xf2   : > { %v1792_v37 = vadd.f32 %v1791_v36, %v1790_v33  ;;  %v1681_v38 = vpop.f32.mrf.mxu0 }
  0xf3   : > { %v1793_v40 = vpop.f32.mrf.mxu1 }
  0xf4   : > { %v1179_v41 = vadd.f32 %v1792_v37, %v1680_v35  ;;  %v1682_v42 = vpop.f32.mrf.mxu0 }
  0xf5   : > { %v1683_v43 = vadd.f32 %v1682_v42, %v1681_v38  ;;  %v1794_v44 = vpop.f32.mrf.mxu1 }
  0xf6   : > { %v1305_v45 = vadd.f32 %v2275_v39, %v1179_v41  ;;  %v1795_v46 = vadd.f32 %v1794_v44, %v1793_v40  ;;  %v1684_v47 = vpop.f32.mrf.mxu0 }
  0xf7   : > { %v1796_v48 = vpop.f32.mrf.mxu1 }
  0xf8   : > { %1404 = vst [vmem:[%s2280_s20] sm:$0xff] %v1305_v45  ;;  %v1182_v49 = vadd.f32 %v1795_v46, %v1683_v43  ;;  %v1685_v50 = vpop.f32.mrf.mxu0 }
  0xf9   : > { %v1686_v51 = vadd.f32 %v1685_v50, %v1684_v47  ;;  %v1797_v52 = vpop.f32.mrf.mxu1 }
  0xfa   : > { %v1306_v53 = vadd.f32 %v2275_v39, %v1182_v49  ;;  %v1798_v54 = vadd.f32 %v1797_v52, %v1796_v48  ;;  %v1687_v55 = vpop.f32.mrf.mxu0 }
  0xfb   : > { %v1799_v56 = vpop.f32.mrf.mxu1 }
  0xfc   : > { %1405 = vst [vmem:[%s2280_s20 + $0x8] sm:$0xff] %v1306_v53  ;;  %v1187_v57 = vadd.f32 %v1798_v54, %v1686_v51  ;;  %v1688_v58 = vpop.f32.mrf.mxu0 }
  0xfd   : > { %v1689_v59 = vadd.f32 %v1688_v58, %v1687_v55  ;;  %v1800_v60 = vpop.f32.mrf.mxu1 }
  0xfe   : > { %v1307_v61 = vadd.f32 %v2275_v39, %v1187_v57  ;;  %v1801_v62 = vadd.f32 %v1800_v60, %v1799_v56  ;;  %v1690_v63 = vpop.f32.mrf.mxu0 }
  0xff   : > { %v1802_v0 = vpop.f32.mrf.mxu1 }
 0x100   : > { %1406 = vst [vmem:[%s2280_s20 + $0x10] sm:$0xff] %v1307_v61  ;;  %v1190_v1 = vadd.f32 %v1801_v62, %v1689_v59  ;;  %v1691_v2 = vpop.f32.mrf.mxu0 }
 0x101   : > { %v1692_v3 = vadd.f32 %v1691_v2, %v1690_v63  ;;  %v1803_v4 = vpop.f32.mrf.mxu1 }
 0x102   : > { %v1308_v5 = vadd.f32 %v2275_v39, %v1190_v1  ;;  %v1804_v6 = vadd.f32 %v1803_v4, %v1802_v0  ;;  %v1693_v7 = vpop.f32.mrf.mxu0 }
 0x103   : > { %v1805_v8 = vpop.f32.mrf.mxu1 }
 0x104   : > { %1407 = vst [vmem:[%s2280_s20 + $0x18] sm:$0xff] %v1308_v5  ;;  %v1195_v9 = vadd.f32 %v1804_v6, %v1692_v3  ;;  %v1694_v10 = vpop.f32.mrf.mxu0 }
 0x105   : > { %v1695_v11 = vadd.f32 %v1694_v10, %v1693_v7  ;;  %v1806_v12 = vpop.f32.mrf.mxu1 }
 0x106   : > { %v1309_v13 = vadd.f32 %v2275_v39, %v1195_v9  ;;  %v1807_v14 = vadd.f32 %v1806_v12, %v1805_v8  ;;  %v1696_v15 = vpop.f32.mrf.mxu0 }
 0x107   : > { %v1808_v16 = vpop.f32.mrf.mxu1 }
 0x108   : > { %1408 = vst [vmem:[%s2280_s20 + $0x20] sm:$0xff] %v1309_v13  ;;  %v1198_v17 = vadd.f32 %v1807_v14, %v1695_v11  ;;  %v1697_v18 = vpop.f32.mrf.mxu0 }
 0x109   : > { %v1698_v19 = vadd.f32 %v1697_v18, %v1696_v15  ;;  %v1809_v20 = vpop.f32.mrf.mxu1 }
 0x10a   : > { %v1310_v21 = vadd.f32 %v2275_v39, %v1198_v17  ;;  %v1810_v22 = vadd.f32 %v1809_v20, %v1808_v16  ;;  %v1699_v23 = vpop.f32.mrf.mxu0 }
 0x10b   : > { %v1811_v24 = vpop.f32.mrf.mxu1 }
 0x10c   : > { %1409 = vst [vmem:[%s2280_s20 + $0x28] sm:$0xff] %v1310_v21  ;;  %v1203_v25 = vadd.f32 %v1810_v22, %v1698_v19  ;;  %v1700_v26 = vpop.f32.mrf.mxu0 }
 0x10d   : > { %v1701_v27 = vadd.f32 %v1700_v26, %v1699_v23  ;;  %v1812_v28 = vpop.f32.mrf.mxu1 }
 0x10e   : > { %v1311_v29 = vadd.f32 %v2275_v39, %v1203_v25  ;;  %v1813_v30 = vadd.f32 %v1812_v28, %v1811_v24  ;;  %v1702_v31 = vpop.f32.mrf.mxu0 }
 0x10f   : > { %v1814_v32 = vpop.f32.mrf.mxu1 }
 0x110   : > { %1410 = vst [vmem:[%s2280_s20 + $0x30] sm:$0xff] %v1311_v29  ;;  %v1206_v33 = vadd.f32 %v1813_v30, %v1701_v27  ;;  %v1703_v34 = vpop.f32.mrf.mxu0 }
 0x111   : > { %v1704_v35 = vadd.f32 %v1703_v34, %v1702_v31  ;;  %v1815_v36 = vpop.f32.mrf.mxu1 }
 0x112   : > { %v1312_v37 = vadd.f32 %v2275_v39, %v1206_v33  ;;  %v1816_v38 = vadd.f32 %v1815_v36, %v1814_v32  ;;  %v1705_v40 = vpop.f32.mrf.mxu0 }
 0x113   : > { %v1817_v41 = vpop.f32.mrf.mxu1 }
 0x114   : > { %1411 = vst [vmem:[%s2280_s20 + $0x38] sm:$0xff] %v1312_v37  ;;  %v1211_v42 = vadd.f32 %v1816_v38, %v1704_v35  ;;  %v1706_v43 = vpop.f32.mrf.mxu0 }
 0x115   : > { %v1707_v44 = vadd.f32 %v1706_v43, %v1705_v40  ;;  %v1818_v45 = vpop.f32.mrf.mxu1 }
 0x116   : > { %v1313_v46 = vadd.f32 %v2275_v39, %v1211_v42  ;;  %v1819_v47 = vadd.f32 %v1818_v45, %v1817_v41  ;;  %v1708_v48 = vpop.f32.mrf.mxu0 }
 0x117   : > { %v1820_v49 = vpop.f32.mrf.mxu1 }
 0x118   : > { %1412 = vst [vmem:[%s2280_s20 + $0x40] sm:$0xff] %v1313_v46  ;;  %v1214_v50 = vadd.f32 %v1819_v47, %v1707_v44  ;;  %v1709_v51 = vpop.f32.mrf.mxu0 }
 0x119   : > { %v1710_v52 = vadd.f32 %v1709_v51, %v1708_v48  ;;  %v1821_v53 = vpop.f32.mrf.mxu1 }
 0x11a   : > { %v1314_v54 = vadd.f32 %v2275_v39, %v1214_v50  ;;  %v1822_v55 = vadd.f32 %v1821_v53, %v1820_v49  ;;  %v1711_v56 = vpop.f32.mrf.mxu0 }
 0x11b   : > { %v1823_v57 = vpop.f32.mrf.mxu1 }
 0x11c   : > { %1413 = vst [vmem:[%s2280_s20 + $0x48] sm:$0xff] %v1314_v54  ;;  %v1219_v58 = vadd.f32 %v1822_v55, %v1710_v52  ;;  %v1712_v59 = vpop.f32.mrf.mxu0 }
 0x11d   : > { %v1713_v60 = vadd.f32 %v1712_v59, %v1711_v56  ;;  %v1824_v61 = vpop.f32.mrf.mxu1 }
 0x11e   : > { %v1315_v62 = vadd.f32 %v2275_v39, %v1219_v58  ;;  %v1825_v63 = vadd.f32 %v1824_v61, %v1823_v57  ;;  %v1714_v0 = vpop.f32.mrf.mxu0 }
 0x11f   : > { %v1826_v1 = vpop.f32.mrf.mxu1 }
 0x120   : > { %1414 = vst [vmem:[%s2280_s20 + $0x50] sm:$0xff] %v1315_v62  ;;  %v1222_v2 = vadd.f32 %v1825_v63, %v1713_v60  ;;  %v1715_v3 = vpop.f32.mrf.mxu0 }
 0x121   : > { %v1716_v4 = vadd.f32 %v1715_v3, %v1714_v0  ;;  %v1827_v5 = vpop.f32.mrf.mxu1 }
 0x122   : > { %v1316_v6 = vadd.f32 %v2275_v39, %v1222_v2  ;;  %v1828_v7 = vadd.f32 %v1827_v5, %v1826_v1  ;;  %v1717_v8 = vpop.f32.mrf.mxu0 }
 0x123   : > { %v1829_v9 = vpop.f32.mrf.mxu1 }
 0x124   : > { %1415 = vst [vmem:[%s2280_s20 + $0x58] sm:$0xff] %v1316_v6  ;;  %v1227_v10 = vadd.f32 %v1828_v7, %v1716_v4  ;;  %v1718_v11 = vpop.f32.mrf.mxu0 }
 0x125   : > { %v1719_v12 = vadd.f32 %v1718_v11, %v1717_v8  ;;  %v1830_v13 = vpop.f32.mrf.mxu1 }
 0x126   : > { %v1317_v14 = vadd.f32 %v2275_v39, %v1227_v10  ;;  %v1831_v15 = vadd.f32 %v1830_v13, %v1829_v9  ;;  %v1720_v16 = vpop.f32.mrf.mxu0 }
 0x127   : > { %v1832_v17 = vpop.f32.mrf.mxu1 }
 0x128   : > { %1416 = vst [vmem:[%s2280_s20 + $0x60] sm:$0xff] %v1317_v14  ;;  %v1230_v18 = vadd.f32 %v1831_v15, %v1719_v12  ;;  %v1721_v19 = vpop.f32.mrf.mxu0 }
 0x129   : > { %v1722_v20 = vadd.f32 %v1721_v19, %v1720_v16  ;;  %v1833_v21 = vpop.f32.mrf.mxu1 }
 0x12a   : > { %v1318_v22 = vadd.f32 %v2275_v39, %v1230_v18  ;;  %v1834_v23 = vadd.f32 %v1833_v21, %v1832_v17  ;;  %v1723_v24 = vpop.f32.mrf.mxu0 }
 0x12b   : > { %v1835_v25 = vpop.f32.mrf.mxu1 }
 0x12c   : > { %1417 = vst [vmem:[%s2280_s20 + $0x68] sm:$0xff] %v1318_v22  ;;  %v1235_v26 = vadd.f32 %v1834_v23, %v1722_v20  ;;  %v1724_v27 = vpop.f32.mrf.mxu0 }
 0x12d   : > { %v1725_v28 = vadd.f32 %v1724_v27, %v1723_v24  ;;  %v1836_v29 = vpop.f32.mrf.mxu1 }
 0x12e   : > { %v1319_v30 = vadd.f32 %v2275_v39, %v1235_v26  ;;  %v1837_v31 = vadd.f32 %v1836_v29, %v1835_v25  ;;  %v1726_v32 = vpop.f32.mrf.mxu0 }
 0x12f   : > { %v1838_v33 = vpop.f32.mrf.mxu1 }
 0x130   : > { %1418 = vst [vmem:[%s2280_s20 + $0x70] sm:$0xff] %v1319_v30  ;;  %v1238_v34 = vadd.f32 %v1837_v31, %v1725_v28  ;;  %v1727_v35 = vpop.f32.mrf.mxu0 }
 0x131   : > { %v1728_v36 = vadd.f32 %v1727_v35, %v1726_v32  ;;  %v1839_v37 = vpop.f32.mrf.mxu1 }
 0x132   : > { %v1320_v38 = vadd.f32 %v2275_v39, %v1238_v34  ;;  %v1840_v40 = vadd.f32 %v1839_v37, %v1838_v33  ;;  %v1729_v41 = vpop.f32.mrf.mxu0 }
 0x133   : > { %v1841_v42 = vpop.f32.mrf.mxu1 }
 0x134   : > { %1419 = vst [vmem:[%s2280_s20 + $0x78] sm:$0xff] %v1320_v38  ;;  %v1243_v43 = vadd.f32 %v1840_v40, %v1728_v36  ;;  %v1730_v44 = vpop.f32.mrf.mxu0 }
 0x135   : > { %v1731_v45 = vadd.f32 %v1730_v44, %v1729_v41  ;;  %v1842_v46 = vpop.f32.mrf.mxu1 }
 0x136   : > { %v1321_v47 = vadd.f32 %v2275_v39, %v1243_v43  ;;  %v1843_v48 = vadd.f32 %v1842_v46, %v1841_v42  ;;  %v1732_v49 = vpop.f32.mrf.mxu0 }
 0x137   : > { %v1844_v50 = vpop.f32.mrf.mxu1 }
 0x138   : > { %1420 = vst [vmem:[%s2280_s20 + $0x80] sm:$0xff] %v1321_v47  ;;  %v1246_v51 = vadd.f32 %v1843_v48, %v1731_v45  ;;  %v1733_v52 = vpop.f32.mrf.mxu0 }
 0x139   : > { %v1734_v53 = vadd.f32 %v1733_v52, %v1732_v49  ;;  %v1845_v54 = vpop.f32.mrf.mxu1 }
 0x13a   : > { %v1322_v55 = vadd.f32 %v2275_v39, %v1246_v51  ;;  %v1846_v56 = vadd.f32 %v1845_v54, %v1844_v50  ;;  %v1735_v57 = vpop.f32.mrf.mxu0 }
 0x13b   : > { %v1847_v58 = vpop.f32.mrf.mxu1 }
 0x13c   : > { %1421 = vst [vmem:[%s2280_s20 + $0x88] sm:$0xff] %v1322_v55  ;;  %v1251_v59 = vadd.f32 %v1846_v56, %v1734_v53  ;;  %v1736_v60 = vpop.f32.mrf.mxu0 }
 0x13d   : > { %v1737_v61 = vadd.f32 %v1736_v60, %v1735_v57  ;;  %v1848_v62 = vpop.f32.mrf.mxu1 }
 0x13e   : > { %v1323_v63 = vadd.f32 %v2275_v39, %v1251_v59  ;;  %v1849_v0 = vadd.f32 %v1848_v62, %v1847_v58  ;;  %v1738_v1 = vpop.f32.mrf.mxu0 }
 0x13f   : > { %v1850_v2 = vpop.f32.mrf.mxu1 }
 0x140   : > { %1422 = vst [vmem:[%s2280_s20 + $0x90] sm:$0xff] %v1323_v63  ;;  %v1254_v3 = vadd.f32 %v1849_v0, %v1737_v61  ;;  %v1739_v4 = vpop.f32.mrf.mxu0 }
 0x141   : > { %v1740_v5 = vadd.f32 %v1739_v4, %v1738_v1  ;;  %v1851_v6 = vpop.f32.mrf.mxu1 }
 0x142   : > { %v1324_v7 = vadd.f32 %v2275_v39, %v1254_v3  ;;  %v1852_v8 = vadd.f32 %v1851_v6, %v1850_v2  ;;  %v1741_v9 = vpop.f32.mrf.mxu0 }
 0x143   : > { %v1853_v10 = vpop.f32.mrf.mxu1 }
 0x144   : > { %1423 = vst [vmem:[%s2280_s20 + $0x98] sm:$0xff] %v1324_v7  ;;  %v1259_v11 = vadd.f32 %v1852_v8, %v1740_v5  ;;  %v1742_v12 = vpop.f32.mrf.mxu0 }
 0x145   : > { %v1743_v13 = vadd.f32 %v1742_v12, %v1741_v9  ;;  %v1854_v14 = vpop.f32.mrf.mxu1 }
 0x146   : > { %v1325_v15 = vadd.f32 %v2275_v39, %v1259_v11  ;;  %v1855_v16 = vadd.f32 %v1854_v14, %v1853_v10  ;;  %v1744_v17 = vpop.f32.mrf.mxu0 }
 0x147   : > { %v1856_v18 = vpop.f32.mrf.mxu1 }
 0x148   : > { %1424 = vst [vmem:[%s2280_s20 + $0xa0] sm:$0xff] %v1325_v15  ;;  %v1262_v19 = vadd.f32 %v1855_v16, %v1743_v13  ;;  %v1745_v20 = vpop.f32.mrf.mxu0 }
 0x149   : > { %v1746_v21 = vadd.f32 %v1745_v20, %v1744_v17  ;;  %v1857_v22 = vpop.f32.mrf.mxu1 }
 0x14a   : > { %v1326_v23 = vadd.f32 %v2275_v39, %v1262_v19  ;;  %v1858_v24 = vadd.f32 %v1857_v22, %v1856_v18  ;;  %v1747_v25 = vpop.f32.mrf.mxu0 }
 0x14b   : > { %v1859_v26 = vpop.f32.mrf.mxu1 }
 0x14c   : > { %1425 = vst [vmem:[%s2280_s20 + $0xa8] sm:$0xff] %v1326_v23  ;;  %v1267_v27 = vadd.f32 %v1858_v24, %v1746_v21  ;;  %v1748_v28 = vpop.f32.mrf.mxu0 }
 0x14d   : > { %v1749_v29 = vadd.f32 %v1748_v28, %v1747_v25  ;;  %v1860_v30 = vpop.f32.mrf.mxu1 }
 0x14e   : > { %v1327_v31 = vadd.f32 %v2275_v39, %v1267_v27  ;;  %v1861_v32 = vadd.f32 %v1860_v30, %v1859_v26  ;;  %v1750_v33 = vpop.f32.mrf.mxu0 }
 0x14f   : > { %v1862_v34 = vpop.f32.mrf.mxu1 }
 0x150   : > { %1426 = vst [vmem:[%s2280_s20 + $0xb0] sm:$0xff] %v1327_v31  ;;  %v1270_v35 = vadd.f32 %v1861_v32, %v1749_v29  ;;  %v1751_v36 = vpop.f32.mrf.mxu0 }
 0x151   : > { %v1752_v37 = vadd.f32 %v1751_v36, %v1750_v33  ;;  %v1863_v38 = vpop.f32.mrf.mxu1 }
 0x152   : > { %v1328_v40 = vadd.f32 %v2275_v39, %v1270_v35  ;;  %v1864_v41 = vadd.f32 %v1863_v38, %v1862_v34  ;;  %v1753_v42 = vpop.f32.mrf.mxu0 }
 0x153   : > { %v1865_v43 = vpop.f32.mrf.mxu1 }
 0x154   : > { %1427 = vst [vmem:[%s2280_s20 + $0xb8] sm:$0xff] %v1328_v40  ;;  %v1275_v44 = vadd.f32 %v1864_v41, %v1752_v37  ;;  %v1754_v45 = vpop.f32.mrf.mxu0 }
 0x155   : > { %v1755_v46 = vadd.f32 %v1754_v45, %v1753_v42  ;;  %v1866_v47 = vpop.f32.mrf.mxu1 }
 0x156   : > { %v1329_v48 = vadd.f32 %v2275_v39, %v1275_v44  ;;  %v1867_v49 = vadd.f32 %v1866_v47, %v1865_v43  ;;  %v1756_v50 = vpop.f32.mrf.mxu0 }
 0x157   : > { %v1868_v51 = vpop.f32.mrf.mxu1 }
 0x158   : > { %1428 = vst [vmem:[%s2280_s20 + $0xc0] sm:$0xff] %v1329_v48  ;;  %v1278_v52 = vadd.f32 %v1867_v49, %v1755_v46  ;;  %v1757_v53 = vpop.f32.mrf.mxu0 }
 0x159   : > { %v1758_v54 = vadd.f32 %v1757_v53, %v1756_v50  ;;  %v1869_v55 = vpop.f32.mrf.mxu1 }
 0x15a   : > { %v1330_v56 = vadd.f32 %v2275_v39, %v1278_v52  ;;  %v1870_v57 = vadd.f32 %v1869_v55, %v1868_v51  ;;  %v1759_v58 = vpop.f32.mrf.mxu0 }
 0x15b   : > { %v1871_v59 = vpop.f32.mrf.mxu1 }
 0x15c   : > { %1429 = vst [vmem:[%s2280_s20 + $0xc8] sm:$0xff] %v1330_v56  ;;  %v1283_v60 = vadd.f32 %v1870_v57, %v1758_v54  ;;  %v1760_v61 = vpop.f32.mrf.mxu0 }
 0x15d   : > { %v1761_v62 = vadd.f32 %v1760_v61, %v1759_v58  ;;  %v1872_v63 = vpop.f32.mrf.mxu1 }
 0x15e   : > { %v1331_v0 = vadd.f32 %v2275_v39, %v1283_v60  ;;  %v1873_v1 = vadd.f32 %v1872_v63, %v1871_v59  ;;  %v1762_v2 = vpop.f32.mrf.mxu0 }
 0x15f   : > { %v1874_v3 = vpop.f32.mrf.mxu1 }
 0x160   : > { %1430 = vst [vmem:[%s2280_s20 + $0xd0] sm:$0xff] %v1331_v0  ;;  %v1286_v4 = vadd.f32 %v1873_v1, %v1761_v62  ;;  %v1763_v5 = vpop.f32.mrf.mxu0 }
 0x161   : > { %v1764_v6 = vadd.f32 %v1763_v5, %v1762_v2  ;;  %v1875_v7 = vpop.f32.mrf.mxu1 }
 0x162   : > { %v1332_v8 = vadd.f32 %v2275_v39, %v1286_v4  ;;  %v1876_v9 = vadd.f32 %v1875_v7, %v1874_v3  ;;  %v1765_v10 = vpop.f32.mrf.mxu0 }
 0x163   : > { %v1877_v11 = vpop.f32.mrf.mxu1 }
 0x164   : > { %1431 = vst [vmem:[%s2280_s20 + $0xd8] sm:$0xff] %v1332_v8  ;;  %v1291_v12 = vadd.f32 %v1876_v9, %v1764_v6  ;;  %v1766_v13 = vpop.f32.mrf.mxu0 }
 0x165   : > { %v1767_v14 = vadd.f32 %v1766_v13, %v1765_v10  ;;  %v1878_v15 = vpop.f32.mrf.mxu1 }
 0x166   : > { %v1333_v16 = vadd.f32 %v2275_v39, %v1291_v12  ;;  %v1879_v17 = vadd.f32 %v1878_v15, %v1877_v11  ;;  %v1768_v18 = vpop.f32.mrf.mxu0 }
 0x167   : > { %v1880_v19 = vpop.f32.mrf.mxu1 }
 0x168   : > { %1432 = vst [vmem:[%s2280_s20 + $0xe0] sm:$0xff] %v1333_v16  ;;  %v1294_v20 = vadd.f32 %v1879_v17, %v1767_v14  ;;  %v1769_v21 = vpop.f32.mrf.mxu0 }
 0x169   : > { %v1770_v22 = vadd.f32 %v1769_v21, %v1768_v18  ;;  %v1881_v23 = vpop.f32.mrf.mxu1 }
 0x16a   : > { %v1334_v24 = vadd.f32 %v2275_v39, %v1294_v20  ;;  %v1882_v25 = vadd.f32 %v1881_v23, %v1880_v19  ;;  %v1771_v26 = vpop.f32.mrf.mxu0 }
 0x16b   : > { %v1883_v27 = vpop.f32.mrf.mxu1 }
 0x16c   : > { %1433 = vst [vmem:[%s2280_s20 + $0xe8] sm:$0xff] %v1334_v24  ;;  %v1299_v28 = vadd.f32 %v1882_v25, %v1770_v22  ;;  %v1772_v29 = vpop.f32.mrf.mxu0 }
 0x16d   : > { %v1773_v30 = vadd.f32 %v1772_v29, %v1771_v26  ;;  %v1884_v31 = vpop.f32.mrf.mxu1 }
 0x16e   : > { %v1335_v32 = vadd.f32 %v2275_v39, %v1299_v28  ;;  %v1885_v33 = vadd.f32 %v1884_v31, %v1883_v27 }
 0x170   : > { %1434 = vst [vmem:[%s2280_s20 + $0xf0] sm:$0xff] %v1335_v32  ;;  %v1302_v34 = vadd.f32 %v1885_v33, %v1773_v30 }
 0x172   : > { %v1336_v35 = vadd.f32 %v2275_v39, %v1302_v34 }
 0x174   : > { %1435 = vst [vmem:[%s2280_s20 + $0xf8] sm:$0xff] %v1336_v35 }
 0x175 PF: > { %s13_s14 = sadd.s32 1, %s2060_s14   ;;  %s2359_s12 = smov %s2056_s13 }
 0x176   : > { %p10_p5 = scmp.ge.s32.totalorder %s13_s14, 6   ;;  %s2360_s13 = smov %s2362_s15 }
 0x178   :  { %12 = sbr.rel (!%p10_p5) target bundleno = 2 (0x2), region = 76 }

// kernel: sub_encoder_forward.11
= control target key start
LH: loop header
LB: loop body
LE: loop exit
PB: predicated region body
PF: predicated region fallthrough
CT: control target
= control target key end

     0   :  { %s1591_s12 = smov 0   ;;  %s1593_s13 = smov 0   ;;  %s1845_s0 = inlined_call_operand.vmem [shape: bf16[128,1024], index: 0, kind: input, shape index: {}]   ;;  %s1846_s1 = inlined_call_operand.vmem [shape: bf16[1024,128], index: 1, kind: input, shape index: {}]   ;;  %s1847_s2 = inlined_call_operand.vmem [shape: f32[1,128], index: 2, kind: input, shape index: {}]   ;;  %s1848_s3 = inlined_call_operand.vmem [shape: f32[128,128], index: 3, kind: output, shape index: {}]  }
   0x1   :  { %s1595_s14 = smov 0   ;;  %s1597_s15 = smov 0  }
   0x2   :  { %s1599_s16 = smov 0  }
   0x3 LB: > { %s25_s17 = sadd.s32 1, %s1565_s15  ;;  %p48_p1 = scmp.ne.s32.totalorder %s1557_s13, %s1553_s12  ;;  %s1569_s16 = sphi %s1599_s16, %s13_s16   ;;  %s1565_s15 = sphi %s1597_s15, %s1852_s15   ;;  %s1561_s14 = sphi %s1595_s14, %s1851_s14   ;;  %s1557_s13 = sphi %s1593_s13, %s1850_s13   ;;  %s1553_s12 = sphi %s1591_s12, %s1849_s12  }
   0x4   : > { %p26_p0 = scmp.ge.s32.totalorder %s25_s17, 2  ;;  %p49_p2 = scmp.eq.s32.totalorder %s1569_s16, 0 }
   0x5   : > { %s41_s19 = sadd.s32 1, %s1557_s13  ;;  %p1203_p5 = scmp.ge.s32.totalorder %s1569_s16, 2 }
   0x6   : > { %s1854_s17 = smov (%p26_p0, %s25_s17), 0  ;;  %p50_p3 = por %p49_p2, %p48_p1 }
   0x7   : > { %s37_s18 = ssub.s32 %s1565_s15, %s1854_s17  ;;  %162 = sbr.rel (%p1203_p5) target bundleno = 32 (0x20), region = 20 }
   0x8   : > { %p39_p4 = scmp.eq.s32.totalorder %s37_s18, 0 }
   0xa   : > { %s1626_s20 = scalar_select %p39_p4, %s1557_s13, %s41_s19  }
   0xc   : > { %165 = sbr.rel (!%p50_p3) target bundleno = 32 (0x20), region = 24  ;;  %s167_s21 = sand.u32 (%p50_p3), 1, %s1557_s13  }
   0xd   : > { %s1282_s22 = sshll.u32 (%p50_p3), %s1565_s15, 4  ;;  %s1204_s23 = sshll.u32 (%p50_p3), %s167_s21, 8 }
   0xe   : > { %s1634_s26 = scalar_lea.vmem (%p50_p3), %s1845_s0, %s1282_s22  ;;  %s1639_s27 = scalar_lea.vmem (%p50_p3), [#allocation3], %s1204_s23 }
   0xf   : > { %v188_v0 = vld [vmem:[%s1634_s26] sm:$0xff] (%p50_p3)  ;;  %v190_v1 = vld [vmem:[%s1634_s26 + $0x8] sm:$0xff] (%p50_p3) }
  0x10   : > { %v192_v2 = vld [vmem:[%s1634_s26 + $0x20] sm:$0xff] (%p50_p3)  ;;  %189 = vst [vmem:[%s1639_s27] sm:$0xff] (%p50_p3), %v188_v0  ;;  %191 = vst [vmem:[%s1639_s27 + $0x8] sm:$0xff] (%p50_p3), %v190_v1  ;;  %v194_v3 = vld [vmem:[%s1634_s26 + $0x28] sm:$0xff] (%p50_p3) }
  0x11   : > { %193 = vst [vmem:[%s1639_s27 + $0x10] sm:$0xff] %v192_v2  ;;  %v196_v4 = vld [vmem:[%s1634_s26 + $0x40] sm:$0xff]  ;;  %v198_v5 = vld [vmem:[%s1634_s26 + $0x48] sm:$0xff]  ;;  %195 = vst [vmem:[%s1639_s27 + $0x18] sm:$0xff] %v194_v3 }
  0x12   : > { %197 = vst [vmem:[%s1639_s27 + $0x20] sm:$0xff] %v196_v4  ;;  %199 = vst [vmem:[%s1639_s27 + $0x28] sm:$0xff] %v198_v5  ;;  %v200_v6 = vld [vmem:[%s1634_s26 + $0x60] sm:$0xff]  ;;  %v202_v7 = vld [vmem:[%s1634_s26 + $0x68] sm:$0xff] }
  0x13   : > { %v204_v8 = vld [vmem:[%s1634_s26 + $0x80] sm:$0xff]  ;;  %201 = vst [vmem:[%s1639_s27 + $0x30] sm:$0xff] %v200_v6  ;;  %203 = vst [vmem:[%s1639_s27 + $0x38] sm:$0xff] %v202_v7  ;;  %v206_v9 = vld [vmem:[%s1634_s26 + $0x88] sm:$0xff] }
  0x14   : > { %205 = vst [vmem:[%s1639_s27 + $0x40] sm:$0xff] %v204_v8  ;;  %v208_v10 = vld [vmem:[%s1634_s26 + $0xa0] sm:$0xff]  ;;  %v210_v11 = vld [vmem:[%s1634_s26 + $0xa8] sm:$0xff]  ;;  %207 = vst [vmem:[%s1639_s27 + $0x48] sm:$0xff] %v206_v9 }
  0x15   : > { %209 = vst [vmem:[%s1639_s27 + $0x50] sm:$0xff] %v208_v10  ;;  %211 = vst [vmem:[%s1639_s27 + $0x58] sm:$0xff] %v210_v11  ;;  %v212_v12 = vld [vmem:[%s1634_s26 + $0xc0] sm:$0xff]  ;;  %v214_v13 = vld [vmem:[%s1634_s26 + $0xc8] sm:$0xff] }
  0x16   : > { %v216_v14 = vld [vmem:[%s1634_s26 + $0xe0] sm:$0xff]  ;;  %213 = vst [vmem:[%s1639_s27 + $0x60] sm:$0xff] %v212_v12  ;;  %215 = vst [vmem:[%s1639_s27 + $0x68] sm:$0xff] %v214_v13  ;;  %v218_v15 = vld [vmem:[%s1634_s26 + $0xe8] sm:$0xff] }
  0x17   : > { %217 = vst [vmem:[%s1639_s27 + $0x70] sm:$0xff] %v216_v14  ;;  %v220_v16 = vld [vmem:[%s1634_s26 + $0x100] sm:$0xff]  ;;  %v222_v17 = vld [vmem:[%s1634_s26 + $0x108] sm:$0xff]  ;;  %219 = vst [vmem:[%s1639_s27 + $0x78] sm:$0xff] %v218_v15 }
  0x18   : > { %221 = vst [vmem:[%s1639_s27 + $0x80] sm:$0xff] %v220_v16  ;;  %223 = vst [vmem:[%s1639_s27 + $0x88] sm:$0xff] %v222_v17  ;;  %v224_v18 = vld [vmem:[%s1634_s26 + $0x120] sm:$0xff]  ;;  %v226_v19 = vld [vmem:[%s1634_s26 + $0x128] sm:$0xff] }
  0x19   : > { %v228_v20 = vld [vmem:[%s1634_s26 + $0x140] sm:$0xff]  ;;  %225 = vst [vmem:[%s1639_s27 + $0x90] sm:$0xff] %v224_v18  ;;  %227 = vst [vmem:[%s1639_s27 + $0x98] sm:$0xff] %v226_v19  ;;  %v230_v21 = vld [vmem:[%s1634_s26 + $0x148] sm:$0xff] }
  0x1a   : > { %229 = vst [vmem:[%s1639_s27 + $0xa0] sm:$0xff] %v228_v20  ;;  %v232_v22 = vld [vmem:[%s1634_s26 + $0x160] sm:$0xff]  ;;  %v234_v23 = vld [vmem:[%s1634_s26 + $0x168] sm:$0xff]  ;;  %231 = vst [vmem:[%s1639_s27 + $0xa8] sm:$0xff] %v230_v21 }
  0x1b   : > { %233 = vst [vmem:[%s1639_s27 + $0xb0] sm:$0xff] %v232_v22  ;;  %235 = vst [vmem:[%s1639_s27 + $0xb8] sm:$0xff] %v234_v23  ;;  %v236_v24 = vld [vmem:[%s1634_s26 + $0x180] sm:$0xff]  ;;  %v238_v25 = vld [vmem:[%s1634_s26 + $0x188] sm:$0xff] }
  0x1c   : > { %v240_v26 = vld [vmem:[%s1634_s26 + $0x1a0] sm:$0xff]  ;;  %237 = vst [vmem:[%s1639_s27 + $0xc0] sm:$0xff] %v236_v24  ;;  %239 = vst [vmem:[%s1639_s27 + $0xc8] sm:$0xff] %v238_v25  ;;  %v242_v27 = vld [vmem:[%s1634_s26 + $0x1a8] sm:$0xff] }
  0x1d   : > { %241 = vst [vmem:[%s1639_s27 + $0xd0] sm:$0xff] %v240_v26  ;;  %v244_v28 = vld [vmem:[%s1634_s26 + $0x1c0] sm:$0xff]  ;;  %v246_v29 = vld [vmem:[%s1634_s26 + $0x1c8] sm:$0xff]  ;;  %243 = vst [vmem:[%s1639_s27 + $0xd8] sm:$0xff] %v242_v27 }
  0x1e   : > { %245 = vst [vmem:[%s1639_s27 + $0xe0] sm:$0xff] %v244_v28  ;;  %247 = vst [vmem:[%s1639_s27 + $0xe8] sm:$0xff] %v246_v29  ;;  %v248_v30 = vld [vmem:[%s1634_s26 + $0x1e0] sm:$0xff]  ;;  %v250_v31 = vld [vmem:[%s1634_s26 + $0x1e8] sm:$0xff] }
  0x1f   : > { %249 = vst [vmem:[%s1639_s27 + $0xf0] sm:$0xff] %v248_v30  ;;  %251 = vst [vmem:[%s1639_s27 + $0xf8] sm:$0xff] %v250_v31 }
  0x20 PF: > { %p1207_p6 = scmp.ge.s32.totalorder %s1569_s16, 1  ;;  %p268_p7 = scmp.lt.s32.totalorder %s1569_s16, 3 }
  0x22   : > { %p269_p8 = pnand %p1207_p6, %p268_p7 }
  0x23   : > { %s275_s28 = sand.u32 (!%p269_p8), 1, %s1553_s12   ;;  %s1209_s29 = sshll.u32 (!%p269_p8), %s1561_s14, 6 }
  0x24   : > { %272 = sbr.rel (%p269_p8) target bundleno = 361 (0x169), region = 51  ;;  %s1208_s30 = sshll.u32 (!%p269_p8), %s275_s28, 8 }
  0x25   : > { %p315_p9 = scmp.lt.s32.totalorder (!%p269_p8), %s1209_s29, 127  ;;  %s1711_s8 = scalar_lea.vmem (!%p269_p8), [#allocation3], %s1208_s30 }
  0x26   : > { %p1211_p10 = scmp.ne.s32.totalorder (!%p269_p8), %s1561_s14, 0 }
  0x29   : > { %s1856_s29 = smov (!%p315_p9, %s1209_s29), 127  ;;  %339 = sbr.rel (%p1211_p10) target bundleno = 55 (0x37), region = 59 }
  0x2a   : > { %s1210_s4 = sshll.u32 %s1856_s29, 2 }
  0x2b   : > { %s1709_s7 = scalar_lea.vmem %s1846_s1, %s1210_s4 }
  0x2e   : > { %v1212_v32 = vld [vmem:[%s1847_s2] ss:$0 sm:$0xff] }
  0x2f   : > { %347 = vst [vmem:[#allocation2 + $0x30] sm:$0xff] %v1212_v32  ;;  %348 = vst [vmem:[#allocation2] sm:$0xff] %v1212_v32 }
  0x30   : > { %349 = vst [vmem:[#allocation2 + $0x58] sm:$0xff] %v1212_v32  ;;  %350 = vst [vmem:[#allocation2 + $0x18] sm:$0xff] %v1212_v32 }
  0x31   : > { %351 = vst [vmem:[#allocation2 + $0x50] sm:$0xff] %v1212_v32  ;;  %352 = vst [vmem:[#allocation2 + $0x68] sm:$0xff] %v1212_v32 }
  0x32   : > { %353 = vst [vmem:[#allocation2 + $0x8] sm:$0xff] %v1212_v32  ;;  %354 = vst [vmem:[#allocation2 + $0x48] sm:$0xff] %v1212_v32 }
  0x33   : > { %355 = vst [vmem:[#allocation2 + $0x40] sm:$0xff] %v1212_v32  ;;  %356 = vst [vmem:[#allocation2 + $0x20] sm:$0xff] %v1212_v32 }
  0x34   : > { %357 = vst [vmem:[#allocation2 + $0x10] sm:$0xff] %v1212_v32  ;;  %358 = vst [vmem:[#allocation2 + $0x38] sm:$0xff] %v1212_v32 }
  0x35   : > { %359 = vst [vmem:[#allocation2 + $0x60] sm:$0xff] %v1212_v32  ;;  %360 = vst [vmem:[#allocation2 + $0x70] sm:$0xff] %v1212_v32 }
  0x36   : > { %361 = vst [vmem:[#allocation2 + $0x78] sm:$0xff] %v1212_v32  ;;  %362 = vst [vmem:[#allocation2 + $0x28] sm:$0xff] %v1212_v32 }
  0x37 PF: > { %v1451_v33 = vld [vmem:[%s1709_s7 + $0x78] sm:$0xff]   ;;  %v1455_v37 = vld [vmem:[%s1709_s7 + $0x70] sm:$0xff]   ;;  %v1459_v41 = vld [vmem:[%s1709_s7 + $0x68] sm:$0xff]   ;;  %p1277_p11 = scmp.ne.s32.totalorder %s1561_s14, 1 }
  0x38   : > { %v1452_v34 = vld [vmem:[%s1709_s7 + $0xf8] sm:$0xff]   ;;  %1283 = vmatprep.subr.bf16.mxu0 %v1451_v33  ;;  %v1456_v38 = vld [vmem:[%s1709_s7 + $0xf0] sm:$0xff]   ;;  %v1460_v42 = vld [vmem:[%s1709_s7 + $0xe8] sm:$0xff]  }
  0x39   : > { %v1453_v35 = vld [vmem:[%s1709_s7 + $0x38] sm:$0xff]   ;;  %1347 = vmatprep.subr.bf16.mxu1 %v1452_v34  ;;  %v1457_v39 = vld [vmem:[%s1709_s7 + $0x30] sm:$0xff]   ;;  %v1461_v43 = vld [vmem:[%s1709_s7 + $0x28] sm:$0xff]  }
  0x3a   : > { %v1454_v36 = vld [vmem:[%s1709_s7 + $0xb8] sm:$0xff]   ;;  %1284 = vmatpush3.bf16.msra.mxu0 %v1453_v35  ;;  %v1458_v40 = vld [vmem:[%s1709_s7 + $0xb0] sm:$0xff]   ;;  %v1462_v44 = vld [vmem:[%s1709_s7 + $0xa8] sm:$0xff]  }
  0x3b   : > { %1348 = vmatpush3.bf16.msra.mxu1 %v1454_v36  ;;  %1285 = vmatprep.subr.bf16.mxu0 %v1455_v37  ;;  %v1463_v45 = vld [vmem:[%s1709_s7 + $0x60] sm:$0xff]   ;;  %v1467_v49 = vld [vmem:[%s1709_s7 + $0x58] sm:$0xff]   ;;  %v1471_v53 = vld [vmem:[%s1709_s7 + $0x50] sm:$0xff]  }
  0x3c   : > { %1349 = vmatprep.subr.bf16.mxu1 %v1456_v38  ;;  %v1464_v46 = vld [vmem:[%s1709_s7 + $0xe0] sm:$0xff]   ;;  %v1468_v50 = vld [vmem:[%s1709_s7 + $0xd8] sm:$0xff]   ;;  %v1472_v54 = vld [vmem:[%s1709_s7 + $0xd0] sm:$0xff]  }
  0x3d   : > { %v1465_v47 = vld [vmem:[%s1709_s7 + $0x20] sm:$0xff]   ;;  %v1469_v51 = vld [vmem:[%s1709_s7 + $0x18] sm:$0xff]   ;;  %v1473_v55 = vld [vmem:[%s1709_s7 + $0x10] sm:$0xff]  }
  0x3e   : > { %1286 = vmatpush3.bf16.msra.mxu0 %v1457_v39  ;;  %v1466_v48 = vld [vmem:[%s1709_s7 + $0xa0] sm:$0xff]   ;;  %v1470_v52 = vld [vmem:[%s1709_s7 + $0x98] sm:$0xff]   ;;  %v1474_v56 = vld [vmem:[%s1709_s7 + $0x90] sm:$0xff]  }
  0x3f   : > { %1350 = vmatpush3.bf16.msra.mxu1 %v1458_v40  ;;  %1287 = vmatprep.subr.bf16.mxu0 %v1459_v41  ;;  %v1475_v57 = vld [vmem:[%s1709_s7 + $0x48] sm:$0xff]   ;;  %v1479_v61 = vld [vmem:[%s1709_s7 + $0x40] sm:$0xff]   ;;  %v363_v40 = vld [vmem:[#allocation2 + $0x30] sm:$0xff] }
  0x40   : > { %1351 = vmatprep.subr.bf16.mxu1 %v1460_v42  ;;  %v1476_v58 = vld [vmem:[%s1709_s7 + $0xc8] sm:$0xff]   ;;  %v1480_v62 = vld [vmem:[%s1709_s7 + $0xc0] sm:$0xff]  }
  0x41   : > { %v1477_v59 = vld [vmem:[%s1709_s7 + $0x8] sm:$0xff]   ;;  %v1481_v63 = vld [vmem:[%s1709_s7] sm:$0xff]  }
  0x42   : > { %1288 = vmatpush3.bf16.msra.mxu0 %v1461_v43  ;;  %v1478_v60 = vld [vmem:[%s1709_s7 + $0x88] sm:$0xff]   ;;  %v1482_v0 = vld [vmem:[%s1709_s7 + $0x80] sm:$0xff]  }
  0x43   : > { %1352 = vmatpush3.bf16.msra.mxu1 %v1462_v44  ;;  %1289 = vmatprep.subr.bf16.mxu0 %v1463_v45  ;;  %v1483_v1 = vld [vmem:[%s1711_s8] ss:$16 sps:$4 sm:$0xff]   ;;  %v1485_v2 = vld [vmem:[%s1711_s8 + $0x4] ss:$16 sps:$4 sm:$0xff]   ;;  %v1486_v3 = vld [vmem:[%s1711_s8 + $0x8] ss:$16 sps:$4 sm:$0xff]  }
  0x44   : > { %1353 = vmatprep.subr.bf16.mxu1 %v1464_v46  ;;  %v1488_v4 = vld [vmem:[%s1711_s8 + $0xc] ss:$16 sps:$4 sm:$0xff]   ;;  %859 = vmatprep.mubr.bf16.mxu0 %v1485_v2  ;;  %v1489_v5 = vld [vmem:[%s1711_s8 + $0x24] ss:$16 sps:$4 sm:$0xff]   ;;  %v1493_v7 = vld [vmem:[%s1711_s8 + $0x20] ss:$16 sps:$4 sm:$0xff]  }
  0x45   : > { %956 = vmatprep.mubr.bf16.mxu1 %v1488_v4  ;;  %v1491_v6 = vld [vmem:[%s1711_s8 + $0x2c] ss:$16 sps:$4 sm:$0xff]   ;;  %v1494_v8 = vld [vmem:[%s1711_s8 + $0x28] ss:$16 sps:$4 sm:$0xff]   ;;  %v1495_v9 = vld [vmem:[%s1711_s8 + $0x44] ss:$16 sps:$4 sm:$0xff]  }
  0x46   : > { %1290 = vmatpush3.bf16.msra.mxu0 %v1465_v47  ;;  %v1497_v10 = vld [vmem:[%s1711_s8 + $0x4c] ss:$16 sps:$4 sm:$0xff]   ;;  %v1499_v11 = vld [vmem:[%s1711_s8 + $0x40] ss:$16 sps:$4 sm:$0xff]   ;;  %v1500_v12 = vld [vmem:[%s1711_s8 + $0x48] ss:$16 sps:$4 sm:$0xff]  }
  0x47   : > { %1354 = vmatpush3.bf16.msra.mxu1 %v1466_v48  ;;  %1291 = vmatprep.subr.bf16.mxu0 %v1467_v49  ;;  %v1501_v13 = vld [vmem:[%s1711_s8 + $0x64] ss:$16 sps:$4 sm:$0xff]   ;;  %v1503_v14 = vld [vmem:[%s1711_s8 + $0x6c] ss:$16 sps:$4 sm:$0xff]   ;;  %v1505_v15 = vld [vmem:[%s1711_s8 + $0x60] ss:$16 sps:$4 sm:$0xff]  }
  0x48   : > { %1355 = vmatprep.subr.bf16.mxu1 %v1468_v50  ;;  %v1506_v16 = vld [vmem:[%s1711_s8 + $0x68] ss:$16 sps:$4 sm:$0xff]   ;;  %v1507_v17 = vld [vmem:[%s1711_s8 + $0x84] ss:$16 sps:$4 sm:$0xff]   ;;  %v1509_v18 = vld [vmem:[%s1711_s8 + $0x8c] ss:$16 sps:$4 sm:$0xff]  }
  0x49   : > { %v1511_v19 = vld [vmem:[%s1711_s8 + $0x80] ss:$16 sps:$4 sm:$0xff]   ;;  %v1512_v20 = vld [vmem:[%s1711_s8 + $0x88] ss:$16 sps:$4 sm:$0xff]   ;;  %v1513_v21 = vld [vmem:[%s1711_s8 + $0xa4] ss:$16 sps:$4 sm:$0xff]  }
  0x4a   : > { %1292 = vmatpush3.bf16.msra.mxu0 %v1469_v51  ;;  %v1515_v22 = vld [vmem:[%s1711_s8 + $0xac] ss:$16 sps:$4 sm:$0xff]   ;;  %v1517_v23 = vld [vmem:[%s1711_s8 + $0xa0] ss:$16 sps:$4 sm:$0xff]   ;;  %v1518_v24 = vld [vmem:[%s1711_s8 + $0xa8] ss:$16 sps:$4 sm:$0xff]  }
  0x4b   : > { %1356 = vmatpush3.bf16.msra.mxu1 %v1470_v52  ;;  %1293 = vmatprep.subr.bf16.mxu0 %v1471_v53  ;;  %v1519_v25 = vld [vmem:[%s1711_s8 + $0xc4] ss:$16 sps:$4 sm:$0xff]   ;;  %v1521_v26 = vld [vmem:[%s1711_s8 + $0xcc] ss:$16 sps:$4 sm:$0xff]   ;;  %v1523_v27 = vld [vmem:[%s1711_s8 + $0xc0] ss:$16 sps:$4 sm:$0xff]  }
  0x4c   : > { %1357 = vmatprep.subr.bf16.mxu1 %v1472_v54  ;;  %v1524_v28 = vld [vmem:[%s1711_s8 + $0xc8] ss:$16 sps:$4 sm:$0xff]   ;;  %v1525_v29 = vld [vmem:[%s1711_s8 + $0xe4] ss:$16 sps:$4 sm:$0xff]   ;;  %v1527_v30 = vld [vmem:[%s1711_s8 + $0xec] ss:$16 sps:$4 sm:$0xff]  }
  0x4d   : > { %v1529_v31 = vld [vmem:[%s1711_s8 + $0xe0] ss:$16 sps:$4 sm:$0xff]   ;;  %v1530_v32 = vld [vmem:[%s1711_s8 + $0xe8] ss:$16 sps:$4 sm:$0xff]  }
  0x4e   : > { %1294 = vmatpush3.bf16.msra.mxu0 %v1473_v55  ;;  %v364_v49 = vld [vmem:[#allocation2] sm:$0xff] }
  0x4f   : > { %1358 = vmatpush3.bf16.msra.mxu1 %v1474_v56  ;;  %1295 = vmatprep.subr.bf16.mxu0 %v1475_v57 }
  0x50   : > { %1359 = vmatprep.subr.bf16.mxu1 %v1476_v58  ;;  %v365_v58 = vld [vmem:[#allocation2 + $0x58] sm:$0xff] }
  0x52   : > { %1296 = vmatpush3.bf16.msra.mxu0 %v1477_v59 }
  0x53   : > { %1360 = vmatpush3.bf16.msra.mxu1 %v1478_v60  ;;  %1297 = vmatprep.subr.bf16.mxu0 %v1479_v61 }
  0x54   : > { %1361 = vmatprep.subr.bf16.mxu1 %v1480_v62 }
  0x56   : > { %1298 = vmatpush3.bf16.msra.mxu0 %v1481_v63 }
  0x57   : > { %1362 = vmatpush3.bf16.msra.mxu1 %v1482_v0 }
  0x59   : > { %860 = vmatmul.mubr.bf16.vlgmr.msra.gmra.mxu0 %v1483_v1 }
  0x5a   : > { %957 = vmatmul.mubr.bf16.vlgmr.msra.gmra.mxu1 %v1486_v3  ;;  %867 = vmatprep.mubr.bf16.mxu0 %v1489_v5  ;;  %v366_v3 = vld [vmem:[#allocation2 + $0x18] sm:$0xff] }
  0x5b   : > { %964 = vmatprep.mubr.bf16.mxu1 %v1491_v6 }
  0x61   : > { %868 = vmatmul.mubr.bf16.gmra.mxu0 %v1493_v7 }
  0x62   : > { %965 = vmatmul.mubr.bf16.gmra.mxu1 %v1494_v8  ;;  %875 = vmatprep.mubr.bf16.mxu0 %v1495_v9 }
  0x63   : > { %972 = vmatprep.mubr.bf16.mxu1 %v1497_v10 }
  0x69   : > { %876 = vmatmul.mubr.bf16.gmra.mxu0 %v1499_v11 }
  0x6a   : > { %973 = vmatmul.mubr.bf16.gmra.mxu1 %v1500_v12  ;;  %883 = vmatprep.mubr.bf16.mxu0 %v1501_v13  ;;  %v367_v12 = vld [vmem:[#allocation2 + $0x50] sm:$0xff] }
  0x6b   : > { %980 = vmatprep.mubr.bf16.mxu1 %v1503_v14 }
  0x71   : > { %884 = vmatmul.mubr.bf16.gmra.mxu0 %v1505_v15 }
  0x72   : > { %981 = vmatmul.mubr.bf16.gmra.mxu1 %v1506_v16  ;;  %891 = vmatprep.mubr.bf16.mxu0 %v1507_v17 }
  0x73   : > { %988 = vmatprep.mubr.bf16.mxu1 %v1509_v18 }
  0x79   : > { %892 = vmatmul.mubr.bf16.gmra.mxu0 %v1511_v19 }
  0x7a   : > { %989 = vmatmul.mubr.bf16.gmra.mxu1 %v1512_v20  ;;  %899 = vmatprep.mubr.bf16.mxu0 %v1513_v21  ;;  %v368_v21 = vld [vmem:[#allocation2 + $0x68] sm:$0xff] }
  0x7b   : > { %996 = vmatprep.mubr.bf16.mxu1 %v1515_v22 }
  0x81   : > { %900 = vmatmul.mubr.bf16.gmra.mxu0 %v1517_v23 }
  0x82   : > { %997 = vmatmul.mubr.bf16.gmra.mxu1 %v1518_v24  ;;  %907 = vmatprep.mubr.bf16.mxu0 %v1519_v25 }
  0x83   : > { %1004 = vmatprep.mubr.bf16.mxu1 %v1521_v26 }
  0x89   : > { %908 = vmatmul.mubr.bf16.gmra.mxu0 %v1523_v27 }
  0x8a   : > { %1005 = vmatmul.mubr.bf16.gmra.mxu1 %v1524_v28  ;;  %915 = vmatprep.mubr.bf16.mxu0 %v1525_v29 }
  0x8b   : > { %1012 = vmatprep.mubr.bf16.mxu1 %v1527_v30  ;;  %v369_v30 = vld [vmem:[#allocation2 + $0x8] sm:$0xff] }
  0x91   : > { %916 = vmatmul.mubr.bf16.gmra.mxu0 %v1529_v31 }
  0x92   : > { %1013 = vmatmul.mubr.bf16.gmra.mxu1 %v1530_v32 }
 0x119   : > { %v1299_v33 = vpop.f32.mrf.mxu0 }
 0x11a   : > { %v1363_v34 = vpop.f32.mrf.mxu1 }
 0x11b   : > { %v1300_v35 = vpop.f32.mrf.mxu0 }
 0x11c   : > { %v1301_v36 = vadd.f32 %v1300_v35, %v1299_v33  ;;  %v1364_v37 = vpop.f32.mrf.mxu1 }
 0x11d   : > { %v1365_v38 = vadd.f32 %v1364_v37, %v1363_v34  ;;  %v1302_v39 = vpop.f32.mrf.mxu0 }
 0x11e   : > { %v1366_v41 = vpop.f32.mrf.mxu1 }
 0x11f   : > { %v959_v42 = vadd.f32 %v1365_v38, %v1301_v36  ;;  %v1303_v43 = vpop.f32.mrf.mxu0 }
 0x120   : > { %v1304_v44 = vadd.f32 %v1303_v43, %v1302_v39  ;;  %v1367_v45 = vpop.f32.mrf.mxu1  ;;  %v370_v39 = vld [vmem:[#allocation2 + $0x48] sm:$0xff] }
 0x121   : > { %v1021_v46 = vadd.f32 %v959_v42, %v363_v40  ;;  %v1368_v47 = vadd.f32 %v1367_v45, %v1366_v41  ;;  %v1305_v48 = vpop.f32.mrf.mxu0 }
 0x122   : > { %v1369_v50 = vpop.f32.mrf.mxu1 }
 0x123   : > { %1037 = vst [vmem:[#allocation2 + $0x30] sm:$0xff] %v1021_v46  ;;  %v962_v51 = vadd.f32 %v1368_v47, %v1304_v44  ;;  %v1306_v52 = vpop.f32.mrf.mxu0 }
 0x124   : > { %v1307_v53 = vadd.f32 %v1306_v52, %v1305_v48  ;;  %v1370_v54 = vpop.f32.mrf.mxu1  ;;  %v371_v48 = vld [vmem:[#allocation2 + $0x40] sm:$0xff] }
 0x125   : > { %v1022_v55 = vadd.f32 %v962_v51, %v364_v49  ;;  %v1371_v56 = vadd.f32 %v1370_v54, %v1369_v50  ;;  %v1308_v57 = vpop.f32.mrf.mxu0 }
 0x126   : > { %v1372_v59 = vpop.f32.mrf.mxu1 }
 0x127   : > { %1038 = vst [vmem:[#allocation2] sm:$0xff] %v1022_v55  ;;  %v967_v60 = vadd.f32 %v1371_v56, %v1307_v53  ;;  %v1309_v61 = vpop.f32.mrf.mxu0 }
 0x128   : > { %v1310_v62 = vadd.f32 %v1309_v61, %v1308_v57  ;;  %v1373_v63 = vpop.f32.mrf.mxu1  ;;  %v372_v57 = vld [vmem:[#allocation2 + $0x20] sm:$0xff] }
 0x129   : > { %v1023_v0 = vadd.f32 %v967_v60, %v365_v58  ;;  %v1374_v1 = vadd.f32 %v1373_v63, %v1372_v59  ;;  %v1311_v2 = vpop.f32.mrf.mxu0 }
 0x12a   : > { %v1375_v4 = vpop.f32.mrf.mxu1 }
 0x12b   : > { %1039 = vst [vmem:[#allocation2 + $0x58] sm:$0xff] %v1023_v0  ;;  %v970_v5 = vadd.f32 %v1374_v1, %v1310_v62  ;;  %v1312_v6 = vpop.f32.mrf.mxu0 }
 0x12c   : > { %v1313_v7 = vadd.f32 %v1312_v6, %v1311_v2  ;;  %v1376_v8 = vpop.f32.mrf.mxu1  ;;  %v373_v2 = vld [vmem:[#allocation2 + $0x10] sm:$0xff] }
 0x12d   : > { %v1024_v9 = vadd.f32 %v970_v5, %v366_v3  ;;  %v1377_v10 = vadd.f32 %v1376_v8, %v1375_v4  ;;  %v1314_v11 = vpop.f32.mrf.mxu0 }
 0x12e   : > { %v1378_v13 = vpop.f32.mrf.mxu1 }
 0x12f   : > { %1040 = vst [vmem:[#allocation2 + $0x18] sm:$0xff] %v1024_v9  ;;  %v975_v14 = vadd.f32 %v1377_v10, %v1313_v7  ;;  %v1315_v15 = vpop.f32.mrf.mxu0 }
 0x130   : > { %v1316_v16 = vadd.f32 %v1315_v15, %v1314_v11  ;;  %v1379_v17 = vpop.f32.mrf.mxu1  ;;  %v374_v11 = vld [vmem:[#allocation2 + $0x38] sm:$0xff] }
 0x131   : > { %v1025_v18 = vadd.f32 %v975_v14, %v367_v12  ;;  %v1380_v19 = vadd.f32 %v1379_v17, %v1378_v13  ;;  %v1317_v20 = vpop.f32.mrf.mxu0 }
 0x132   : > { %v1381_v22 = vpop.f32.mrf.mxu1 }
 0x133   : > { %1041 = vst [vmem:[#allocation2 + $0x50] sm:$0xff] %v1025_v18  ;;  %v978_v23 = vadd.f32 %v1380_v19, %v1316_v16  ;;  %v1318_v24 = vpop.f32.mrf.mxu0 }
 0x134   : > { %v1319_v25 = vadd.f32 %v1318_v24, %v1317_v20  ;;  %v1382_v26 = vpop.f32.mrf.mxu1  ;;  %v375_v20 = vld [vmem:[#allocation2 + $0x60] sm:$0xff] }
 0x135   : > { %v1026_v27 = vadd.f32 %v978_v23, %v368_v21  ;;  %v1383_v28 = vadd.f32 %v1382_v26, %v1381_v22  ;;  %v1320_v29 = vpop.f32.mrf.mxu0 }
 0x136   : > { %v1384_v31 = vpop.f32.mrf.mxu1 }
 0x137   : > { %1042 = vst [vmem:[#allocation2 + $0x68] sm:$0xff] %v1026_v27  ;;  %v983_v32 = vadd.f32 %v1383_v28, %v1319_v25  ;;  %v1321_v33 = vpop.f32.mrf.mxu0 }
 0x138   : > { %v1322_v34 = vadd.f32 %v1321_v33, %v1320_v29  ;;  %v1385_v35 = vpop.f32.mrf.mxu1  ;;  %v376_v29 = vld [vmem:[#allocation2 + $0x70] sm:$0xff] }
 0x139   : > { %v1027_v36 = vadd.f32 %v983_v32, %v369_v30  ;;  %v1386_v37 = vadd.f32 %v1385_v35, %v1384_v31  ;;  %v1323_v38 = vpop.f32.mrf.mxu0 }
 0x13a   : > { %v1387_v40 = vpop.f32.mrf.mxu1 }
 0x13b   : > { %1043 = vst [vmem:[#allocation2 + $0x8] sm:$0xff] %v1027_v36  ;;  %v986_v41 = vadd.f32 %v1386_v37, %v1322_v34  ;;  %v1324_v42 = vpop.f32.mrf.mxu0 }
 0x13c   : > { %v1325_v43 = vadd.f32 %v1324_v42, %v1323_v38  ;;  %v1388_v44 = vpop.f32.mrf.mxu1  ;;  %v377_v38 = vld [vmem:[#allocation2 + $0x78] sm:$0xff] }
 0x13d   : > { %v1028_v45 = vadd.f32 %v986_v41, %v370_v39  ;;  %v1389_v46 = vadd.f32 %v1388_v44, %v1387_v40  ;;  %v1326_v47 = vpop.f32.mrf.mxu0 }
 0x13e   : > { %v1390_v49 = vpop.f32.mrf.mxu1 }
 0x13f   : > { %1044 = vst [vmem:[#allocation2 + $0x48] sm:$0xff] %v1028_v45  ;;  %v991_v50 = vadd.f32 %v1389_v46, %v1325_v43  ;;  %v1327_v51 = vpop.f32.mrf.mxu0  ;;  %v378_v46 = vld [vmem:[#allocation2 + $0x28] sm:$0xff] }
 0x140   : > { %v1328_v52 = vadd.f32 %v1327_v51, %v1326_v47  ;;  %v1391_v53 = vpop.f32.mrf.mxu1 }
 0x141   : > { %v1029_v54 = vadd.f32 %v991_v50, %v371_v48  ;;  %v1392_v55 = vadd.f32 %v1391_v53, %v1390_v49  ;;  %v1329_v56 = vpop.f32.mrf.mxu0 }
 0x142   : > { %v1393_v58 = vpop.f32.mrf.mxu1 }
 0x143   : > { %1045 = vst [vmem:[#allocation2 + $0x40] sm:$0xff] %v1029_v54  ;;  %v994_v59 = vadd.f32 %v1392_v55, %v1328_v52  ;;  %v1330_v60 = vpop.f32.mrf.mxu0 }
 0x144   : > { %v1331_v61 = vadd.f32 %v1330_v60, %v1329_v56  ;;  %v1394_v62 = vpop.f32.mrf.mxu1 }
 0x145   : > { %v1030_v63 = vadd.f32 %v994_v59, %v372_v57  ;;  %v1395_v0 = vadd.f32 %v1394_v62, %v1393_v58  ;;  %v1332_v1 = vpop.f32.mrf.mxu0 }
 0x146   : > { %v1396_v3 = vpop.f32.mrf.mxu1 }
 0x147   : > { %1046 = vst [vmem:[#allocation2 + $0x20] sm:$0xff] %v1030_v63  ;;  %v999_v4 = vadd.f32 %v1395_v0, %v1331_v61  ;;  %v1333_v5 = vpop.f32.mrf.mxu0 }
 0x148   : > { %v1334_v6 = vadd.f32 %v1333_v5, %v1332_v1  ;;  %v1397_v7 = vpop.f32.mrf.mxu1 }
 0x149   : > { %v1031_v8 = vadd.f32 %v999_v4, %v373_v2  ;;  %v1398_v9 = vadd.f32 %v1397_v7, %v1396_v3  ;;  %v1335_v10 = vpop.f32.mrf.mxu0 }
 0x14a   : > { %v1399_v12 = vpop.f32.mrf.mxu1 }
 0x14b   : > { %1047 = vst [vmem:[#allocation2 + $0x10] sm:$0xff] %v1031_v8  ;;  %v1002_v13 = vadd.f32 %v1398_v9, %v1334_v6  ;;  %v1336_v14 = vpop.f32.mrf.mxu0 }
 0x14c   : > { %v1337_v15 = vadd.f32 %v1336_v14, %v1335_v10  ;;  %v1400_v16 = vpop.f32.mrf.mxu1 }
 0x14d   : > { %v1032_v17 = vadd.f32 %v1002_v13, %v374_v11  ;;  %v1401_v18 = vadd.f32 %v1400_v16, %v1399_v12  ;;  %v1338_v19 = vpop.f32.mrf.mxu0 }
 0x14e   : > { %v1402_v21 = vpop.f32.mrf.mxu1 }
 0x14f   : > { %1048 = vst [vmem:[#allocation2 + $0x38] sm:$0xff] %v1032_v17  ;;  %v1007_v22 = vadd.f32 %v1401_v18, %v1337_v15  ;;  %v1339_v23 = vpop.f32.mrf.mxu0 }
 0x150   : > { %v1340_v24 = vadd.f32 %v1339_v23, %v1338_v19  ;;  %v1403_v25 = vpop.f32.mrf.mxu1 }
 0x151   : > { %v1033_v26 = vadd.f32 %v1007_v22, %v375_v20  ;;  %v1404_v27 = vadd.f32 %v1403_v25, %v1402_v21  ;;  %v1341_v28 = vpop.f32.mrf.mxu0 }
 0x152   : > { %v1405_v30 = vpop.f32.mrf.mxu1 }
 0x153   : > { %1049 = vst [vmem:[#allocation2 + $0x60] sm:$0xff] %v1033_v26  ;;  %v1010_v31 = vadd.f32 %v1404_v27, %v1340_v24  ;;  %v1342_v32 = vpop.f32.mrf.mxu0 }
 0x154   : > { %v1343_v33 = vadd.f32 %v1342_v32, %v1341_v28  ;;  %v1406_v34 = vpop.f32.mrf.mxu1 }
 0x155   : > { %v1034_v35 = vadd.f32 %v1010_v31, %v376_v29  ;;  %v1407_v36 = vadd.f32 %v1406_v34, %v1405_v30  ;;  %v1344_v37 = vpop.f32.mrf.mxu0 }
 0x156   : > { %v1408_v39 = vpop.f32.mrf.mxu1 }
 0x157   : > { %1050 = vst [vmem:[#allocation2 + $0x70] sm:$0xff] %v1034_v35  ;;  %v1015_v40 = vadd.f32 %v1407_v36, %v1343_v33  ;;  %v1345_v41 = vpop.f32.mrf.mxu0 }
 0x158   : > { %v1346_v42 = vadd.f32 %v1345_v41, %v1344_v37  ;;  %v1409_v43 = vpop.f32.mrf.mxu1 }
 0x159   : > { %v1035_v44 = vadd.f32 %v1015_v40, %v377_v38  ;;  %v1410_v45 = vadd.f32 %v1409_v43, %v1408_v39 }
 0x15b   : > { %1051 = vst [vmem:[#allocation2 + $0x78] sm:$0xff] %v1035_v44  ;;  %v1018_v47 = vadd.f32 %v1410_v45, %v1346_v42  ;;  %1056 = sbr.rel (%p1277_p11) target bundleno = 361 (0x169), region = 63 }
 0x15d   : > { %v1036_v48 = vadd.f32 %v1018_v47, %v378_v46 }
 0x15f   : > { %1052 = vst [vmem:[#allocation2 + $0x28] sm:$0xff] %v1036_v48 }
 0x160   : > { %v1057_v49 = vld [vmem:[#allocation2 + $0x30] sm:$0xff]  ;;  %v1058_v50 = vld [vmem:[#allocation2] sm:$0xff]  ;;  %v1059_v51 = vld [vmem:[#allocation2 + $0x58] sm:$0xff] }
 0x161   : > { %1073 = vst [vmem:[%s1848_s3] sm:$0xff] %v1057_v49  ;;  %1074 = vst [vmem:[%s1848_s3 + $0x8] sm:$0xff] %v1058_v50  ;;  %v1060_v52 = vld [vmem:[#allocation2 + $0x18] sm:$0xff]  ;;  %v1061_v53 = vld [vmem:[#allocation2 + $0x50] sm:$0xff] }
 0x162   : > { %1075 = vst [vmem:[%s1848_s3 + $0x10] sm:$0xff] %v1059_v51  ;;  %v1062_v54 = vld [vmem:[#allocation2 + $0x68] sm:$0xff]  ;;  %1076 = vst [vmem:[%s1848_s3 + $0x18] sm:$0xff] %v1060_v52  ;;  %v1065_v57 = vld [vmem:[#allocation2 + $0x40] sm:$0xff] }
 0x163   : > { %1077 = vst [vmem:[%s1848_s3 + $0x20] sm:$0xff] %v1061_v53  ;;  %1078 = vst [vmem:[%s1848_s3 + $0x28] sm:$0xff] %v1062_v54  ;;  %v1063_v55 = vld [vmem:[#allocation2 + $0x8] sm:$0xff]  ;;  %v1066_v58 = vld [vmem:[#allocation2 + $0x20] sm:$0xff] }
 0x164   : > { %v1064_v56 = vld [vmem:[#allocation2 + $0x48] sm:$0xff]  ;;  %1079 = vst [vmem:[%s1848_s3 + $0x30] sm:$0xff] %v1063_v55  ;;  %1081 = vst [vmem:[%s1848_s3 + $0x40] sm:$0xff] %v1065_v57  ;;  %v1067_v59 = vld [vmem:[#allocation2 + $0x10] sm:$0xff] }
 0x165   : > { %1080 = vst [vmem:[%s1848_s3 + $0x38] sm:$0xff] %v1064_v56  ;;  %v1068_v60 = vld [vmem:[#allocation2 + $0x38] sm:$0xff]  ;;  %1082 = vst [vmem:[%s1848_s3 + $0x48] sm:$0xff] %v1066_v58  ;;  %v1069_v61 = vld [vmem:[#allocation2 + $0x60] sm:$0xff] }
 0x166   : > { %1083 = vst [vmem:[%s1848_s3 + $0x50] sm:$0xff] %v1067_v59  ;;  %1084 = vst [vmem:[%s1848_s3 + $0x58] sm:$0xff] %v1068_v60  ;;  %v1070_v62 = vld [vmem:[#allocation2 + $0x70] sm:$0xff]  ;;  %v1071_v63 = vld [vmem:[#allocation2 + $0x78] sm:$0xff] }
 0x167   : > { %1085 = vst [vmem:[%s1848_s3 + $0x60] sm:$0xff] %v1069_v61  ;;  %1086 = vst [vmem:[%s1848_s3 + $0x68] sm:$0xff] %v1070_v62  ;;  %v1072_v0 = vld [vmem:[#allocation2 + $0x28] sm:$0xff] }
 0x168   : > { %1087 = vst [vmem:[%s1848_s3 + $0x70] sm:$0xff] %v1071_v63  ;;  %1088 = vst [vmem:[%s1848_s3 + $0x78] sm:$0xff] %v1072_v0 }
 0x169 PF: > { %s13_s16 = sadd.s32 1, %s1569_s16   ;;  %s1849_s12 = smov %s1557_s13 }
 0x16a   : > { %p10_p12 = scmp.ge.s32.totalorder %s13_s16, 4   ;;  %s1850_s13 = smov %s1626_s20 }
 0x16b   : > { %s1851_s14 = smov %s1565_s15  ;;  %s1852_s15 = smov %s1854_s17 }
 0x16c   :  { %12 = sbr.rel (!%p10_p12) target bundleno = 3 (0x3), region = 104 }

// kernel: tile.83
= control target key start
LH: loop header
LB: loop body
LE: loop exit
PB: predicated region body
PF: predicated region fallthrough
CT: control target
= control target key end

     0   :  { %s22_s0 = inlined_call_operand.vmem [shape: s32[32], index: 0, kind: input, shape index: {}]   ;;  %s23_s1 = inlined_call_operand.vmem [shape: s32[4,32], index: 1, kind: output, shape index: {}]  }
   0x1   :  { %v4_v0 = vld [vmem:[%s22_s0] ss:$0 sm:$0xff] }
   0x2   :  { %5 = vst [vmem:[%s23_s1] sm:$0xf] %v4_v0 }

// kernel: eq.36
= control target key start
LH: loop header
LB: loop body
LE: loop exit
PB: predicated region body
PF: predicated region fallthrough
CT: control target
= control target key end

     0   :  { %vm8_vm0 = vcmask 261120   ;;  %s40_s8 = smov 32   ;;  %s41_s9 = smov 64   ;;  %vm14_vm1 = vcmask 1048320   ;;  %vm20_vm2 = vcmask 785920   ;;  %vm26_vm3 = vcmask 523520   ;;  %s58_s0 = inlined_call_operand.vmem [shape: s32[4,32], index: 0, kind: input, shape index: {}]   ;;  %s59_s1 = inlined_call_operand.vmem [shape: s32[128], index: 1, kind: output, shape index: {}]  }
   0x1   :  { %v5_v0 = vld [vmem:[%s58_s0] sm:$0xf]  ;;  %s39_s0 = smov 96  }
   0x2   :  { %6 = vst [vmem:[#allocation1] sm:$0xf] %v5_v0 }
   0x9   :  { %v11_v1 = vld [vmem:[#allocation1 + $0x3] sm:$0x1]   ;;  %v23_v2 = vld [vmem:[#allocation1 + $0x1] sm:$0x1]   ;;  %v7_v3 = vld [vmem:[#allocation1] sm:$0x1]  }
   0xa   :  { %12 = vrot.lane.b32.xlu0 %v11_v1, %s39_s0  ;;  %24 = vrot.lane.b32.xlu1 %v23_v2, %s40_s8  ;;  %v17_v4 = vld [vmem:[#allocation1 + $0x2] sm:$0x1]   ;;  %9 = vst.msk [vmem:[#allocation0] sm:$0x1] %vm8_vm0, %v7_v3  }
   0xe   :  { %18 = vrot.lane.b32.xlu0 %v17_v4, %s41_s9 }
  0x7c   :  { %v13_v5 = vpop.permute.xlu0 %12   ;;  %v25_v6 = vpop.permute.xlu1 %24  }
  0x7d   :  { %15 = vst.msk [vmem:[#allocation0] sm:$0x1] %vm14_vm1, %v13_v5  }
  0x80   :  { %v19_v7 = vpop.permute.xlu0 %18  }
  0x81   :  { %21 = vst.msk [vmem:[#allocation0] sm:$0x1] %vm20_vm2, %v19_v7  }
  0x82   :  { %27 = vst.msk [vmem:[#allocation0] sm:$0x1] %vm26_vm3, %v25_v6  }
  0x89   :  { %v32_v8 = vld [vmem:[#allocation0] sm:$0x1] }
  0x8a   :  { %35 = vst [vmem:[%s59_s1] sm:$0x1] %v32_v8 }

// kernel: tile.89
= control target key start
LH: loop header
LB: loop body
LE: loop exit
PB: predicated region body
PF: predicated region fallthrough
CT: control target
= control target key end

     0   :  { %s22_s0 = inlined_call_operand.vmem [shape: f32[32], index: 0, kind: input, shape index: {}]   ;;  %s23_s1 = inlined_call_operand.vmem [shape: f32[4,32], index: 1, kind: output, shape index: {}]  }
   0x1   :  { %v4_v0 = vld [vmem:[%s22_s0] ss:$0 sm:$0xff] }
   0x2   :  { %5 = vst [vmem:[%s23_s1] sm:$0xf] %v4_v0 }

// kernel: tile.90
= control target key start
LH: loop header
LB: loop body
LE: loop exit
PB: predicated region body
PF: predicated region fallthrough
CT: control target
= control target key end

     0   :  { %vm8_vm0 = vcmask 261120   ;;  %s40_s8 = smov 32   ;;  %s41_s9 = smov 64   ;;  %vm14_vm1 = vcmask 1048320   ;;  %vm20_vm2 = vcmask 785920   ;;  %vm26_vm3 = vcmask 523520   ;;  %s58_s0 = inlined_call_operand.vmem [shape: f32[4,32], index: 0, kind: input, shape index: {}]   ;;  %s59_s1 = inlined_call_operand.vmem [shape: f32[1,128], index: 1, kind: output, shape index: {}]  }
   0x1   :  { %v5_v0 = vld [vmem:[%s58_s0] sm:$0xf]  ;;  %s39_s0 = smov 96  }
   0x2   :  { %6 = vst [vmem:[#allocation1] sm:$0xf] %v5_v0 }
   0x9   :  { %v11_v1 = vld [vmem:[#allocation1 + $0x3] sm:$0x1]   ;;  %v23_v2 = vld [vmem:[#allocation1 + $0x1] sm:$0x1]   ;;  %v7_v3 = vld [vmem:[#allocation1] sm:$0x1]  }
   0xa   :  { %12 = vrot.lane.b32.xlu0 %v11_v1, %s39_s0  ;;  %24 = vrot.lane.b32.xlu1 %v23_v2, %s40_s8  ;;  %v17_v4 = vld [vmem:[#allocation1 + $0x2] sm:$0x1]   ;;  %9 = vst.msk [vmem:[#allocation0] sm:$0x1] %vm8_vm0, %v7_v3  }
   0xe   :  { %18 = vrot.lane.b32.xlu0 %v17_v4, %s41_s9 }
  0x7c   :  { %v13_v5 = vpop.permute.xlu0 %12   ;;  %v25_v6 = vpop.permute.xlu1 %24  }
  0x7d   :  { %15 = vst.msk [vmem:[#allocation0] sm:$0x1] %vm14_vm1, %v13_v5  }
  0x80   :  { %v19_v7 = vpop.permute.xlu0 %18  }
  0x81   :  { %21 = vst.msk [vmem:[#allocation0] sm:$0x1] %vm20_vm2, %v19_v7  }
  0x82   :  { %27 = vst.msk [vmem:[#allocation0] sm:$0x1] %vm26_vm3, %v25_v6  }
  0x89   :  { %v32_v8 = vld [vmem:[#allocation0] sm:$0x1] }
  0x8a   :  { %35 = vst [vmem:[%s59_s1] sm:$0x1] %v32_v8 }

// kernel: sub_encoder_forward.12
= control target key start
LH: loop header
LB: loop body
LE: loop exit
PB: predicated region body
PF: predicated region fallthrough
CT: control target
= control target key end

     0   :  { %s619_s15 = smov 0   ;;  %s743_s0 = inlined_call_operand.vmem [shape: f32[2,16,128], index: 0, kind: input, shape index: {}]   ;;  %s744_s1 = inlined_call_operand.vmem [shape: f32[128,128], index: 1, kind: input, shape index: {}]   ;;  %s745_s2 = inlined_call_operand.vmem [shape: f32[1,128], index: 2, kind: input, shape index: {}]   ;;  %s746_s3 = inlined_call_operand.vmem [shape: f32[1,128], index: 3, kind: input, shape index: {}]   ;;  %s747_s4 = inlined_call_operand.vmem [shape: f32[2,16,128], index: 4, kind: output, shape index: {}]  }
   0x1 LB: > { %s455_s16 = sadd.s32 4294967295, %s590_s15   ;;  %p459_p0 = scmp.ge.s32.totalorder %s590_s15, 1  ;;  %s590_s15 = sphi %s619_s15, %s14_s15  }
   0x2   : > { %p162_p1 = scmp.lt.s32.totalorder %s590_s15, 3 }
   0x4   : > { %p163_p2 = pnand %p459_p0, %p162_p1 }
   0x5   : > { %p188_p3 = scmp.lt.s32.totalorder (!%p163_p2), %s455_s16, 1 }
   0x6   : > { %166 = sbr.rel (%p163_p2) target bundleno = 273 (0x111), region = 36 }
   0xb   : > { %v231_v0 = vld [vmem:[%s744_s1 + $0x78] sm:$0xff]  ;;  %v592_v1 = vmov 0.0   ;;  %v230_v2 = vld [vmem:[%s744_s1 + $0x70] sm:$0xff]  ;;  %s749_s16 = smov (!%p188_p3, %s455_s16), 1  ;;  %v229_v3 = vld [vmem:[%s744_s1 + $0x68] sm:$0xff]  ;;  %vm593_vm0 = vmmov 0   ;;  %v382_v43 = vlaneseq }
   0xc   : > { %502 = vmatprep.subr.mxu0 %v592_v1  ;;  %537 = vmatprep.subr.mxu1 %v592_v1  ;;  %s466_s23 = sshll.u32 %s749_s16, 4  ;;  %v228_v4 = vld [vmem:[%s744_s1 + $0x60] sm:$0xff]  ;;  %v227_v7 = vld [vmem:[%s744_s1 + $0x58] sm:$0xff]  ;;  %v226_v11 = vld [vmem:[%s744_s1 + $0x50] sm:$0xff] }
   0xd   : > { %503 = vmatpush3.msra.mxu0 %v231_v0  ;;  %538 = vmatpush3.msra.mxu1 %v231_v0  ;;  %s192_s28 = scalar_lea.vmem %s743_s0, %s466_s23  ;;  %v225_v14 = vld [vmem:[%s744_s1 + $0x48] sm:$0xff]  ;;  %v224_v16 = vld [vmem:[%s744_s1 + $0x40] sm:$0xff]  ;;  %v223_v19 = vld [vmem:[%s744_s1 + $0x38] sm:$0xff]  ;;  %v383_v44 = vshrl.u32 %v382_v43, 7  ;;  %s197_s10 = scalar_lea.vmem %s747_s4, %s466_s23 }
   0xe   : > { %504 = vmatprep.subr.mxu0 %v592_v1  ;;  %539 = vmatprep.subr.mxu1 %v592_v1  ;;  %v653_v5 = vld [vmem:[%s192_s28] sm:$0xff]  ;;  %v655_v6 = vld [vmem:[%s192_s28 + $0x8] sm:$0xff]  ;;  %v222_v20 = vld [vmem:[%s744_s1 + $0x30] sm:$0xff] }
   0xf   : > { %505 = vmatpush3.msra.mxu0 %v230_v2  ;;  %540 = vmatpush3.msra.mxu1 %v230_v2  ;;  %v200_v8 = vadd.f32 %v655_v6, %v653_v5  ;;  %v207_v9 = vmul.f32 %v653_v5, %v653_v5  ;;  %v208_v10 = vmul.f32 %v655_v6, %v655_v6  ;;  %v221_v23 = vld [vmem:[%s744_s1 + $0x28] sm:$0xff]  ;;  %v220_v24 = vld [vmem:[%s744_s1 + $0x20] sm:$0xff]  ;;  %v219_v27 = vld [vmem:[%s744_s1 + $0x18] sm:$0xff]  ;;  %v384_v46 = vsub.s32 0, %v383_v44 }
  0x10   : > { %506 = vmatprep.subr.mxu0 %v592_v1  ;;  %541 = vmatprep.subr.mxu1 %v592_v1  ;;  %v218_v28 = vld [vmem:[%s744_s1 + $0x10] sm:$0xff]  ;;  %v217_v31 = vld [vmem:[%s744_s1 + $0x8] sm:$0xff]  ;;  %v216_v32 = vld [vmem:[%s744_s1] sm:$0xff] }
  0x11   : > { %507 = vmatpush3.msra.mxu0 %v229_v3  ;;  %542 = vmatpush3.msra.mxu1 %v229_v3  ;;  %v209_v12 = vadd.f32 %v208_v10, %v207_v9  ;;  %v201_v13 = vrot.slane %v200_v8, 4  ;;  %v377_v45 = vld [vmem:[%s745_s2] sm:$0x1] }
  0x12   : > { %508 = vmatprep.subr.mxu0 %v592_v1  ;;  %543 = vmatprep.subr.mxu1 %v592_v1  ;;  %v379_v49 = vld [vmem:[%s746_s3] sm:$0x1] }
  0x13   : > { %509 = vmatpush3.msra.mxu0 %v228_v4  ;;  %544 = vmatpush3.msra.mxu1 %v228_v4  ;;  %v210_v15 = vrot.slane %v209_v12, 4  ;;  %v202_v17 = vadd.f32 %v201_v13, %v200_v8 }
  0x14   : > { %510 = vmatprep.subr.mxu0 %v592_v1  ;;  %545 = vmatprep.subr.mxu1 %v592_v1 }
  0x15   : > { %511 = vmatpush3.msra.mxu0 %v227_v7  ;;  %546 = vmatpush3.msra.mxu1 %v227_v7  ;;  %v211_v18 = vadd.f32 %v210_v15, %v209_v12  ;;  %v203_v21 = vrot.slane %v202_v17, 2 }
  0x16   : > { %512 = vmatprep.subr.mxu0 %v592_v1  ;;  %547 = vmatprep.subr.mxu1 %v592_v1 }
  0x17   : > { %513 = vmatpush3.msra.mxu0 %v226_v11  ;;  %548 = vmatpush3.msra.mxu1 %v226_v11  ;;  %v212_v22 = vrot.slane %v211_v18, 2  ;;  %v204_v25 = vadd.f32 %v203_v21, %v202_v17 }
  0x18   : > { %514 = vmatprep.subr.mxu0 %v592_v1  ;;  %549 = vmatprep.subr.mxu1 %v592_v1 }
  0x19   : > { %515 = vmatpush3.msra.mxu0 %v225_v14  ;;  %550 = vmatpush3.msra.mxu1 %v225_v14  ;;  %v213_v26 = vadd.f32 %v212_v22, %v211_v18  ;;  %v205_v29 = vrot.slane %v204_v25, 1 }
  0x1a   : > { %516 = vmatprep.subr.mxu0 %v592_v1  ;;  %551 = vmatprep.subr.mxu1 %v592_v1 }
  0x1b   : > { %517 = vmatpush3.msra.mxu0 %v224_v16  ;;  %552 = vmatpush3.msra.mxu1 %v224_v16  ;;  %v214_v30 = vrot.slane %v213_v26, 1  ;;  %v206_v33 = vadd.f32 %v205_v29, %v204_v25 }
  0x1c   : > { %518 = vmatprep.subr.mxu0 %v592_v1  ;;  %553 = vmatprep.subr.mxu1 %v592_v1 }
  0x1d   : > { %519 = vmatpush3.msra.mxu0 %v223_v19  ;;  %554 = vmatpush3.msra.mxu1 %v223_v19  ;;  %v215_v34 = vadd.f32 %v214_v30, %v213_v26 }
  0x1e   : > { %520 = vmatprep.subr.mxu0 %v592_v1  ;;  %555 = vmatprep.subr.mxu1 %v592_v1 }
  0x1f   : > { %521 = vmatpush3.msra.mxu0 %v222_v20  ;;  %556 = vmatpush3.msra.mxu1 %v222_v20 }
  0x20   : > { %522 = vmatprep.subr.mxu0 %v592_v1  ;;  %557 = vmatprep.subr.mxu1 %v592_v1 }
  0x21   : > { %523 = vmatpush3.msra.mxu0 %v221_v23  ;;  %558 = vmatpush3.msra.mxu1 %v221_v23 }
  0x22   : > { %524 = vmatprep.subr.mxu0 %v592_v1  ;;  %559 = vmatprep.subr.mxu1 %v592_v1 }
  0x23   : > { %525 = vmatpush3.msra.mxu0 %v220_v24  ;;  %560 = vmatpush3.msra.mxu1 %v220_v24 }
  0x24   : > { %526 = vmatprep.subr.mxu0 %v592_v1  ;;  %561 = vmatprep.subr.mxu1 %v592_v1 }
  0x25   : > { %527 = vmatpush3.msra.mxu0 %v219_v27  ;;  %562 = vmatpush3.msra.mxu1 %v219_v27 }
  0x26   : > { %528 = vmatprep.subr.mxu0 %v592_v1  ;;  %563 = vmatprep.subr.mxu1 %v592_v1 }
  0x27   : > { %529 = vmatpush3.msra.mxu0 %v218_v28  ;;  %564 = vmatpush3.msra.mxu1 %v218_v28 }
  0x28   : > { %530 = vmatprep.subr.mxu0 %v592_v1  ;;  %565 = vmatprep.subr.mxu1 %v592_v1 }
  0x29   : > { %531 = vmatpush3.msra.mxu0 %v217_v31  ;;  %566 = vmatpush3.msra.mxu1 %v217_v31 }
  0x2a   : > { %532 = vmatprep.subr.mxu0 %v592_v1  ;;  %567 = vmatprep.subr.mxu1 %v592_v1 }
  0x2b   : > { %533 = vmatpush3.msra.mxu0 %v216_v32  ;;  %534 = vmatprep.mubr.msk.f32.mxu0 %vm593_vm0, %v592_v1 }
  0x2c   : > { %568 = vmatpush3.msra.mxu1 %v216_v32  ;;  %569 = vmatprep.mubr.msk.f32.mxu1 %vm593_vm0, %v592_v1 }
  0x2d   : > { %535 = vmatmul.mubr.f32.vlgmr.msra.gmra.mxu0 %v206_v33  ;;  %570 = vmatmul.mubr.f32.vlgmr.msra.gmra.mxu1 %v215_v34 }
  0xed   : > { %v298_v35 = vpop.f32.mrf.mxu0  ;;  %v368_v36 = vpop.f32.mrf.mxu1 }
  0xee   : > { %v372_v37 = vmul.f32 %v298_v35, %v298_v35 }
  0xef   : > { %v536_v38 = vpop.f32.mrf.mxu0  ;;  %v571_v39 = vpop.f32.mrf.mxu1 }
  0xf0   : > { %v373_v40 = vsub.f32 %v368_v36, %v372_v37 }
  0xf2   : > { %v374_v41 = vmax.f32 %v373_v40, 0.0 }
  0xf4   : > { %v375_v42 = vadd.f32 1e-05, %v374_v41 }
  0xf6   : > { %582 = vrsqrt.f32 %v375_v42 }
 0x103   : > { %v583_v47 = vpop.eup %582 }
 0x104   : > { %v378_v48 = vmul.f32 %v583_v47, %v377_v45 }
 0x106   : > { %v380_v50 = vmul.f32 %v378_v48, %v298_v35  ;;  %v385_v51 = vrot.slane %v378_v48, %v384_v46 }
 0x108   : > { %v381_v52 = vsub.f32 %v379_v49, %v380_v50  ;;  %v386_v53 = vmul.f32 %v385_v51, %v653_v5  ;;  %v387_v54 = vmul.f32 %v385_v51, %v655_v6 }
 0x10a   : > { %v392_v55 = vrot.slane %v381_v52, %v384_v46 }
 0x10c   : > { %v394_v56 = vadd.f32 %v392_v55, %v386_v53  ;;  %v395_v57 = vadd.f32 %v392_v55, %v387_v54 }
 0x10e   : > { %v396_v58 = vmax.f32 %v394_v56, 0.0  ;;  %v397_v59 = vmax.f32 %v395_v57, 0.0 }
 0x110   : > { %398 = vst [vmem:[%s197_s10] sm:$0xff] %v396_v58  ;;  %399 = vst [vmem:[%s197_s10 + $0x8] sm:$0xff] %v397_v59 }
 0x111 PF: > { %s14_s15 = sadd.s32 1, %s590_s15  }
 0x112   : > { %p11_p4 = scmp.ge.s32.totalorder %s14_s15, 4  }
 0x114   :  { %13 = sbr.rel (!%p11_p4) target bundleno = 1 (0x1), region = 66 }

// kernel: sub_encoder_forward.13
= control target key start
LH: loop header
LB: loop body
LE: loop exit
PB: predicated region body
PF: predicated region fallthrough
CT: control target
= control target key end

     0   :  { %s937_s12 = smov 0   ;;  %s939_s13 = smov 0   ;;  %s1020_s0 = inlined_call_operand.vmem [shape: bf16[8,2048], index: 0, kind: input, shape index: {}]   ;;  %s1021_s1 = inlined_call_operand.vmem [shape: bf16[2048,128], index: 1, kind: input, shape index: {}]   ;;  %s1022_s2 = inlined_call_operand.vmem [shape: f32[1,128], index: 2, kind: input, shape index: {}]   ;;  %s1023_s3 = inlined_call_operand.vmem [shape: f32[8,128], index: 3, kind: output, shape index: {}]  }
   0x1   :  { %s941_s14 = smov 0  }
   0x2 LB: > { %s25_s15 = sadd.s32 1, %s911_s13  ;;  %p742_p0 = scmp.ge.s32.totalorder %s915_s14, 1  ;;  %s915_s14 = sphi %s941_s14, %s13_s14   ;;  %s911_s13 = sphi %s939_s13, %s1025_s13   ;;  %s907_s12 = sphi %s937_s12, %s1024_s12  }
   0x3   : > { %p26_p1 = scmp.ge.s32.totalorder %s25_s15, 4  ;;  %p189_p2 = scmp.lt.s32.totalorder %s915_s14, 5 }
   0x5   : > { %s1027_s15 = smov (%p26_p1, %s25_s15), 0  ;;  %p190_p3 = pnand %p742_p0, %p189_p2 }
   0x6   : > { %s743_s16 = sshll.u32 (!%p190_p3), %s907_s12, 2  ;;  %s745_s17 = sshll.u32 (!%p190_p3), %s907_s12, 6 }
   0x7   : > { %193 = sbr.rel (%p190_p3) target bundleno = 267 (0x10b), region = 32  ;;  %p233_p4 = scmp.lt.s32.totalorder (!%p190_p3), %s743_s16, 15 }
   0x8   : > { %p241_p5 = scmp.lt.s32.totalorder (!%p190_p3), %s745_s17, 255  ;;  %p747_p6 = scmp.ne.s32.totalorder (!%p190_p3), %s907_s12, 0 }
   0xc   : > { %s1029_s16 = smov (!%p233_p4, %s743_s16), 15  ;;  %s1031_s17 = smov (!%p241_p5, %s745_s17), 255 }
   0xd   : > { %s744_s18 = sshll.u32 %s1029_s16, 2  ;;  %s746_s22 = sshll.u32 %s1031_s17, 2 }
   0xe   : > { %s962_s21 = scalar_lea.vmem %s1020_s0, %s744_s18  ;;  %s967_s25 = scalar_lea.vmem %s1021_s1, %s746_s22 }
   0xf   : > { %263 = sbr.rel (%p747_p6) target bundleno = 22 (0x16), region = 36 }
  0x14   : > { %v748_v0 = vld [vmem:[%s1022_s2] ss:$0 sm:$0xff] }
  0x15   : > { %271 = vst [vmem:[#allocation2] sm:$0xff] %v748_v0 }
  0x16 PF: > { %v857_v1 = vld [vmem:[%s967_s25 + $0x78] sm:$0xff]   ;;  %v861_v5 = vld [vmem:[%s967_s25 + $0x70] sm:$0xff]   ;;  %v865_v9 = vld [vmem:[%s967_s25 + $0x68] sm:$0xff]   ;;  %p785_p7 = scmp.ne.s32.totalorder %s907_s12, 3 }
  0x17   : > { %v858_v2 = vld [vmem:[%s967_s25 + $0xf8] sm:$0xff]   ;;  %789 = vmatprep.subr.bf16.mxu0 %v857_v1  ;;  %v862_v6 = vld [vmem:[%s967_s25 + $0xf0] sm:$0xff]   ;;  %v866_v10 = vld [vmem:[%s967_s25 + $0xe8] sm:$0xff]  }
  0x18   : > { %v859_v3 = vld [vmem:[%s967_s25 + $0x38] sm:$0xff]   ;;  %811 = vmatprep.subr.bf16.mxu1 %v858_v2  ;;  %v863_v7 = vld [vmem:[%s967_s25 + $0x30] sm:$0xff]   ;;  %v867_v11 = vld [vmem:[%s967_s25 + $0x28] sm:$0xff]  }
  0x19   : > { %v860_v4 = vld [vmem:[%s967_s25 + $0xb8] sm:$0xff]   ;;  %790 = vmatpush3.bf16.msra.mxu0 %v859_v3  ;;  %v864_v8 = vld [vmem:[%s967_s25 + $0xb0] sm:$0xff]   ;;  %v868_v12 = vld [vmem:[%s967_s25 + $0xa8] sm:$0xff]  }
  0x1a   : > { %812 = vmatpush3.bf16.msra.mxu1 %v860_v4  ;;  %791 = vmatprep.subr.bf16.mxu0 %v861_v5  ;;  %v869_v13 = vld [vmem:[%s967_s25 + $0x60] sm:$0xff]   ;;  %v873_v17 = vld [vmem:[%s967_s25 + $0x58] sm:$0xff]   ;;  %v877_v21 = vld [vmem:[%s967_s25 + $0x50] sm:$0xff]  }
  0x1b   : > { %813 = vmatprep.subr.bf16.mxu1 %v862_v6  ;;  %v870_v14 = vld [vmem:[%s967_s25 + $0xe0] sm:$0xff]   ;;  %v874_v18 = vld [vmem:[%s967_s25 + $0xd8] sm:$0xff]   ;;  %v878_v22 = vld [vmem:[%s967_s25 + $0xd0] sm:$0xff]  }
  0x1c   : > { %v871_v15 = vld [vmem:[%s967_s25 + $0x20] sm:$0xff]   ;;  %v875_v19 = vld [vmem:[%s967_s25 + $0x18] sm:$0xff]   ;;  %v879_v23 = vld [vmem:[%s967_s25 + $0x10] sm:$0xff]  }
  0x1d   : > { %792 = vmatpush3.bf16.msra.mxu0 %v863_v7  ;;  %v872_v16 = vld [vmem:[%s967_s25 + $0xa0] sm:$0xff]   ;;  %v876_v20 = vld [vmem:[%s967_s25 + $0x98] sm:$0xff]   ;;  %v880_v24 = vld [vmem:[%s967_s25 + $0x90] sm:$0xff]  }
  0x1e   : > { %814 = vmatpush3.bf16.msra.mxu1 %v864_v8  ;;  %793 = vmatprep.subr.bf16.mxu0 %v865_v9  ;;  %v881_v25 = vld [vmem:[%s967_s25 + $0x48] sm:$0xff]   ;;  %v885_v29 = vld [vmem:[%s967_s25 + $0x40] sm:$0xff]  }
  0x1f   : > { %815 = vmatprep.subr.bf16.mxu1 %v866_v10  ;;  %v882_v26 = vld [vmem:[%s967_s25 + $0xc8] sm:$0xff]   ;;  %v886_v30 = vld [vmem:[%s967_s25 + $0xc0] sm:$0xff]  }
  0x20   : > { %v883_v27 = vld [vmem:[%s967_s25 + $0x8] sm:$0xff]   ;;  %v887_v31 = vld [vmem:[%s967_s25] sm:$0xff]  }
  0x21   : > { %794 = vmatpush3.bf16.msra.mxu0 %v867_v11  ;;  %v884_v28 = vld [vmem:[%s967_s25 + $0x88] sm:$0xff]   ;;  %v888_v32 = vld [vmem:[%s967_s25 + $0x80] sm:$0xff]  }
  0x22   : > { %816 = vmatpush3.bf16.msra.mxu1 %v868_v12  ;;  %795 = vmatprep.subr.bf16.mxu0 %v869_v13  ;;  %v273_v33 = vld [vmem:[%s962_s21] sm:$0xff]  ;;  %v274_v34 = vld [vmem:[%s962_s21 + $0x8] sm:$0xff] }
  0x23   : > { %817 = vmatprep.subr.bf16.mxu1 %v870_v14  ;;  %v749_v35 = vcombine.low %v273_v33, %v273_v33  ;;  %v750_v36 = vcombine.high %v273_v33, %v273_v33  ;;  %v751_v37 = vcombine.low %v274_v34, %v274_v34  ;;  %v752_v38 = vcombine.high %v274_v34, %v274_v34  ;;  %v272_v45 = vld [vmem:[#allocation2] sm:$0xff] }
  0x25   : > { %796 = vmatpush3.bf16.msra.mxu0 %v871_v15  ;;  %577 = vmatprep.mubr.bf16.mxu0 %v750_v36 }
  0x26   : > { %818 = vmatpush3.bf16.msra.mxu1 %v872_v16  ;;  %797 = vmatprep.subr.bf16.mxu0 %v873_v17 }
  0x27   : > { %819 = vmatprep.subr.bf16.mxu1 %v874_v18  ;;  %617 = vmatprep.mubr.bf16.mxu1 %v752_v38 }
  0x29   : > { %798 = vmatpush3.bf16.msra.mxu0 %v875_v19 }
  0x2a   : > { %820 = vmatpush3.bf16.msra.mxu1 %v876_v20  ;;  %799 = vmatprep.subr.bf16.mxu0 %v877_v21 }
  0x2b   : > { %821 = vmatprep.subr.bf16.mxu1 %v878_v22 }
  0x2d   : > { %800 = vmatpush3.bf16.msra.mxu0 %v879_v23 }
  0x2e   : > { %822 = vmatpush3.bf16.msra.mxu1 %v880_v24  ;;  %801 = vmatprep.subr.bf16.mxu0 %v881_v25 }
  0x2f   : > { %823 = vmatprep.subr.bf16.mxu1 %v882_v26 }
  0x31   : > { %802 = vmatpush3.bf16.msra.mxu0 %v883_v27 }
  0x32   : > { %824 = vmatpush3.bf16.msra.mxu1 %v884_v28  ;;  %803 = vmatprep.subr.bf16.mxu0 %v885_v29 }
  0x33   : > { %825 = vmatprep.subr.bf16.mxu1 %v886_v30 }
  0x35   : > { %804 = vmatpush3.bf16.msra.mxu0 %v887_v31 }
  0x36   : > { %826 = vmatpush3.bf16.msra.mxu1 %v888_v32 }
  0x38   : > { %578 = vmatmul.mubr.bf16.vlgmr.msra.gmra.mxu0 %v749_v35 }
  0x39   : > { %618 = vmatmul.mubr.bf16.vlgmr.msra.gmra.mxu1 %v751_v37 }
  0xf8   : > { %v805_v39 = vpop.f32.mrf.mxu0 }
  0xf9   : > { %v827_v40 = vpop.f32.mrf.mxu1 }
  0xfa   : > { %v806_v41 = vpop.f32.mrf.mxu0 }
  0xfb   : > { %v828_v42 = vpop.f32.mrf.mxu1  ;;  %v807_v43 = vadd.f32 %v806_v41, %v805_v39 }
  0xfc   : > { %v829_v44 = vadd.f32 %v828_v42, %v827_v40  ;;  %v808_v46 = vpop.f32.mrf.mxu0 }
  0xfd   : > { %v830_v47 = vpop.f32.mrf.mxu1 }
  0xfe   : > { %v620_v48 = vadd.f32 %v829_v44, %v807_v43  ;;  %v809_v49 = vpop.f32.mrf.mxu0  ;;  %630 = sbr.rel (%p785_p7) target bundleno = 267 (0x10b), region = 40 }
  0xff   : > { %v831_v50 = vpop.f32.mrf.mxu1 }
 0x100   : > { %v625_v51 = vadd.f32 %v620_v48, %v272_v45 }
 0x102   : > { %626 = vst [vmem:[#allocation2] sm:$0xff] %v625_v51 }
 0x109   : > { %v631_v52 = vld [vmem:[#allocation2] sm:$0xff] }
 0x10a   : > { %632 = vst [vmem:[%s1023_s3] sm:$0xff] %v631_v52 }
 0x10b PF: > { %s13_s14 = sadd.s32 1, %s915_s14   ;;  %s1024_s12 = smov %s911_s13 }
 0x10c   : > { %p10_p8 = scmp.ge.s32.totalorder %s13_s14, 6   ;;  %s1025_s13 = smov %s1027_s15 }
 0x10e   :  { %12 = sbr.rel (!%p10_p8) target bundleno = 2 (0x2), region = 76 }

</bundles_post_ra>
